<compile_context>
chip_gen: v6e
topology: v6e:2x2x1
jax: 0.10.0
libtpu: 0.0.40
codegen_flags: <defaults>
</compile_context>

<pallas_src>
import functools

import jax
import jax.numpy as jnp
import numpy as np
from jax.experimental import pallas as pl
from jax.experimental.pallas import tpu as pltpu


def _round_up(x, m):
    return ((x + m - 1) // m) * m


# ----------------------------------------------------------------------------- Pallas kernel
def _gemm_bias_act_kernel(p_ref, w_ref, b_ref, o_ref, acc_ref, *, negative_slope):
    """Tiled fused conv hot path: bf16 GEMM accumulated in an f32 VMEM scratch tile;
    bias + optional LeakyReLU applied once on the final K step, then stored (bf16/f32)."""
    k = pl.program_id(2)

    @pl.when(k == 0)
    def _init():
        acc_ref[...] = jnp.zeros_like(acc_ref)

    acc_ref[...] += jnp.dot(p_ref[...], w_ref[...], preferred_element_type=jnp.float32)

    @pl.when(k == pl.num_programs(2) - 1)
    def _finalize():
        out = acc_ref[...] + b_ref[...]  # (TM,TN) + (1,TN): broadcast once per output tile
        if negative_slope is not None:
            out = jnp.where(out >= 0.0, out, negative_slope * out)
        o_ref[...] = out.astype(o_ref.dtype)


def gemm_bias_act(patches, w_mat, bias, negative_slope=None, out_dtype=jnp.bfloat16):
    """patches (M,K) bf16, w_mat (K,Cout) f32, bias (Cout,) f32 -> (M,Cout) out_dtype."""
    M, K = patches.shape
    Cout = w_mat.shape[1]

    # Tile sizes: 128-aligned (lane-dense, (8,128)-legal, MXU-friendly), clamped to the
    # (rounded-up) problem size.  Full-width TN (<=512) streams the patches tile once per
    # (i,k); big TK reduces f32 accumulator read-modify-write passes.
    TM = min(1024, _round_up(M, 128))
    TN = min(512, _round_up(Cout, 128))
    TK = min(1024, _round_up(K, 128))

    Mp, Kp, Np = _round_up(M, TM), _round_up(K, TK), _round_up(Cout, TN)

    # Conv glue guarantees K is a multiple of 128 (channel-padded x), so normally Kp == K and
    # only a small M row-pad remains; XLA fuses it into the im2col producer fusion under jit.
    p_b = patches.astype(jnp.bfloat16)
    if (Mp, Kp) != (M, K):
        p_b = jnp.pad(p_b, ((0, Mp - M), (0, Kp - K)))
    w_b = jnp.pad(w_mat.astype(jnp.bfloat16), ((0, Kp - K), (0, Np - Cout)))
    b_b = jnp.pad(bias.astype(jnp.float32), (0, Np - Cout)).reshape(1, Np)

    grid = (Mp // TM, Np // TN, Kp // TK)
    kernel = functools.partial(_gemm_bias_act_kernel, negative_slope=negative_slope)

    # VMEM budget from actual buffer sizes (double-buffered bf16 inputs, double-buffered
    # output, f32 accumulator) + headroom; capped below v7x's 64 MiB physical VMEM.
    out_bytes = jnp.dtype(out_dtype).itemsize
    vmem_bytes = (2 * TM * TK * 2 + 2 * TK * TN * 2 + 2 * 8 * TN * 4
                  + 2 * TM * TN * out_bytes + TM * TN * 4)
    vmem_limit = min(64 * 1024 * 1024, max(32 * 1024 * 1024, 2 * vmem_bytes))

    out = pl.pallas_call(
        kernel,
        out_shape=jax.ShapeDtypeStruct((Mp, Np), out_dtype),
        grid_spec=pltpu.PrefetchScalarGridSpec(
            num_scalar_prefetch=0,
            grid=grid,
            in_specs=[
                pl.BlockSpec((TM, TK), lambda i, j, k: (i, k)),   # patches tile
                pl.BlockSpec((TK, TN), lambda i, j, k: (k, j)),   # weight tile
                pl.BlockSpec((1, TN), lambda i, j, k: (0, j)),    # bias tile (k-invariant)
            ],
            out_specs=pl.BlockSpec((TM, TN), lambda i, j, k: (i, j)),
            scratch_shapes=[pltpu.VMEM((TM, TN), jnp.float32)],
        ),
        compiler_params=pltpu.CompilerParams(
            dimension_semantics=("parallel", "parallel", "arbitrary"),
            vmem_limit_bytes=vmem_limit,
        ),
        cost_estimate=pl.CostEstimate(
            flops=2 * Mp * Kp * Np,
            transcendentals=0,
            bytes_accessed=Mp * Kp * 2 + Kp * Np * 2 + Mp * Np * out_bytes,
        ),
    )(p_b, w_b, b_b)
    return out[:M, :Cout]


# ----------------------------------------------------------------------------- conv glue
def _im2col(x_nhwc, k, stride, pad):
    """Extract kxk patches -> (N*Hout*Wout, k*k*C), K-axis ordered (kh, kw, cin). Kept in the
    input dtype (bf16) so the 16x-expanded matrix costs half the HBM bytes."""
    N, H, W, C = x_nhwc.shape
    xp = jnp.pad(x_nhwc, ((0, 0), (pad, pad), (pad, pad), (0, 0)))
    Hout = (H + 2 * pad - k) // stride + 1
    Wout = (W + 2 * pad - k) // stride + 1
    cols = []
    for kh in range(k):
        for kw in range(k):
            sl = jax.lax.slice(
                xp,
                (0, kh, kw, 0),
                (N, kh + stride * (Hout - 1) + 1, kw + stride * (Wout - 1) + 1, C),
                (1, stride, stride, 1),
            )  # (N, Hout, Wout, C)
            cols.append(sl)
    p = jnp.stack(cols, axis=3)  # (N, Hout, Wout, k*k, C)
    return p.reshape(N * Hout * Wout, k * k * C), (N, Hout, Wout)


def conv2d_pallas(x_nhwc, w_oihw, bias, stride, pad, leaky, out_dtype=jnp.bfloat16):
    """Conv2d(k=4) matching PyTorch NCHW/OIHW semantics, activations kept NHWC bf16."""
    Cout, Cin, kh, kw = w_oihw.shape
    # Zero-pad Cin (and the weight's Cin) to a multiple of 8 so K = 16*Cin is 128-aligned and
    # the patches matrix never needs a K pad pass; extra channels contribute exact zeros.
    Cin_p = _round_up(Cin, 8)
    if Cin_p != Cin:
        x_nhwc = jnp.pad(x_nhwc, ((0, 0), (0, 0), (0, 0), (0, Cin_p - Cin)))
        w_oihw = jnp.pad(w_oihw, ((0, 0), (0, Cin_p - Cin), (0, 0), (0, 0)))
    patches, (N, Hout, Wout) = _im2col(x_nhwc.astype(jnp.bfloat16), kh, stride, pad)
    # Reorder weight so its K axis matches the patch ordering (kh, kw, cin).
    w_mat = jnp.transpose(w_oihw, (2, 3, 1, 0)).reshape(kh * kw * Cin_p, Cout)
    b = bias if bias is not None else jnp.zeros((Cout,), jnp.float32)
    out = gemm_bias_act(patches, w_mat, b, 0.2 if leaky else None, out_dtype=out_dtype)
    return out.reshape(N, Hout, Wout, Cout)


# ----------------------------------------------------------------------------- spectral norm (weight prep)
def _l2normalize(v, eps=1e-12):
    return v / (jnp.linalg.norm(v) + eps)


def spectral_norm_weight(w_bar, u, v, power_iterations=1):
    # Replicates PyTorch flow: compute_weight() runs once in SpectralNorm.apply() and once
    # in the forward pre-hook => 2 power iterations total at the first forward, then
    # sigma = u . (W v), W_eff = W_bar / sigma.
    # TODO(synk): PyTorch mutates u/v buffers every forward (stateful); here they restart from
    #             the stored u/v, matching only the first PyTorch forward.
    h = w_bar.shape[0]
    wm = w_bar.reshape(h, -1)
    for _ in range(2 * power_iterations):
        v = _l2normalize(wm.T @ u)
        u = _l2normalize(wm @ v)
    sigma = jnp.dot(u, wm @ v)
    return w_bar / sigma


# ----------------------------------------------------------------------------- model
def build_layer_configs(input_nc=3, ndf=64, n_layers=3, norm_layer=None):
    use_bias = norm_layer == "instance"  # default norm_layer=None -> False (matches PyTorch code)
    cfg = [dict(cin=input_nc, cout=ndf, stride=2, bias=True, sn=True, leaky=True)]
    nf_mult = 1
    for n in range(1, n_layers):
        nf_prev, nf_mult = nf_mult, min(2 ** n, 8)
        cfg.append(dict(cin=ndf * nf_prev, cout=ndf * nf_mult, stride=2,
                        bias=use_bias, sn=True, leaky=True))
    nf_prev, nf_mult = nf_mult, min(2 ** n_layers, 8)
    cfg.append(dict(cin=ndf * nf_prev, cout=ndf * nf_mult, stride=1,
                    bias=use_bias, sn=True, leaky=True))
    cfg.append(dict(cin=ndf * nf_mult, cout=1, stride=1, bias=True, sn=False, leaky=False))
    return cfg


def init_params(key, cfg):
    params = []
    for layer in cfg:
        key, kw_, kb_, ku_, kv_ = jax.random.split(key, 5)
        cin, cout = layer["cin"], layer["cout"]
        fan_in = cin * 4 * 4
        w = jax.random.normal(kw_, (cout, cin, 4, 4), jnp.float32) / np.sqrt(fan_in)
        b = (jax.random.normal(kb_, (cout,), jnp.float32) * 0.01) if layer["bias"] else None
        u = jax.random.normal(ku_, (cout,), jnp.float32)
        v = jax.random.normal(kv_, (cin * 4 * 4,), jnp.float32)
        params.append(dict(cfg=layer, w=w, b=b, u=u, v=v))
    return params


def nlayer_discriminator_forward(x_nchw, params):
    x = jnp.transpose(x_nchw, (0, 2, 3, 1)).astype(jnp.bfloat16)  # NCHW -> NHWC bf16
    n = len(params)
    for idx, p in enumerate(params):
        c = p["cfg"]
        w = spectral_norm_weight(p["w"], p["u"], p["v"]) if c["sn"] else p["w"]
        out_dtype = jnp.float32 if idx == n - 1 else jnp.bfloat16  # head stays f32
        x = conv2d_pallas(x, w, p["b"], c["stride"], 1, c["leaky"], out_dtype=out_dtype)
    return jnp.transpose(x, (0, 3, 1, 2))  # NHWC -> NCHW


# pure-JAX reference (lax conv, same bf16-operand / f32-accumulate numerics) for correctness
def reference_forward(x_nchw, params):
    x = x_nchw
    for p in params:
        c = p["cfg"]
        w = spectral_norm_weight(p["w"], p["u"], p["v"]) if c["sn"] else p["w"]
        y = jax.lax.conv_general_dilated(
            x.astype(jnp.bfloat16), w.astype(jnp.bfloat16),
            (c["stride"], c["stride"]), ((1, 1), (1, 1)),
            dimension_numbers=("NCHW", "OIHW", "NCHW"),
            preferred_element_type=jnp.float32)
        if p["b"] is not None:
            y = y + p["b"].reshape(1, -1, 1, 1)
        if c["leaky"]:
            y = jnp.where(y >= 0, y, 0.2 * y)
        x = y
    return x


if __name__ == "__main__":
    key = jax.random.PRNGKey(0)
    k_params, k_x = jax.random.split(key)

    # small config: input_nc=3, ndf=8, n_layers=3; input 2x3x32x32 (NCHW, PyTorch convention)
    cfg = build_layer_configs(input_nc=3, ndf=8, n_layers=3, norm_layer=None)
    params = init_params(k_params, cfg)
    x = jax.random.normal(k_x, (2, 3, 32, 32), jnp.float32)

    fwd = jax.jit(lambda xx: nlayer_discriminator_forward(xx, params))
    ref_fn = jax.jit(lambda xx: reference_forward(xx, params))

    out = jax.block_until_ready(fwd(x))
    ref = jax.block_until_ready(ref_fn(x))
    assert out.shape == ref.shape == (2, 1, 2, 2), (out.shape, ref.shape)
    np.testing.assert_allclose(np.asarray(out), np.asarray(ref), rtol=2e-2, atol=2e-2)

    print("KERNEL_OK")
</pallas_src>

<mosaic_0001>
module attributes {stable_mosaic.version = 11 : i64} {
  func.func @_gemm_bias_act_kernel(%arg0: i32, %arg1: i32, %arg2: i32, %arg3: memref<512x128xbf16, #tpu.memory_space<vmem>>, %arg4: memref<128x128xbf16, #tpu.memory_space<vmem>>, %arg5: memref<1x128xf32, #tpu.memory_space<vmem>>, %arg6: memref<512x128xbf16, #tpu.memory_space<vmem>>, %arg7: memref<512x128xf32, #tpu.memory_space<vmem>>) attributes {dimension_semantics = [#tpu.dimension_semantics<parallel>, #tpu.dimension_semantics<parallel>, #tpu.dimension_semantics<arbitrary>], iteration_bounds = array<i64: 1, 1, 1>, scalar_prefetch = 0 : i64, scratch_operands = 1 : i64, tpu.core_type = #tpu.core_type<tc>, window_params = [{transform_indices = @transform_0, window_bounds = array<i64: 512, 128>}, {transform_indices = @transform_1, window_bounds = array<i64: 128, 128>}, {transform_indices = @transform_2, window_bounds = array<i64: 1, 128>}, {transform_indices = @transform_3, window_bounds = array<i64: 512, 128>}]} {
    %c0_i32 = arith.constant 0 : i32
    %0 = arith.cmpi eq, %arg2, %c0_i32 : i32
    %1 = arith.extui %0 : i1 to i32
    %c0_i32_0 = arith.constant 0 : i32
    %2 = arith.cmpi ne, %1, %c0_i32_0 : i32
    scf.if %2 {
      %cst_10 = arith.constant 0.000000e+00 : f32
      %12 = vector.broadcast %cst_10 : f32 to vector<512x128xf32>
      %c0_11 = arith.constant 0 : index
      %c0_12 = arith.constant 0 : index
      %13 = vector.load %arg7[%c0_11, %c0_12] : memref<512x128xf32, #tpu.memory_space<vmem>>, vector<512x128xf32>
      tpu.vector_store %arg7[%c0_11, %c0_12], %12 {strides = array<i32>} : memref<512x128xf32, #tpu.memory_space<vmem>>, vector<512x128xf32>,
    } else {
    }
    %c0 = arith.constant 0 : index
    %c0_1 = arith.constant 0 : index
    %3 = vector.load %arg7[%c0, %c0_1] : memref<512x128xf32, #tpu.memory_space<vmem>>, vector<512x128xf32>
    %c0_2 = arith.constant 0 : index
    %c0_3 = arith.constant 0 : index
    %4 = vector.load %arg3[%c0_2, %c0_3] : memref<512x128xbf16, #tpu.memory_space<vmem>>, vector<512x128xbf16>
    %c0_4 = arith.constant 0 : index
    %c0_5 = arith.constant 0 : index
    %5 = vector.load %arg4[%c0_4, %c0_5] : memref<128x128xbf16, #tpu.memory_space<vmem>>, vector<128x128xbf16>
    %cst = arith.constant dense<0.000000e+00> : vector<512x128xf32>
    %6 = tpu.matmul %4, %5, %cst {dimension_numbers = #tpu.dot_dimension_numbers<[1], [0], [0], [1], [0, 0, 1, 1], [], []>} : vector<512x128xbf16>, vector<128x128xbf16>, vector<512x128xf32> -> vector<512x128xf32>
    %7 = arith.addf %3, %6 : vector<512x128xf32>
    %c0_6 = arith.constant 0 : index
    %c0_7 = arith.constant 0 : index
    %8 = vector.load %arg7[%c0_6, %c0_7] : memref<512x128xf32, #tpu.memory_space<vmem>>, vector<512x128xf32>
    tpu.vector_store %arg7[%c0_6, %c0_7], %7 {strides = array<i32>} : memref<512x128xf32, #tpu.memory_space<vmem>>, vector<512x128xf32>,
    %c0_i32_8 = arith.constant 0 : i32
    %9 = arith.cmpi eq, %arg2, %c0_i32_8 : i32
    %10 = arith.extui %9 : i1 to i32
    %c0_i32_9 = arith.constant 0 : i32
    %11 = arith.cmpi ne, %10, %c0_i32_9 : i32
    scf.if %11 {
      %c0_10 = arith.constant 0 : index
      %c0_11 = arith.constant 0 : index
      %12 = vector.load %arg7[%c0_10, %c0_11] : memref<512x128xf32, #tpu.memory_space<vmem>>, vector<512x128xf32>
      %c0_12 = arith.constant 0 : index
      %c0_13 = arith.constant 0 : index
      %13 = vector.load %arg5[%c0_12, %c0_13] : memref<1x128xf32, #tpu.memory_space<vmem>>, vector<1x128xf32>
      %14 = vector.broadcast %13 : vector<1x128xf32> to vector<512x128xf32>
      %15 = arith.addf %12, %14 : vector<512x128xf32>
      %cst_14 = arith.constant 0.000000e+00 : f32
      %16 = vector.broadcast %cst_14 : f32 to vector<512x128xf32>
      %17 = arith.cmpf oge, %15, %16 : vector<512x128xf32>
      %cst_15 = arith.constant 2.000000e-01 : f32
      %18 = vector.broadcast %cst_15 : f32 to vector<512x128xf32>
      %19 = arith.mulf %18, %15 : vector<512x128xf32>
      %20 = arith.select %17, %15, %19 : vector<512x128xi1>, vector<512x128xf32>
      %21 = arith.truncf %20 : vector<512x128xf32> to vector<512x128xbf16>
      %c0_16 = arith.constant 0 : index
      %c0_17 = arith.constant 0 : index
      %22 = vector.load %arg6[%c0_16, %c0_17] : memref<512x128xbf16, #tpu.memory_space<vmem>>, vector<512x128xbf16>
      tpu.vector_store %arg6[%c0_16, %c0_17], %21 {strides = array<i32>} : memref<512x128xbf16, #tpu.memory_space<vmem>>, vector<512x128xbf16>,
    } else {
    }
    return
  }
  func.func @transform_0(%arg0: i32, %arg1: i32, %arg2: i32) -> (i32, i32) {
    %c0_i32 = arith.constant 0 : i32
    return %arg0, %arg2 : i32, i32
  }
  func.func @transform_1(%arg0: i32, %arg1: i32, %arg2: i32) -> (i32, i32) {
    %c0_i32 = arith.constant 0 : i32
    return %arg2, %arg1 : i32, i32
  }
  func.func @transform_2(%arg0: i32, %arg1: i32, %arg2: i32) -> (i32, i32) {
    %c0_i32 = arith.constant 0 : i32
    %c0_i32_0 = arith.constant 0 : i32
    return %c0_i32, %arg1 : i32, i32
  }
  func.func @transform_3(%arg0: i32, %arg1: i32, %arg2: i32) -> (i32, i32) {
    %c0_i32 = arith.constant 0 : i32
    return %arg0, %arg1 : i32, i32
  }
}

module attributes {stable_mosaic.version = 11 : i64} {
  func.func @_gemm_bias_act_kernel(%arg0: i32, %arg1: i32, %arg2: i32, %arg3: memref<128x128xbf16, #tpu.memory_space<vmem>>, %arg4: memref<128x128xbf16, #tpu.memory_space<vmem>>, %arg5: memref<1x128xf32, #tpu.memory_space<vmem>>, %arg6: memref<128x128xbf16, #tpu.memory_space<vmem>>, %arg7: memref<128x128xf32, #tpu.memory_space<vmem>>) attributes {dimension_semantics = [#tpu.dimension_semantics<parallel>, #tpu.dimension_semantics<parallel>, #tpu.dimension_semantics<arbitrary>], iteration_bounds = array<i64: 1, 1, 1>, scalar_prefetch = 0 : i64, scratch_operands = 1 : i64, tpu.core_type = #tpu.core_type<tc>, window_params = [{transform_indices = @transform_0, window_bounds = array<i64: 128, 128>}, {transform_indices = @transform_1, window_bounds = array<i64: 128, 128>}, {transform_indices = @transform_2, window_bounds = array<i64: 1, 128>}, {transform_indices = @transform_3, window_bounds = array<i64: 128, 128>}]} {
    %c0_i32 = arith.constant 0 : i32
    %0 = arith.cmpi eq, %arg2, %c0_i32 : i32
    %1 = arith.extui %0 : i1 to i32
    %c0_i32_0 = arith.constant 0 : i32
    %2 = arith.cmpi ne, %1, %c0_i32_0 : i32
    scf.if %2 {
      %cst_10 = arith.constant 0.000000e+00 : f32
      %12 = vector.broadcast %cst_10 : f32 to vector<128x128xf32>
      %c0_11 = arith.constant 0 : index
      %c0_12 = arith.constant 0 : index
      %13 = vector.load %arg7[%c0_11, %c0_12] : memref<128x128xf32, #tpu.memory_space<vmem>>, vector<128x128xf32>
      tpu.vector_store %arg7[%c0_11, %c0_12], %12 {strides = array<i32>} : memref<128x128xf32, #tpu.memory_space<vmem>>, vector<128x128xf32>,
    } else {
    }
    %c0 = arith.constant 0 : index
    %c0_1 = arith.constant 0 : index
    %3 = vector.load %arg7[%c0, %c0_1] : memref<128x128xf32, #tpu.memory_space<vmem>>, vector<128x128xf32>
    %c0_2 = arith.constant 0 : index
    %c0_3 = arith.constant 0 : index
    %4 = vector.load %arg3[%c0_2, %c0_3] : memref<128x128xbf16, #tpu.memory_space<vmem>>, vector<128x128xbf16>
    %c0_4 = arith.constant 0 : index
    %c0_5 = arith.constant 0 : index
    %5 = vector.load %arg4[%c0_4, %c0_5] : memref<128x128xbf16, #tpu.memory_space<vmem>>, vector<128x128xbf16>
    %cst = arith.constant dense<0.000000e+00> : vector<128x128xf32>
    %6 = tpu.matmul %4, %5, %cst {dimension_numbers = #tpu.dot_dimension_numbers<[1], [0], [0], [1], [0, 0, 1, 1], [], []>} : vector<128x128xbf16>, vector<128x128xbf16>, vector<128x128xf32> -> vector<128x128xf32>
    %7 = arith.addf %3, %6 : vector<128x128xf32>
    %c0_6 = arith.constant 0 : index
    %c0_7 = arith.constant 0 : index
    %8 = vector.load %arg7[%c0_6, %c0_7] : memref<128x128xf32, #tpu.memory_space<vmem>>, vector<128x128xf32>
    tpu.vector_store %arg7[%c0_6, %c0_7], %7 {strides = array<i32>} : memref<128x128xf32, #tpu.memory_space<vmem>>, vector<128x128xf32>,
    %c0_i32_8 = arith.constant 0 : i32
    %9 = arith.cmpi eq, %arg2, %c0_i32_8 : i32
    %10 = arith.extui %9 : i1 to i32
    %c0_i32_9 = arith.constant 0 : i32
    %11 = arith.cmpi ne, %10, %c0_i32_9 : i32
    scf.if %11 {
      %c0_10 = arith.constant 0 : index
      %c0_11 = arith.constant 0 : index
      %12 = vector.load %arg7[%c0_10, %c0_11] : memref<128x128xf32, #tpu.memory_space<vmem>>, vector<128x128xf32>
      %c0_12 = arith.constant 0 : index
      %c0_13 = arith.constant 0 : index
      %13 = vector.load %arg5[%c0_12, %c0_13] : memref<1x128xf32, #tpu.memory_space<vmem>>, vector<1x128xf32>
      %14 = vector.broadcast %13 : vector<1x128xf32> to vector<128x128xf32>
      %15 = arith.addf %12, %14 : vector<128x128xf32>
      %cst_14 = arith.constant 0.000000e+00 : f32
      %16 = vector.broadcast %cst_14 : f32 to vector<128x128xf32>
      %17 = arith.cmpf oge, %15, %16 : vector<128x128xf32>
      %cst_15 = arith.constant 2.000000e-01 : f32
      %18 = vector.broadcast %cst_15 : f32 to vector<128x128xf32>
      %19 = arith.mulf %18, %15 : vector<128x128xf32>
      %20 = arith.select %17, %15, %19 : vector<128x128xi1>, vector<128x128xf32>
      %21 = arith.truncf %20 : vector<128x128xf32> to vector<128x128xbf16>
      %c0_16 = arith.constant 0 : index
      %c0_17 = arith.constant 0 : index
      %22 = vector.load %arg6[%c0_16, %c0_17] : memref<128x128xbf16, #tpu.memory_space<vmem>>, vector<128x128xbf16>
      tpu.vector_store %arg6[%c0_16, %c0_17], %21 {strides = array<i32>} : memref<128x128xbf16, #tpu.memory_space<vmem>>, vector<128x128xbf16>,
    } else {
    }
    return
  }
  func.func @transform_0(%arg0: i32, %arg1: i32, %arg2: i32) -> (i32, i32) {
    %c0_i32 = arith.constant 0 : i32
    return %arg0, %arg2 : i32, i32
  }
  func.func @transform_1(%arg0: i32, %arg1: i32, %arg2: i32) -> (i32, i32) {
    %c0_i32 = arith.constant 0 : i32
    return %arg2, %arg1 : i32, i32
  }
  func.func @transform_2(%arg0: i32, %arg1: i32, %arg2: i32) -> (i32, i32) {
    %c0_i32 = arith.constant 0 : i32
    %c0_i32_0 = arith.constant 0 : i32
    return %c0_i32, %arg1 : i32, i32
  }
  func.func @transform_3(%arg0: i32, %arg1: i32, %arg2: i32) -> (i32, i32) {
    %c0_i32 = arith.constant 0 : i32
    return %arg0, %arg1 : i32, i32
  }
}

module attributes {stable_mosaic.version = 11 : i64} {
  func.func @_gemm_bias_act_kernel(%arg0: i32, %arg1: i32, %arg2: i32, %arg3: memref<128x256xbf16, #tpu.memory_space<vmem>>, %arg4: memref<256x128xbf16, #tpu.memory_space<vmem>>, %arg5: memref<1x128xf32, #tpu.memory_space<vmem>>, %arg6: memref<128x128xbf16, #tpu.memory_space<vmem>>, %arg7: memref<128x128xf32, #tpu.memory_space<vmem>>) attributes {dimension_semantics = [#tpu.dimension_semantics<parallel>, #tpu.dimension_semantics<parallel>, #tpu.dimension_semantics<arbitrary>], iteration_bounds = array<i64: 1, 1, 1>, scalar_prefetch = 0 : i64, scratch_operands = 1 : i64, tpu.core_type = #tpu.core_type<tc>, window_params = [{transform_indices = @transform_0, window_bounds = array<i64: 128, 256>}, {transform_indices = @transform_1, window_bounds = array<i64: 256, 128>}, {transform_indices = @transform_2, window_bounds = array<i64: 1, 128>}, {transform_indices = @transform_3, window_bounds = array<i64: 128, 128>}]} {
    %c0_i32 = arith.constant 0 : i32
    %0 = arith.cmpi eq, %arg2, %c0_i32 : i32
    %1 = arith.extui %0 : i1 to i32
    %c0_i32_0 = arith.constant 0 : i32
    %2 = arith.cmpi ne, %1, %c0_i32_0 : i32
    scf.if %2 {
      %cst_10 = arith.constant 0.000000e+00 : f32
      %12 = vector.broadcast %cst_10 : f32 to vector<128x128xf32>
      %c0_11 = arith.constant 0 : index
      %c0_12 = arith.constant 0 : index
      %13 = vector.load %arg7[%c0_11, %c0_12] : memref<128x128xf32, #tpu.memory_space<vmem>>, vector<128x128xf32>
      tpu.vector_store %arg7[%c0_11, %c0_12], %12 {strides = array<i32>} : memref<128x128xf32, #tpu.memory_space<vmem>>, vector<128x128xf32>,
    } else {
    }
    %c0 = arith.constant 0 : index
    %c0_1 = arith.constant 0 : index
    %3 = vector.load %arg7[%c0, %c0_1] : memref<128x128xf32, #tpu.memory_space<vmem>>, vector<128x128xf32>
    %c0_2 = arith.constant 0 : index
    %c0_3 = arith.constant 0 : index
    %4 = vector.load %arg3[%c0_2, %c0_3] : memref<128x256xbf16, #tpu.memory_space<vmem>>, vector<128x256xbf16>
    %c0_4 = arith.constant 0 : index
    %c0_5 = arith.constant 0 : index
    %5 = vector.load %arg4[%c0_4, %c0_5] : memref<256x128xbf16, #tpu.memory_space<vmem>>, vector<256x128xbf16>
    %cst = arith.constant dense<0.000000e+00> : vector<128x128xf32>
    %6 = tpu.matmul %4, %5, %cst {dimension_numbers = #tpu.dot_dimension_numbers<[1], [0], [0], [1], [0, 0, 1, 1], [], []>} : vector<128x256xbf16>, vector<256x128xbf16>, vector<128x128xf32> -> vector<128x128xf32>
    %7 = arith.addf %3, %6 : vector<128x128xf32>
    %c0_6 = arith.constant 0 : index
    %c0_7 = arith.constant 0 : index
    %8 = vector.load %arg7[%c0_6, %c0_7] : memref<128x128xf32, #tpu.memory_space<vmem>>, vector<128x128xf32>
    tpu.vector_store %arg7[%c0_6, %c0_7], %7 {strides = array<i32>} : memref<128x128xf32, #tpu.memory_space<vmem>>, vector<128x128xf32>,
    %c0_i32_8 = arith.constant 0 : i32
    %9 = arith.cmpi eq, %arg2, %c0_i32_8 : i32
    %10 = arith.extui %9 : i1 to i32
    %c0_i32_9 = arith.constant 0 : i32
    %11 = arith.cmpi ne, %10, %c0_i32_9 : i32
    scf.if %11 {
      %c0_10 = arith.constant 0 : index
      %c0_11 = arith.constant 0 : index
      %12 = vector.load %arg7[%c0_10, %c0_11] : memref<128x128xf32, #tpu.memory_space<vmem>>, vector<128x128xf32>
      %c0_12 = arith.constant 0 : index
      %c0_13 = arith.constant 0 : index
      %13 = vector.load %arg5[%c0_12, %c0_13] : memref<1x128xf32, #tpu.memory_space<vmem>>, vector<1x128xf32>
      %14 = vector.broadcast %13 : vector<1x128xf32> to vector<128x128xf32>
      %15 = arith.addf %12, %14 : vector<128x128xf32>
      %cst_14 = arith.constant 0.000000e+00 : f32
      %16 = vector.broadcast %cst_14 : f32 to vector<128x128xf32>
      %17 = arith.cmpf oge, %15, %16 : vector<128x128xf32>
      %cst_15 = arith.constant 2.000000e-01 : f32
      %18 = vector.broadcast %cst_15 : f32 to vector<128x128xf32>
      %19 = arith.mulf %18, %15 : vector<128x128xf32>
      %20 = arith.select %17, %15, %19 : vector<128x128xi1>, vector<128x128xf32>
      %21 = arith.truncf %20 : vector<128x128xf32> to vector<128x128xbf16>
      %c0_16 = arith.constant 0 : index
      %c0_17 = arith.constant 0 : index
      %22 = vector.load %arg6[%c0_16, %c0_17] : memref<128x128xbf16, #tpu.memory_space<vmem>>, vector<128x128xbf16>
      tpu.vector_store %arg6[%c0_16, %c0_17], %21 {strides = array<i32>} : memref<128x128xbf16, #tpu.memory_space<vmem>>, vector<128x128xbf16>,
    } else {
    }
    return
  }
  func.func @transform_0(%arg0: i32, %arg1: i32, %arg2: i32) -> (i32, i32) {
    %c0_i32 = arith.constant 0 : i32
    return %arg0, %arg2 : i32, i32
  }
  func.func @transform_1(%arg0: i32, %arg1: i32, %arg2: i32) -> (i32, i32) {
    %c0_i32 = arith.constant 0 : i32
    return %arg2, %arg1 : i32, i32
  }
  func.func @transform_2(%arg0: i32, %arg1: i32, %arg2: i32) -> (i32, i32) {
    %c0_i32 = arith.constant 0 : i32
    %c0_i32_0 = arith.constant 0 : i32
    return %c0_i32, %arg1 : i32, i32
  }
  func.func @transform_3(%arg0: i32, %arg1: i32, %arg2: i32) -> (i32, i32) {
    %c0_i32 = arith.constant 0 : i32
    return %arg0, %arg1 : i32, i32
  }
}

module attributes {stable_mosaic.version = 11 : i64} {
  func.func @_gemm_bias_act_kernel(%arg0: i32, %arg1: i32, %arg2: i32, %arg3: memref<128x512xbf16, #tpu.memory_space<vmem>>, %arg4: memref<512x128xbf16, #tpu.memory_space<vmem>>, %arg5: memref<1x128xf32, #tpu.memory_space<vmem>>, %arg6: memref<128x128xbf16, #tpu.memory_space<vmem>>, %arg7: memref<128x128xf32, #tpu.memory_space<vmem>>) attributes {dimension_semantics = [#tpu.dimension_semantics<parallel>, #tpu.dimension_semantics<parallel>, #tpu.dimension_semantics<arbitrary>], iteration_bounds = array<i64: 1, 1, 1>, scalar_prefetch = 0 : i64, scratch_operands = 1 : i64, tpu.core_type = #tpu.core_type<tc>, window_params = [{transform_indices = @transform_0, window_bounds = array<i64: 128, 512>}, {transform_indices = @transform_1, window_bounds = array<i64: 512, 128>}, {transform_indices = @transform_2, window_bounds = array<i64: 1, 128>}, {transform_indices = @transform_3, window_bounds = array<i64: 128, 128>}]} {
    %c0_i32 = arith.constant 0 : i32
    %0 = arith.cmpi eq, %arg2, %c0_i32 : i32
    %1 = arith.extui %0 : i1 to i32
    %c0_i32_0 = arith.constant 0 : i32
    %2 = arith.cmpi ne, %1, %c0_i32_0 : i32
    scf.if %2 {
      %cst_10 = arith.constant 0.000000e+00 : f32
      %12 = vector.broadcast %cst_10 : f32 to vector<128x128xf32>
      %c0_11 = arith.constant 0 : index
      %c0_12 = arith.constant 0 : index
      %13 = vector.load %arg7[%c0_11, %c0_12] : memref<128x128xf32, #tpu.memory_space<vmem>>, vector<128x128xf32>
      tpu.vector_store %arg7[%c0_11, %c0_12], %12 {strides = array<i32>} : memref<128x128xf32, #tpu.memory_space<vmem>>, vector<128x128xf32>,
    } else {
    }
    %c0 = arith.constant 0 : index
    %c0_1 = arith.constant 0 : index
    %3 = vector.load %arg7[%c0, %c0_1] : memref<128x128xf32, #tpu.memory_space<vmem>>, vector<128x128xf32>
    %c0_2 = arith.constant 0 : index
    %c0_3 = arith.constant 0 : index
    %4 = vector.load %arg3[%c0_2, %c0_3] : memref<128x512xbf16, #tpu.memory_space<vmem>>, vector<128x512xbf16>
    %c0_4 = arith.constant 0 : index
    %c0_5 = arith.constant 0 : index
    %5 = vector.load %arg4[%c0_4, %c0_5] : memref<512x128xbf16, #tpu.memory_space<vmem>>, vector<512x128xbf16>
    %cst = arith.constant dense<0.000000e+00> : vector<128x128xf32>
    %6 = tpu.matmul %4, %5, %cst {dimension_numbers = #tpu.dot_dimension_numbers<[1], [0], [0], [1], [0, 0, 1, 1], [], []>} : vector<128x512xbf16>, vector<512x128xbf16>, vector<128x128xf32> -> vector<128x128xf32>
    %7 = arith.addf %3, %6 : vector<128x128xf32>
    %c0_6 = arith.constant 0 : index
    %c0_7 = arith.constant 0 : index
    %8 = vector.load %arg7[%c0_6, %c0_7] : memref<128x128xf32, #tpu.memory_space<vmem>>, vector<128x128xf32>
    tpu.vector_store %arg7[%c0_6, %c0_7], %7 {strides = array<i32>} : memref<128x128xf32, #tpu.memory_space<vmem>>, vector<128x128xf32>,
    %c0_i32_8 = arith.constant 0 : i32
    %9 = arith.cmpi eq, %arg2, %c0_i32_8 : i32
    %10 = arith.extui %9 : i1 to i32
    %c0_i32_9 = arith.constant 0 : i32
    %11 = arith.cmpi ne, %10, %c0_i32_9 : i32
    scf.if %11 {
      %c0_10 = arith.constant 0 : index
      %c0_11 = arith.constant 0 : index
      %12 = vector.load %arg7[%c0_10, %c0_11] : memref<128x128xf32, #tpu.memory_space<vmem>>, vector<128x128xf32>
      %c0_12 = arith.constant 0 : index
      %c0_13 = arith.constant 0 : index
      %13 = vector.load %arg5[%c0_12, %c0_13] : memref<1x128xf32, #tpu.memory_space<vmem>>, vector<1x128xf32>
      %14 = vector.broadcast %13 : vector<1x128xf32> to vector<128x128xf32>
      %15 = arith.addf %12, %14 : vector<128x128xf32>
      %cst_14 = arith.constant 0.000000e+00 : f32
      %16 = vector.broadcast %cst_14 : f32 to vector<128x128xf32>
      %17 = arith.cmpf oge, %15, %16 : vector<128x128xf32>
      %cst_15 = arith.constant 2.000000e-01 : f32
      %18 = vector.broadcast %cst_15 : f32 to vector<128x128xf32>
      %19 = arith.mulf %18, %15 : vector<128x128xf32>
      %20 = arith.select %17, %15, %19 : vector<128x128xi1>, vector<128x128xf32>
      %21 = arith.truncf %20 : vector<128x128xf32> to vector<128x128xbf16>
      %c0_16 = arith.constant 0 : index
      %c0_17 = arith.constant 0 : index
      %22 = vector.load %arg6[%c0_16, %c0_17] : memref<128x128xbf16, #tpu.memory_space<vmem>>, vector<128x128xbf16>
      tpu.vector_store %arg6[%c0_16, %c0_17], %21 {strides = array<i32>} : memref<128x128xbf16, #tpu.memory_space<vmem>>, vector<128x128xbf16>,
    } else {
    }
    return
  }
  func.func @transform_0(%arg0: i32, %arg1: i32, %arg2: i32) -> (i32, i32) {
    %c0_i32 = arith.constant 0 : i32
    return %arg0, %arg2 : i32, i32
  }
  func.func @transform_1(%arg0: i32, %arg1: i32, %arg2: i32) -> (i32, i32) {
    %c0_i32 = arith.constant 0 : i32
    return %arg2, %arg1 : i32, i32
  }
  func.func @transform_2(%arg0: i32, %arg1: i32, %arg2: i32) -> (i32, i32) {
    %c0_i32 = arith.constant 0 : i32
    %c0_i32_0 = arith.constant 0 : i32
    return %c0_i32, %arg1 : i32, i32
  }
  func.func @transform_3(%arg0: i32, %arg1: i32, %arg2: i32) -> (i32, i32) {
    %c0_i32 = arith.constant 0 : i32
    return %arg0, %arg1 : i32, i32
  }
}

module attributes {stable_mosaic.version = 11 : i64} {
  func.func @_gemm_bias_act_kernel(%arg0: i32, %arg1: i32, %arg2: i32, %arg3: memref<128x1024xbf16, #tpu.memory_space<vmem>>, %arg4: memref<1024x128xbf16, #tpu.memory_space<vmem>>, %arg5: memref<1x128xf32, #tpu.memory_space<vmem>>, %arg6: memref<128x128xf32, #tpu.memory_space<vmem>>, %arg7: memref<128x128xf32, #tpu.memory_space<vmem>>) attributes {dimension_semantics = [#tpu.dimension_semantics<parallel>, #tpu.dimension_semantics<parallel>, #tpu.dimension_semantics<arbitrary>], iteration_bounds = array<i64: 1, 1, 1>, scalar_prefetch = 0 : i64, scratch_operands = 1 : i64, tpu.core_type = #tpu.core_type<tc>, window_params = [{transform_indices = @transform_0, window_bounds = array<i64: 128, 1024>}, {transform_indices = @transform_1, window_bounds = array<i64: 1024, 128>}, {transform_indices = @transform_2, window_bounds = array<i64: 1, 128>}, {transform_indices = @transform_3, window_bounds = array<i64: 128, 128>}]} {
    %c0_i32 = arith.constant 0 : i32
    %0 = arith.cmpi eq, %arg2, %c0_i32 : i32
    %1 = arith.extui %0 : i1 to i32
    %c0_i32_0 = arith.constant 0 : i32
    %2 = arith.cmpi ne, %1, %c0_i32_0 : i32
    scf.if %2 {
      %cst_10 = arith.constant 0.000000e+00 : f32
      %12 = vector.broadcast %cst_10 : f32 to vector<128x128xf32>
      %c0_11 = arith.constant 0 : index
      %c0_12 = arith.constant 0 : index
      %13 = vector.load %arg7[%c0_11, %c0_12] : memref<128x128xf32, #tpu.memory_space<vmem>>, vector<128x128xf32>
      tpu.vector_store %arg7[%c0_11, %c0_12], %12 {strides = array<i32>} : memref<128x128xf32, #tpu.memory_space<vmem>>, vector<128x128xf32>,
    } else {
    }
    %c0 = arith.constant 0 : index
    %c0_1 = arith.constant 0 : index
    %3 = vector.load %arg7[%c0, %c0_1] : memref<128x128xf32, #tpu.memory_space<vmem>>, vector<128x128xf32>
    %c0_2 = arith.constant 0 : index
    %c0_3 = arith.constant 0 : index
    %4 = vector.load %arg3[%c0_2, %c0_3] : memref<128x1024xbf16, #tpu.memory_space<vmem>>, vector<128x1024xbf16>
    %c0_4 = arith.constant 0 : index
    %c0_5 = arith.constant 0 : index
    %5 = vector.load %arg4[%c0_4, %c0_5] : memref<1024x128xbf16, #tpu.memory_space<vmem>>, vector<1024x128xbf16>
    %cst = arith.constant dense<0.000000e+00> : vector<128x128xf32>
    %6 = tpu.matmul %4, %5, %cst {dimension_numbers = #tpu.dot_dimension_numbers<[1], [0], [0], [1], [0, 0, 1, 1], [], []>} : vector<128x1024xbf16>, vector<1024x128xbf16>, vector<128x128xf32> -> vector<128x128xf32>
    %7 = arith.addf %3, %6 : vector<128x128xf32>
    %c0_6 = arith.constant 0 : index
    %c0_7 = arith.constant 0 : index
    %8 = vector.load %arg7[%c0_6, %c0_7] : memref<128x128xf32, #tpu.memory_space<vmem>>, vector<128x128xf32>
    tpu.vector_store %arg7[%c0_6, %c0_7], %7 {strides = array<i32>} : memref<128x128xf32, #tpu.memory_space<vmem>>, vector<128x128xf32>,
    %c0_i32_8 = arith.constant 0 : i32
    %9 = arith.cmpi eq, %arg2, %c0_i32_8 : i32
    %10 = arith.extui %9 : i1 to i32
    %c0_i32_9 = arith.constant 0 : i32
    %11 = arith.cmpi ne, %10, %c0_i32_9 : i32
    scf.if %11 {
      %c0_10 = arith.constant 0 : index
      %c0_11 = arith.constant 0 : index
      %12 = vector.load %arg7[%c0_10, %c0_11] : memref<128x128xf32, #tpu.memory_space<vmem>>, vector<128x128xf32>
      %c0_12 = arith.constant 0 : index
      %c0_13 = arith.constant 0 : index
      %13 = vector.load %arg5[%c0_12, %c0_13] : memref<1x128xf32, #tpu.memory_space<vmem>>, vector<1x128xf32>
      %14 = vector.broadcast %13 : vector<1x128xf32> to vector<128x128xf32>
      %15 = arith.addf %12, %14 : vector<128x128xf32>
      %c0_14 = arith.constant 0 : index
      %c0_15 = arith.constant 0 : index
      %16 = vector.load %arg6[%c0_14, %c0_15] : memref<128x128xf32, #tpu.memory_space<vmem>>, vector<128x128xf32>
      tpu.vector_store %arg6[%c0_14, %c0_15], %15 {strides = array<i32>} : memref<128x128xf32, #tpu.memory_space<vmem>>, vector<128x128xf32>,
    } else {
    }
    return
  }
  func.func @transform_0(%arg0: i32, %arg1: i32, %arg2: i32) -> (i32, i32) {
    %c0_i32 = arith.constant 0 : i32
    return %arg0, %arg2 : i32, i32
  }
  func.func @transform_1(%arg0: i32, %arg1: i32, %arg2: i32) -> (i32, i32) {
    %c0_i32 = arith.constant 0 : i32
    return %arg2, %arg1 : i32, i32
  }
  func.func @transform_2(%arg0: i32, %arg1: i32, %arg2: i32) -> (i32, i32) {
    %c0_i32 = arith.constant 0 : i32
    %c0_i32_0 = arith.constant 0 : i32
    return %c0_i32, %arg1 : i32, i32
  }
  func.func @transform_3(%arg0: i32, %arg1: i32, %arg2: i32) -> (i32, i32) {
    %c0_i32 = arith.constant 0 : i32
    return %arg0, %arg1 : i32, i32
  }
}

</mosaic_0001>

<bundles_post_ra>
// kernel: _lambda_.5
= control target key start
LH: loop header
LB: loop body
LE: loop exit
PB: predicated region body
PF: predicated region fallthrough
CT: control target
= control target key end

     0   :  { %s2382_s1 = inlined_call_operand.vmem [shape: bf16[128,128], index: 1, kind: input, shape index: {}]   ;;  %s2383_s0 = inlined_call_operand.vmem [shape: bf16[512,128], index: 0, kind: input, shape index: {}]   ;;  %s2384_s2 = inlined_call_operand.vmem [shape: f32[1,128], index: 2, kind: input, shape index: {}]   ;;  %s2385_s3 = inlined_call_operand.vmem [shape: bf16[512,128], index: 3, kind: output, shape index: {}]  }
   0x1   :  { %v2034_v0 = vld [vmem:[%s2382_s1 + $0x38] sm:$0xff]   ;;  %v2035_v1 = vld [vmem:[%s2382_s1 + $0x30] sm:$0xff]   ;;  %v2036_v2 = vld [vmem:[%s2382_s1 + $0x28] sm:$0xff]  }
   0x2   :  { %1938 = vmatprep.subr.bf16.mxu0 %v2034_v0  ;;  %2018 = vmatprep.subr.bf16.mxu1 %v2034_v0  ;;  %v2037_v3 = vld [vmem:[%s2382_s1 + $0x20] sm:$0xff]   ;;  %v2038_v6 = vld [vmem:[%s2382_s1 + $0x18] sm:$0xff]   ;;  %v2039_v7 = vld [vmem:[%s2382_s1 + $0x10] sm:$0xff]  }
   0x3   :  { %1939 = vmatpush3.bf16.msra.mxu0 %v2034_v0  ;;  %2026 = vmatpush3.bf16.msra.mxu1 %v2034_v0  ;;  %v2042_v4 = vld [vmem:[%s2383_s0] sm:$0xff]   ;;  %v2040_v8 = vld [vmem:[%s2382_s1 + $0x8] sm:$0xff]   ;;  %v2046_v12 = vld [vmem:[%s2383_s0 + $0x10] sm:$0xff]  }
   0x4   :  { %1940 = vmatprep.subr.bf16.mxu0 %v2035_v1  ;;  %2019 = vmatprep.subr.bf16.mxu1 %v2035_v1  ;;  %v2043_v5 = vld [vmem:[%s2383_s0 + $0x80] sm:$0xff]   ;;  %v2044_v10 = vld [vmem:[%s2383_s0 + $0x8] sm:$0xff]   ;;  %v2047_v13 = vld [vmem:[%s2383_s0 + $0x90] sm:$0xff]  }
   0x5   :  { %1954 = vmatprep.mubr.bf16.mxu0 %v2042_v4  ;;  %1986 = vmatprep.mubr.bf16.mxu1 %v2043_v5  ;;  %v2041_v9 = vld [vmem:[%s2382_s1] sm:$0xff]   ;;  %v2045_v11 = vld [vmem:[%s2383_s0 + $0x88] sm:$0xff]   ;;  %v2048_v14 = vld [vmem:[%s2383_s0 + $0x18] sm:$0xff]  }
   0x6   :  { %v2049_v15 = vld [vmem:[%s2383_s0 + $0x98] sm:$0xff]   ;;  %v2050_v16 = vld [vmem:[%s2383_s0 + $0x20] sm:$0xff]   ;;  %v2052_v18 = vld [vmem:[%s2383_s0 + $0x28] sm:$0xff]  }
   0x7   :  { %1941 = vmatpush3.bf16.msra.mxu0 %v2035_v1  ;;  %2027 = vmatpush3.bf16.msra.mxu1 %v2035_v1  ;;  %v2051_v17 = vld [vmem:[%s2383_s0 + $0xa0] sm:$0xff]   ;;  %v2053_v19 = vld [vmem:[%s2383_s0 + $0xa8] sm:$0xff]   ;;  %v2054_v20 = vld [vmem:[%s2383_s0 + $0x30] sm:$0xff]  }
   0x8   :  { %1942 = vmatprep.subr.bf16.mxu0 %v2036_v2  ;;  %2020 = vmatprep.subr.bf16.mxu1 %v2036_v2  ;;  %v2055_v21 = vld [vmem:[%s2383_s0 + $0xb0] sm:$0xff]   ;;  %v2056_v22 = vld [vmem:[%s2383_s0 + $0x38] sm:$0xff]   ;;  %v2058_v24 = vld [vmem:[%s2383_s0 + $0x40] sm:$0xff]  }
   0x9   :  { %v2057_v23 = vld [vmem:[%s2383_s0 + $0xb8] sm:$0xff]   ;;  %v2059_v25 = vld [vmem:[%s2383_s0 + $0xc0] sm:$0xff]   ;;  %v2060_v26 = vld [vmem:[%s2383_s0 + $0x48] sm:$0xff]  }
   0xa   :  { %v2061_v27 = vld [vmem:[%s2383_s0 + $0xc8] sm:$0xff]   ;;  %v2062_v28 = vld [vmem:[%s2383_s0 + $0x50] sm:$0xff]   ;;  %v2064_v30 = vld [vmem:[%s2383_s0 + $0x58] sm:$0xff]  }
   0xb   :  { %1943 = vmatpush3.bf16.msra.mxu0 %v2036_v2  ;;  %2028 = vmatpush3.bf16.msra.mxu1 %v2036_v2  ;;  %v2063_v29 = vld [vmem:[%s2383_s0 + $0xd0] sm:$0xff]   ;;  %v2065_v31 = vld [vmem:[%s2383_s0 + $0xd8] sm:$0xff]   ;;  %v2066_v32 = vld [vmem:[%s2383_s0 + $0x60] sm:$0xff]  }
   0xc   :  { %1944 = vmatprep.subr.bf16.mxu0 %v2037_v3  ;;  %2021 = vmatprep.subr.bf16.mxu1 %v2037_v3  ;;  %v2067_v33 = vld [vmem:[%s2383_s0 + $0xe0] sm:$0xff]   ;;  %v2068_v34 = vld [vmem:[%s2383_s0 + $0x68] sm:$0xff]   ;;  %v2070_v36 = vld [vmem:[%s2383_s0 + $0x70] sm:$0xff]  }
   0xd   :  { %v2069_v35 = vld [vmem:[%s2383_s0 + $0xe8] sm:$0xff]   ;;  %v2071_v37 = vld [vmem:[%s2383_s0 + $0xf0] sm:$0xff]   ;;  %v2072_v38 = vld [vmem:[%s2383_s0 + $0x78] sm:$0xff]  }
   0xe   :  { %v2073_v39 = vld [vmem:[%s2383_s0 + $0xf8] sm:$0xff]   ;;  %v2217_v40 = vld [vmem:[%s2384_s2] ss:$0 sm:$0xff] }
   0xf   :  { %1945 = vmatpush3.bf16.msra.mxu0 %v2037_v3  ;;  %2029 = vmatpush3.bf16.msra.mxu1 %v2037_v3 }
  0x10   :  { %1946 = vmatprep.subr.bf16.mxu0 %v2038_v6  ;;  %2022 = vmatprep.subr.bf16.mxu1 %v2038_v6 }
  0x13   :  { %1947 = vmatpush3.bf16.msra.mxu0 %v2038_v6  ;;  %2030 = vmatpush3.bf16.msra.mxu1 %v2038_v6 }
  0x14   :  { %1948 = vmatprep.subr.bf16.mxu0 %v2039_v7  ;;  %2023 = vmatprep.subr.bf16.mxu1 %v2039_v7 }
  0x17   :  { %1949 = vmatpush3.bf16.msra.mxu0 %v2039_v7  ;;  %2031 = vmatpush3.bf16.msra.mxu1 %v2039_v7 }
  0x18   :  { %1950 = vmatprep.subr.bf16.mxu0 %v2040_v8  ;;  %2024 = vmatprep.subr.bf16.mxu1 %v2040_v8 }
  0x1b   :  { %1951 = vmatpush3.bf16.msra.mxu0 %v2040_v8  ;;  %2032 = vmatpush3.bf16.msra.mxu1 %v2040_v8 }
  0x1c   :  { %1952 = vmatprep.subr.bf16.mxu0 %v2041_v9  ;;  %2025 = vmatprep.subr.bf16.mxu1 %v2041_v9 }
  0x1f   :  { %1953 = vmatpush3.bf16.msra.mxu0 %v2041_v9  ;;  %2033 = vmatpush3.bf16.msra.mxu1 %v2041_v9 }
  0x22   :  { %1955 = vmatmul.mubr.bf16.vlgmr.msra.gmra.mxu0 %v2044_v10  ;;  %1987 = vmatmul.mubr.bf16.vlgmr.msra.gmra.mxu1 %v2045_v11 }
  0x23   :  { %1958 = vmatprep.mubr.bf16.mxu0 %v2046_v12  ;;  %1990 = vmatprep.mubr.bf16.mxu1 %v2047_v13 }
  0x2a   :  { %1959 = vmatmul.mubr.bf16.gmra.mxu0 %v2048_v14  ;;  %1991 = vmatmul.mubr.bf16.gmra.mxu1 %v2049_v15 }
  0x2b   :  { %1962 = vmatprep.mubr.bf16.mxu0 %v2050_v16  ;;  %1994 = vmatprep.mubr.bf16.mxu1 %v2051_v17 }
  0x32   :  { %1963 = vmatmul.mubr.bf16.gmra.mxu0 %v2052_v18  ;;  %1995 = vmatmul.mubr.bf16.gmra.mxu1 %v2053_v19 }
  0x33   :  { %1966 = vmatprep.mubr.bf16.mxu0 %v2054_v20  ;;  %1998 = vmatprep.mubr.bf16.mxu1 %v2055_v21 }
  0x3a   :  { %1967 = vmatmul.mubr.bf16.gmra.mxu0 %v2056_v22  ;;  %1999 = vmatmul.mubr.bf16.gmra.mxu1 %v2057_v23 }
  0x3b   :  { %1970 = vmatprep.mubr.bf16.mxu0 %v2058_v24  ;;  %2002 = vmatprep.mubr.bf16.mxu1 %v2059_v25 }
  0x42   :  { %1971 = vmatmul.mubr.bf16.gmra.mxu0 %v2060_v26  ;;  %2003 = vmatmul.mubr.bf16.gmra.mxu1 %v2061_v27 }
  0x43   :  { %1974 = vmatprep.mubr.bf16.mxu0 %v2062_v28  ;;  %2006 = vmatprep.mubr.bf16.mxu1 %v2063_v29 }
  0x4a   :  { %1975 = vmatmul.mubr.bf16.gmra.mxu0 %v2064_v30  ;;  %2007 = vmatmul.mubr.bf16.gmra.mxu1 %v2065_v31 }
  0x4b   :  { %1978 = vmatprep.mubr.bf16.mxu0 %v2066_v32  ;;  %2010 = vmatprep.mubr.bf16.mxu1 %v2067_v33 }
  0x52   :  { %1979 = vmatmul.mubr.bf16.gmra.mxu0 %v2068_v34  ;;  %2011 = vmatmul.mubr.bf16.gmra.mxu1 %v2069_v35 }
  0x53   :  { %1982 = vmatprep.mubr.bf16.mxu0 %v2070_v36  ;;  %2014 = vmatprep.mubr.bf16.mxu1 %v2071_v37 }
  0x5a   :  { %1983 = vmatmul.mubr.bf16.gmra.mxu0 %v2072_v38  ;;  %2015 = vmatmul.mubr.bf16.gmra.mxu1 %v2073_v39 }
  0xe2   :  { %v1956_v41 = vpop.f32.mrf.mxu0  ;;  %v1988_v42 = vpop.f32.mrf.mxu1 }
  0xe3   :  { %v960_v43 = vadd.f32 %v1956_v41, %v2217_v40  ;;  %v992_v44 = vadd.f32 %v1988_v42, %v2217_v40 }
  0xe4   :  { %v501_v45 = vpop.f32.mrf.mxu0  ;;  %v629_v46 = vpop.f32.mrf.mxu1 }
  0xe5   :  { %vm1024_vm0 = vcmp.ge.f32.partialorder %v960_v43, 0.0  ;;  %v1088_v47 = vmul.f32 0.2, %v960_v43  ;;  %vm1056_vm1 = vcmp.ge.f32.partialorder %v992_v44, 0.0  ;;  %v1120_v48 = vmul.f32 0.2, %v992_v44 }
  0xe6   :  { %v958_v49 = vadd.f32 %v2217_v40, %v501_v45  ;;  %v990_v50 = vadd.f32 %v2217_v40, %v629_v46  ;;  %v1957_v51 = vpop.f32.mrf.mxu0  ;;  %v1989_v52 = vpop.f32.mrf.mxu1 }
  0xe7   :  { %v1152_v53 = vsel %vm1024_vm0, %v960_v43, %v1088_v47  ;;  %v961_v54 = vadd.f32 %v1957_v51, %v2217_v40  ;;  %v993_v55 = vadd.f32 %v1989_v52, %v2217_v40  ;;  %v1184_v56 = vsel %vm1056_vm1, %v992_v44, %v1120_v48 }
  0xe8   :  { %vm1022_vm2 = vcmp.ge.f32.partialorder %v958_v49, 0.0  ;;  %v1086_v57 = vmul.f32 0.2, %v958_v49  ;;  %vm1054_vm3 = vcmp.ge.f32.partialorder %v990_v50, 0.0  ;;  %v504_v58 = vpop.f32.mrf.mxu0  ;;  %v632_v59 = vpop.f32.mrf.mxu1  ;;  %v1118_v63 = vmul.f32 0.2, %v990_v50 }
  0xe9   :  { %vm1025_vm4 = vcmp.ge.f32.partialorder %v961_v54, 0.0  ;;  %v1089_v60 = vmul.f32 0.2, %v961_v54  ;;  %vm1057_vm5 = vcmp.ge.f32.partialorder %v993_v55, 0.0  ;;  %v1121_v61 = vmul.f32 0.2, %v993_v55 }
  0xea   :  { %v1150_v62 = vsel %vm1022_vm2, %v958_v49, %v1086_v57  ;;  %v959_v0 = vadd.f32 %v2217_v40, %v504_v58  ;;  %v991_v1 = vadd.f32 %v2217_v40, %v632_v59  ;;  %v1960_v2 = vpop.f32.mrf.mxu0  ;;  %v1992_v3 = vpop.f32.mrf.mxu1  ;;  %v1182_v15 = vsel %vm1054_vm3, %v990_v50, %v1118_v63 }
  0xeb   :  { %v1153_v4 = vsel %vm1025_vm4, %v961_v54, %v1089_v60  ;;  %v1185_v5 = vsel %vm1057_vm5, %v993_v55, %v1121_v61  ;;  %v964_v6 = vadd.f32 %v1960_v2, %v2217_v40  ;;  %v996_v7 = vadd.f32 %v1992_v3, %v2217_v40 }
  0xec   :  { %v1715_v8 = vpack.c.bf16 %v1153_v4, %v1152_v53  ;;  %v1795_v9 = vpack.c.bf16 %v1185_v5, %v1184_v56  ;;  %vm1023_vm6 = vcmp.ge.f32.partialorder %v959_v0, 0.0  ;;  %v1087_v10 = vmul.f32 0.2, %v959_v0  ;;  %v517_v11 = vpop.f32.mrf.mxu0  ;;  %v645_v12 = vpop.f32.mrf.mxu1 }
  0xed   :  { %vm1055_vm7 = vcmp.ge.f32.partialorder %v991_v1, 0.0  ;;  %v1119_v13 = vmul.f32 0.2, %v991_v1  ;;  %vm1028_vm8 = vcmp.ge.f32.partialorder %v964_v6, 0.0  ;;  %v1092_v14 = vmul.f32 0.2, %v964_v6 }
  0xee   :  { %1867 = vst [vmem:[%s2385_s3 + $0x8] sm:$0xff] %v1715_v8   ;;  %1883 = vst [vmem:[%s2385_s3 + $0x88] sm:$0xff] %v1795_v9   ;;  %v1151_v16 = vsel %vm1023_vm6, %v959_v0, %v1087_v10  ;;  %v1124_v17 = vmul.f32 0.2, %v996_v7  ;;  %v962_v18 = vadd.f32 %v2217_v40, %v517_v11  ;;  %v1961_v19 = vpop.f32.mrf.mxu0  ;;  %v1993_v20 = vpop.f32.mrf.mxu1  ;;  %vm1060_vm9 = vcmp.ge.f32.partialorder %v996_v7, 0.0 }
  0xef   :  { %v1710_v21 = vpack.c.bf16 %v1151_v16, %v1150_v62  ;;  %v1183_v22 = vsel %vm1055_vm7, %v991_v1, %v1119_v13  ;;  %v994_v23 = vadd.f32 %v2217_v40, %v645_v12  ;;  %v1156_v25 = vsel %vm1028_vm8, %v964_v6, %v1092_v14 }
  0xf0   :  { %v1790_v24 = vpack.c.bf16 %v1183_v22, %v1182_v15  ;;  %vm1026_vm10 = vcmp.ge.f32.partialorder %v962_v18, 0.0  ;;  %v1090_v26 = vmul.f32 0.2, %v962_v18  ;;  %v520_v27 = vpop.f32.mrf.mxu0  ;;  %v648_v28 = vpop.f32.mrf.mxu1  ;;  %v965_v30 = vadd.f32 %v1961_v19, %v2217_v40 }
  0xf1   :  { %1711 = vst [vmem:[%s2385_s3] sm:$0xff] %v1710_v21   ;;  %vm1058_vm11 = vcmp.ge.f32.partialorder %v994_v23, 0.0  ;;  %v1122_v29 = vmul.f32 0.2, %v994_v23  ;;  %v997_v31 = vadd.f32 %v1993_v20, %v2217_v40  ;;  %v1188_v32 = vsel %vm1060_vm9, %v996_v7, %v1124_v17 }
  0xf2   :  { %1882 = vst [vmem:[%s2385_s3 + $0x80] sm:$0xff] %v1790_v24   ;;  %v1154_v33 = vsel %vm1026_vm10, %v962_v18, %v1090_v26  ;;  %v963_v34 = vadd.f32 %v2217_v40, %v520_v27  ;;  %v995_v35 = vadd.f32 %v2217_v40, %v648_v28  ;;  %v1964_v36 = vpop.f32.mrf.mxu0  ;;  %v1996_v37 = vpop.f32.mrf.mxu1  ;;  %vm1029_vm12 = vcmp.ge.f32.partialorder %v965_v30, 0.0 }
  0xf3   :  { %v1186_v38 = vsel %vm1058_vm11, %v994_v23, %v1122_v29  ;;  %v1093_v39 = vmul.f32 0.2, %v965_v30  ;;  %vm1061_vm13 = vcmp.ge.f32.partialorder %v997_v31, 0.0  ;;  %v1125_v41 = vmul.f32 0.2, %v997_v31 }
  0xf4   :  { %vm1027_vm14 = vcmp.ge.f32.partialorder %v963_v34, 0.0  ;;  %v1091_v42 = vmul.f32 0.2, %v963_v34  ;;  %vm1059_vm15 = vcmp.ge.f32.partialorder %v995_v35, 0.0  ;;  %v533_v43 = vpop.f32.mrf.mxu0  ;;  %v661_v44 = vpop.f32.mrf.mxu1  ;;  %v1123_v46 = vmul.f32 0.2, %v995_v35 }
  0xf5   :  { %v1157_v45 = vsel %vm1029_vm12, %v965_v30, %v1093_v39  ;;  %v968_v47 = vadd.f32 %v1964_v36, %v2217_v40  ;;  %v1000_v48 = vadd.f32 %v1996_v37, %v2217_v40  ;;  %v1189_v50 = vsel %vm1061_vm13, %v997_v31, %v1125_v41 }
  0xf6   :  { %v1725_v49 = vpack.c.bf16 %v1157_v45, %v1156_v25  ;;  %v1155_v51 = vsel %vm1027_vm14, %v963_v34, %v1091_v42  ;;  %v966_v52 = vadd.f32 %v2217_v40, %v533_v43  ;;  %v1965_v53 = vpop.f32.mrf.mxu0  ;;  %v1997_v54 = vpop.f32.mrf.mxu1  ;;  %v1805_v55 = vpack.c.bf16 %v1189_v50, %v1188_v32 }
  0xf7   :  { %v1720_v56 = vpack.c.bf16 %v1155_v51, %v1154_v33  ;;  %v1187_v57 = vsel %vm1059_vm15, %v995_v35, %v1123_v46  ;;  %vm1032_vm0 = vcmp.ge.f32.partialorder %v968_v47, 0.0  ;;  %v1096_v59 = vmul.f32 0.2, %v968_v47 }
  0xf8   :  { %1869 = vst [vmem:[%s2385_s3 + $0x18] sm:$0xff] %v1725_v49   ;;  %v1800_v58 = vpack.c.bf16 %v1187_v57, %v1186_v38  ;;  %vm1064_vm1 = vcmp.ge.f32.partialorder %v1000_v48, 0.0  ;;  %v1128_v60 = vmul.f32 0.2, %v1000_v48  ;;  %v536_v61 = vpop.f32.mrf.mxu0  ;;  %v664_v62 = vpop.f32.mrf.mxu1  ;;  %1885 = vst [vmem:[%s2385_s3 + $0x98] sm:$0xff] %v1805_v55   ;;  %vm1030_vm2 = vcmp.ge.f32.partialorder %v966_v52, 0.0 }
  0xf9   :  { %1868 = vst [vmem:[%s2385_s3 + $0x10] sm:$0xff] %v1720_v56   ;;  %v1094_v63 = vmul.f32 0.2, %v966_v52  ;;  %v998_v0 = vadd.f32 %v2217_v40, %v661_v44  ;;  %v969_v1 = vadd.f32 %v1965_v53, %v2217_v40  ;;  %v1160_v2 = vsel %vm1032_vm0, %v968_v47, %v1096_v59 }
  0xfa   :  { %1884 = vst [vmem:[%s2385_s3 + $0x90] sm:$0xff] %v1800_v58   ;;  %v1192_v3 = vsel %vm1064_vm1, %v1000_v48, %v1128_v60  ;;  %v1001_v4 = vadd.f32 %v1997_v54, %v2217_v40  ;;  %v967_v5 = vadd.f32 %v2217_v40, %v536_v61  ;;  %v1968_v6 = vpop.f32.mrf.mxu0  ;;  %v2000_v7 = vpop.f32.mrf.mxu1  ;;  %v999_v16 = vadd.f32 %v2217_v40, %v664_v62 }
  0xfb   :  { %v1158_v8 = vsel %vm1030_vm2, %v966_v52, %v1094_v63  ;;  %vm1062_vm3 = vcmp.ge.f32.partialorder %v998_v0, 0.0  ;;  %v1126_v9 = vmul.f32 0.2, %v998_v0  ;;  %vm1033_vm4 = vcmp.ge.f32.partialorder %v969_v1, 0.0 }
  0xfc   :  { %v1097_v10 = vmul.f32 0.2, %v969_v1  ;;  %vm1065_vm5 = vcmp.ge.f32.partialorder %v1001_v4, 0.0  ;;  %v1129_v11 = vmul.f32 0.2, %v1001_v4  ;;  %vm1031_vm6 = vcmp.ge.f32.partialorder %v967_v5, 0.0  ;;  %v549_v12 = vpop.f32.mrf.mxu0  ;;  %v677_v13 = vpop.f32.mrf.mxu1 }
  0xfd   :  { %v1190_v14 = vsel %vm1062_vm3, %v998_v0, %v1126_v9  ;;  %v1095_v15 = vmul.f32 0.2, %v967_v5  ;;  %v972_v17 = vadd.f32 %v1968_v6, %v2217_v40  ;;  %v1004_v20 = vadd.f32 %v2000_v7, %v2217_v40 }
  0xfe   :  { %v1161_v18 = vsel %vm1033_vm4, %v969_v1, %v1097_v10  ;;  %v1193_v19 = vsel %vm1065_vm5, %v1001_v4, %v1129_v11  ;;  %v970_v21 = vadd.f32 %v2217_v40, %v549_v12  ;;  %v1969_v22 = vpop.f32.mrf.mxu0  ;;  %v2001_v23 = vpop.f32.mrf.mxu1  ;;  %vm1063_vm7 = vcmp.ge.f32.partialorder %v999_v16, 0.0 }
  0xff   :  { %v1735_v24 = vpack.c.bf16 %v1161_v18, %v1160_v2  ;;  %v1815_v25 = vpack.c.bf16 %v1193_v19, %v1192_v3  ;;  %v1159_v26 = vsel %vm1031_vm6, %v967_v5, %v1095_v15  ;;  %v1127_v28 = vmul.f32 0.2, %v999_v16 }
 0x100   :  { %v1730_v27 = vpack.c.bf16 %v1159_v26, %v1158_v8  ;;  %vm1036_vm8 = vcmp.ge.f32.partialorder %v972_v17, 0.0  ;;  %v1100_v29 = vmul.f32 0.2, %v972_v17  ;;  %v552_v30 = vpop.f32.mrf.mxu0  ;;  %v680_v31 = vpop.f32.mrf.mxu1  ;;  %vm1068_vm9 = vcmp.ge.f32.partialorder %v1004_v20, 0.0 }
 0x101   :  { %1871 = vst [vmem:[%s2385_s3 + $0x28] sm:$0xff] %v1735_v24   ;;  %1887 = vst [vmem:[%s2385_s3 + $0xa8] sm:$0xff] %v1815_v25   ;;  %v1132_v32 = vmul.f32 0.2, %v1004_v20  ;;  %vm1034_vm10 = vcmp.ge.f32.partialorder %v970_v21, 0.0  ;;  %v1191_v34 = vsel %vm1063_vm7, %v999_v16, %v1127_v28  ;;  %v1002_v36 = vadd.f32 %v2217_v40, %v677_v13 }
 0x102   :  { %v1098_v33 = vmul.f32 0.2, %v970_v21  ;;  %1870 = vst [vmem:[%s2385_s3 + $0x20] sm:$0xff] %v1730_v27   ;;  %v1164_v35 = vsel %vm1036_vm8, %v972_v17, %v1100_v29  ;;  %v973_v37 = vadd.f32 %v1969_v22, %v2217_v40  ;;  %v1972_v38 = vpop.f32.mrf.mxu0  ;;  %v2004_v39 = vpop.f32.mrf.mxu1  ;;  %v1810_v41 = vpack.c.bf16 %v1191_v34, %v1190_v14 }
 0x103   :  { %v1196_v42 = vsel %vm1068_vm9, %v1004_v20, %v1132_v32  ;;  %v1005_v44 = vadd.f32 %v2001_v23, %v2217_v40  ;;  %vm1066_vm11 = vcmp.ge.f32.partialorder %v1002_v36, 0.0  ;;  %v1130_v45 = vmul.f32 0.2, %v1002_v36 }
 0x104   :  { %v1162_v43 = vsel %vm1034_vm10, %v970_v21, %v1098_v33  ;;  %vm1037_vm12 = vcmp.ge.f32.partialorder %v973_v37, 0.0  ;;  %v1101_v46 = vmul.f32 0.2, %v973_v37  ;;  %v565_v47 = vpop.f32.mrf.mxu0  ;;  %v693_v48 = vpop.f32.mrf.mxu1  ;;  %1886 = vst [vmem:[%s2385_s3 + $0xa0] sm:$0xff] %v1810_v41   ;;  %v971_v50 = vadd.f32 %v2217_v40, %v552_v30 }
 0x105   :  { %vm1069_vm13 = vcmp.ge.f32.partialorder %v1005_v44, 0.0  ;;  %v1133_v49 = vmul.f32 0.2, %v1005_v44  ;;  %v1003_v51 = vadd.f32 %v2217_v40, %v680_v31  ;;  %v1194_v52 = vsel %vm1066_vm11, %v1002_v36, %v1130_v45 }
 0x106   :  { %v1165_v53 = vsel %vm1037_vm12, %v973_v37, %v1101_v46  ;;  %v976_v54 = vadd.f32 %v1972_v38, %v2217_v40  ;;  %v1008_v55 = vadd.f32 %v2004_v39, %v2217_v40  ;;  %v1973_v56 = vpop.f32.mrf.mxu0  ;;  %v2005_v57 = vpop.f32.mrf.mxu1  ;;  %vm1035_vm14 = vcmp.ge.f32.partialorder %v971_v50, 0.0 }
 0x107   :  { %v1745_v58 = vpack.c.bf16 %v1165_v53, %v1164_v35  ;;  %v1197_v59 = vsel %vm1069_vm13, %v1005_v44, %v1133_v49  ;;  %v1099_v60 = vmul.f32 0.2, %v971_v50  ;;  %vm1067_vm15 = vcmp.ge.f32.partialorder %v1003_v51, 0.0 }
 0x108   :  { %v1825_v61 = vpack.c.bf16 %v1197_v59, %v1196_v42  ;;  %v1131_v62 = vmul.f32 0.2, %v1003_v51  ;;  %vm1040_vm0 = vcmp.ge.f32.partialorder %v976_v54, 0.0  ;;  %v568_v63 = vpop.f32.mrf.mxu0  ;;  %v696_v0 = vpop.f32.mrf.mxu1  ;;  %v1104_v2 = vmul.f32 0.2, %v976_v54 }
 0x109   :  { %1873 = vst [vmem:[%s2385_s3 + $0x38] sm:$0xff] %v1745_v58   ;;  %v1163_v1 = vsel %vm1035_vm14, %v971_v50, %v1099_v60  ;;  %vm1072_vm1 = vcmp.ge.f32.partialorder %v1008_v55, 0.0  ;;  %v1136_v3 = vmul.f32 0.2, %v1008_v55  ;;  %v974_v6 = vadd.f32 %v2217_v40, %v565_v47 }
 0x10a   :  { %1889 = vst [vmem:[%s2385_s3 + $0xb8] sm:$0xff] %v1825_v61   ;;  %v1740_v4 = vpack.c.bf16 %v1163_v1, %v1162_v43  ;;  %v1195_v5 = vsel %vm1067_vm15, %v1003_v51, %v1131_v62  ;;  %v1006_v7 = vadd.f32 %v2217_v40, %v693_v48  ;;  %v1976_v8 = vpop.f32.mrf.mxu0  ;;  %v2008_v9 = vpop.f32.mrf.mxu1  ;;  %v1168_v11 = vsel %vm1040_vm0, %v976_v54, %v1104_v2 }
 0x10b   :  { %v1820_v10 = vpack.c.bf16 %v1195_v5, %v1194_v52  ;;  %v1200_v12 = vsel %vm1072_vm1, %v1008_v55, %v1136_v3  ;;  %v977_v13 = vadd.f32 %v1973_v56, %v2217_v40  ;;  %vm1038_vm2 = vcmp.ge.f32.partialorder %v974_v6, 0.0 }
 0x10c   :  { %1872 = vst [vmem:[%s2385_s3 + $0x30] sm:$0xff] %v1740_v4   ;;  %v1102_v14 = vmul.f32 0.2, %v974_v6  ;;  %vm1070_vm3 = vcmp.ge.f32.partialorder %v1006_v7, 0.0  ;;  %v1134_v15 = vmul.f32 0.2, %v1006_v7  ;;  %v581_v16 = vpop.f32.mrf.mxu0  ;;  %v709_v17 = vpop.f32.mrf.mxu1  ;;  %v1009_v19 = vadd.f32 %v2005_v57, %v2217_v40 }
 0x10d   :  { %1888 = vst [vmem:[%s2385_s3 + $0xb0] sm:$0xff] %v1820_v10   ;;  %vm1041_vm4 = vcmp.ge.f32.partialorder %v977_v13, 0.0  ;;  %v1105_v18 = vmul.f32 0.2, %v977_v13  ;;  %v975_v20 = vadd.f32 %v2217_v40, %v568_v63  ;;  %v1007_v23 = vadd.f32 %v2217_v40, %v696_v0 }
 0x10e   :  { %v1166_v21 = vsel %vm1038_vm2, %v974_v6, %v1102_v14  ;;  %v1198_v22 = vsel %vm1070_vm3, %v1006_v7, %v1134_v15  ;;  %v980_v24 = vadd.f32 %v1976_v8, %v2217_v40  ;;  %v1977_v25 = vpop.f32.mrf.mxu0  ;;  %v2009_v26 = vpop.f32.mrf.mxu1  ;;  %vm1073_vm5 = vcmp.ge.f32.partialorder %v1009_v19, 0.0 }
 0x10f   :  { %v1169_v27 = vsel %vm1041_vm4, %v977_v13, %v1105_v18  ;;  %v1137_v28 = vmul.f32 0.2, %v1009_v19  ;;  %vm1039_vm6 = vcmp.ge.f32.partialorder %v975_v20, 0.0  ;;  %v1103_v30 = vmul.f32 0.2, %v975_v20 }
 0x110   :  { %v1755_v29 = vpack.c.bf16 %v1169_v27, %v1168_v11  ;;  %vm1071_vm7 = vcmp.ge.f32.partialorder %v1007_v23, 0.0  ;;  %v1135_v31 = vmul.f32 0.2, %v1007_v23  ;;  %v584_v32 = vpop.f32.mrf.mxu0  ;;  %v712_v33 = vpop.f32.mrf.mxu1  ;;  %vm1044_vm8 = vcmp.ge.f32.partialorder %v980_v24, 0.0 }
 0x111   :  { %v1201_v34 = vsel %vm1073_vm5, %v1009_v19, %v1137_v28  ;;  %v1108_v35 = vmul.f32 0.2, %v980_v24  ;;  %v1012_v36 = vadd.f32 %v2008_v9, %v2217_v40  ;;  %v1167_v38 = vsel %vm1039_vm6, %v975_v20, %v1103_v30 }
 0x112   :  { %1875 = vst [vmem:[%s2385_s3 + $0x48] sm:$0xff] %v1755_v29   ;;  %v1835_v37 = vpack.c.bf16 %v1201_v34, %v1200_v12  ;;  %v1199_v39 = vsel %vm1071_vm7, %v1007_v23, %v1135_v31  ;;  %v978_v41 = vadd.f32 %v2217_v40, %v581_v16  ;;  %v1980_v42 = vpop.f32.mrf.mxu0  ;;  %v2012_v43 = vpop.f32.mrf.mxu1  ;;  %v1750_v44 = vpack.c.bf16 %v1167_v38, %v1166_v21 }
 0x113   :  { %v1830_v45 = vpack.c.bf16 %v1199_v39, %v1198_v22  ;;  %v1172_v46 = vsel %vm1044_vm8, %v980_v24, %v1108_v35  ;;  %vm1076_vm9 = vcmp.ge.f32.partialorder %v1012_v36, 0.0  ;;  %v1140_v47 = vmul.f32 0.2, %v1012_v36 }
 0x114   :  { %1891 = vst [vmem:[%s2385_s3 + $0xc8] sm:$0xff] %v1835_v37   ;;  %vm1042_vm10 = vcmp.ge.f32.partialorder %v978_v41, 0.0  ;;  %v1106_v48 = vmul.f32 0.2, %v978_v41  ;;  %v1010_v49 = vadd.f32 %v2217_v40, %v709_v17  ;;  %v597_v50 = vpop.f32.mrf.mxu0  ;;  %v725_v51 = vpop.f32.mrf.mxu1  ;;  %1874 = vst [vmem:[%s2385_s3 + $0x40] sm:$0xff] %v1750_v44   ;;  %v981_v52 = vadd.f32 %v1977_v25, %v2217_v40 }
 0x115   :  { %1890 = vst [vmem:[%s2385_s3 + $0xc0] sm:$0xff] %v1830_v45   ;;  %v1013_v53 = vadd.f32 %v2009_v26, %v2217_v40  ;;  %v979_v54 = vadd.f32 %v2217_v40, %v584_v32  ;;  %v1011_v55 = vadd.f32 %v2217_v40, %v712_v33  ;;  %v1204_v56 = vsel %vm1076_vm9, %v1012_v36, %v1140_v47 }
 0x116   :  { %v1170_v57 = vsel %vm1042_vm10, %v978_v41, %v1106_v48  ;;  %vm1074_vm11 = vcmp.ge.f32.partialorder %v1010_v49, 0.0  ;;  %v1138_v58 = vmul.f32 0.2, %v1010_v49  ;;  %v1981_v59 = vpop.f32.mrf.mxu0  ;;  %v2013_v60 = vpop.f32.mrf.mxu1  ;;  %vm1045_vm12 = vcmp.ge.f32.partialorder %v981_v52, 0.0 }
 0x117   :  { %v1109_v61 = vmul.f32 0.2, %v981_v52  ;;  %vm1077_vm13 = vcmp.ge.f32.partialorder %v1013_v53, 0.0  ;;  %v1141_v62 = vmul.f32 0.2, %v1013_v53  ;;  %vm1043_vm14 = vcmp.ge.f32.partialorder %v979_v54, 0.0 }
 0x118   :  { %v1202_v63 = vsel %vm1074_vm11, %v1010_v49, %v1138_v58  ;;  %v1107_v0 = vmul.f32 0.2, %v979_v54  ;;  %vm1075_vm15 = vcmp.ge.f32.partialorder %v1011_v55, 0.0  ;;  %v600_v1 = vpop.f32.mrf.mxu0  ;;  %v728_v2 = vpop.f32.mrf.mxu1  ;;  %v1139_v5 = vmul.f32 0.2, %v1011_v55 }
 0x119   :  { %v1173_v3 = vsel %vm1045_vm12, %v981_v52, %v1109_v61  ;;  %v1205_v4 = vsel %vm1077_vm13, %v1013_v53, %v1141_v62  ;;  %v984_v6 = vadd.f32 %v1980_v42, %v2217_v40  ;;  %v1016_v10 = vadd.f32 %v2012_v43, %v2217_v40 }
 0x11a   :  { %v1765_v7 = vpack.c.bf16 %v1173_v3, %v1172_v46  ;;  %v1845_v8 = vpack.c.bf16 %v1205_v4, %v1204_v56  ;;  %v1171_v9 = vsel %vm1043_vm14, %v979_v54, %v1107_v0  ;;  %v1984_v11 = vpop.f32.mrf.mxu0  ;;  %v2016_v12 = vpop.f32.mrf.mxu1  ;;  %v1203_v14 = vsel %vm1075_vm15, %v1011_v55, %v1139_v5 }
 0x11b   :  { %v1760_v13 = vpack.c.bf16 %v1171_v9, %v1170_v57  ;;  %vm1048_vm0 = vcmp.ge.f32.partialorder %v984_v6, 0.0  ;;  %v1112_v15 = vmul.f32 0.2, %v984_v6  ;;  %v1840_v16 = vpack.c.bf16 %v1203_v14, %v1202_v63 }
 0x11c   :  { %1877 = vst [vmem:[%s2385_s3 + $0x58] sm:$0xff] %v1765_v7   ;;  %1893 = vst [vmem:[%s2385_s3 + $0xd8] sm:$0xff] %v1845_v8   ;;  %vm1080_vm1 = vcmp.ge.f32.partialorder %v1016_v10, 0.0  ;;  %v1144_v17 = vmul.f32 0.2, %v1016_v10  ;;  %v982_v18 = vadd.f32 %v2217_v40, %v597_v50  ;;  %v1014_v19 = vadd.f32 %v2217_v40, %v725_v51  ;;  %v613_v25 = vpop.f32.mrf.mxu0  ;;  %v741_v26 = vpop.f32.mrf.mxu1 }
 0x11d   :  { %1876 = vst [vmem:[%s2385_s3 + $0x50] sm:$0xff] %v1760_v13   ;;  %v985_v20 = vadd.f32 %v1981_v59, %v2217_v40  ;;  %v1017_v21 = vadd.f32 %v2013_v60, %v2217_v40  ;;  %1892 = vst [vmem:[%s2385_s3 + $0xd0] sm:$0xff] %v1840_v16   ;;  %v1176_v22 = vsel %vm1048_vm0, %v984_v6, %v1112_v15 }
 0x11e   :  { %vm1046_vm2 = vcmp.ge.f32.partialorder %v982_v18, 0.0  ;;  %v1110_v23 = vmul.f32 0.2, %v982_v18  ;;  %v983_v24 = vadd.f32 %v2217_v40, %v600_v1  ;;  %v1208_v27 = vsel %vm1080_vm1, %v1016_v10, %v1144_v17  ;;  %v1985_v39 = vpop.f32.mrf.mxu0  ;;  %v2017_v41 = vpop.f32.mrf.mxu1 }
 0x11f   :  { %vm1078_vm3 = vcmp.ge.f32.partialorder %v1014_v19, 0.0  ;;  %vm1049_vm4 = vcmp.ge.f32.partialorder %v985_v20, 0.0  ;;  %v1113_v28 = vmul.f32 0.2, %v985_v20  ;;  %v1142_v29 = vmul.f32 0.2, %v1014_v19 }
 0x120   :  { %vm1081_vm5 = vcmp.ge.f32.partialorder %v1017_v21, 0.0  ;;  %v1145_v30 = vmul.f32 0.2, %v1017_v21  ;;  %vm1047_vm6 = vcmp.ge.f32.partialorder %v983_v24, 0.0  ;;  %v1174_v31 = vsel %vm1046_vm2, %v982_v18, %v1110_v23  ;;  %v616_v55 = vpop.f32.mrf.mxu0  ;;  %v744_v56 = vpop.f32.mrf.mxu1 }
 0x121   :  { %v1177_v32 = vsel %vm1049_vm4, %v985_v20, %v1113_v28  ;;  %v1111_v33 = vmul.f32 0.2, %v983_v24  ;;  %v1015_v34 = vadd.f32 %v2217_v40, %v728_v2  ;;  %v988_v37 = vadd.f32 %v1984_v11, %v2217_v40 }
 0x122   :  { %v1775_v35 = vpack.c.bf16 %v1177_v32, %v1176_v22  ;;  %v1209_v36 = vsel %vm1081_vm5, %v1017_v21, %v1145_v30  ;;  %v1020_v38 = vadd.f32 %v2016_v12, %v2217_v40  ;;  %v1206_v45 = vsel %vm1078_vm3, %v1014_v19, %v1142_v29 }
 0x123   :  { %v1855_v42 = vpack.c.bf16 %v1209_v36, %v1208_v27  ;;  %v1175_v43 = vsel %vm1047_vm6, %v983_v24, %v1111_v33  ;;  %vm1079_vm7 = vcmp.ge.f32.partialorder %v1015_v34, 0.0  ;;  %v1143_v44 = vmul.f32 0.2, %v1015_v34 }
 0x124   :  { %1879 = vst [vmem:[%s2385_s3 + $0x68] sm:$0xff] %v1775_v35   ;;  %v1770_v46 = vpack.c.bf16 %v1175_v43, %v1174_v31  ;;  %vm1052_vm8 = vcmp.ge.f32.partialorder %v988_v37, 0.0  ;;  %v1116_v47 = vmul.f32 0.2, %v988_v37  ;;  %vm1084_vm9 = vcmp.ge.f32.partialorder %v1020_v38, 0.0 }
 0x125   :  { %1895 = vst [vmem:[%s2385_s3 + $0xe8] sm:$0xff] %v1855_v42   ;;  %v1207_v48 = vsel %vm1079_vm7, %v1015_v34, %v1143_v44  ;;  %v1148_v49 = vmul.f32 0.2, %v1020_v38  ;;  %v986_v50 = vadd.f32 %v2217_v40, %v613_v25  ;;  %v1018_v52 = vadd.f32 %v2217_v40, %v741_v26 }
 0x126   :  { %1878 = vst [vmem:[%s2385_s3 + $0x60] sm:$0xff] %v1770_v46   ;;  %v1850_v51 = vpack.c.bf16 %v1207_v48, %v1206_v45  ;;  %v989_v53 = vadd.f32 %v1985_v39, %v2217_v40  ;;  %v1021_v54 = vadd.f32 %v2017_v41, %v2217_v40  ;;  %v1180_v57 = vsel %vm1052_vm8, %v988_v37, %v1116_v47 }
 0x127   :  { %v1212_v58 = vsel %vm1084_vm9, %v1020_v38, %v1148_v49  ;;  %v1114_v60 = vmul.f32 0.2, %v986_v50  ;;  %v987_v62 = vadd.f32 %v2217_v40, %v616_v55  ;;  %v1019_v63 = vadd.f32 %v2217_v40, %v744_v56 }
 0x128   :  { %1894 = vst [vmem:[%s2385_s3 + $0xe0] sm:$0xff] %v1850_v51   ;;  %vm1053_vm10 = vcmp.ge.f32.partialorder %v989_v53, 0.0  ;;  %v1117_v59 = vmul.f32 0.2, %v989_v53  ;;  %vm1085_vm11 = vcmp.ge.f32.partialorder %v1021_v54, 0.0  ;;  %vm1050_vm12 = vcmp.ge.f32.partialorder %v986_v50, 0.0 }
 0x129   :  { %v1149_v61 = vmul.f32 0.2, %v1021_v54  ;;  %vm1082_vm13 = vcmp.ge.f32.partialorder %v1018_v52, 0.0  ;;  %v1146_v0 = vmul.f32 0.2, %v1018_v52  ;;  %vm1051_vm14 = vcmp.ge.f32.partialorder %v987_v62, 0.0 }
 0x12a   :  { %v1181_v1 = vsel %vm1053_vm10, %v989_v53, %v1117_v59  ;;  %v1115_v4 = vmul.f32 0.2, %v987_v62  ;;  %vm1083_vm15 = vcmp.ge.f32.partialorder %v1019_v63, 0.0  ;;  %v1147_v6 = vmul.f32 0.2, %v1019_v63 }
 0x12b   :  { %v1785_v2 = vpack.c.bf16 %v1181_v1, %v1180_v57  ;;  %v1213_v3 = vsel %vm1085_vm11, %v1021_v54, %v1149_v61  ;;  %v1178_v7 = vsel %vm1050_vm12, %v986_v50, %v1114_v60  ;;  %v1210_v9 = vsel %vm1082_vm13, %v1018_v52, %v1146_v0 }
 0x12c   :  { %v1865_v5 = vpack.c.bf16 %v1213_v3, %v1212_v58  ;;  %v1179_v8 = vsel %vm1051_vm14, %v987_v62, %v1115_v4  ;;  %v1211_v10 = vsel %vm1083_vm15, %v1019_v63, %v1147_v6 }
 0x12d   :  { %1881 = vst [vmem:[%s2385_s3 + $0x78] sm:$0xff] %v1785_v2   ;;  %v1780_v40 = vpack.c.bf16 %v1179_v8, %v1178_v7  ;;  %v1860_v11 = vpack.c.bf16 %v1211_v10, %v1210_v9 }
 0x12e   :  { %1897 = vst [vmem:[%s2385_s3 + $0xf8] sm:$0xff] %v1865_v5  }
 0x12f   :  { %1880 = vst [vmem:[%s2385_s3 + $0x70] sm:$0xff] %v1780_v40   ;;  %1896 = vst [vmem:[%s2385_s3 + $0xf0] sm:$0xff] %v1860_v11  }

// kernel: _lambda_.6
= control target key start
LH: loop header
LB: loop body
LE: loop exit
PB: predicated region body
PF: predicated region fallthrough
CT: control target
= control target key end

     0   :  { %s777_s1 = inlined_call_operand.vmem [shape: bf16[128,128], index: 1, kind: input, shape index: {}]   ;;  %s778_s0 = inlined_call_operand.vmem [shape: bf16[128,128], index: 0, kind: input, shape index: {}]   ;;  %s779_s2 = inlined_call_operand.vmem [shape: f32[1,128], index: 2, kind: input, shape index: {}]   ;;  %s780_s3 = inlined_call_operand.vmem [shape: bf16[128,128], index: 3, kind: output, shape index: {}]  }
   0x1   :  { %v642_v0 = vld [vmem:[%s777_s1 + $0x38] sm:$0xff]   ;;  %v643_v1 = vld [vmem:[%s777_s1 + $0x30] sm:$0xff]   ;;  %v644_v2 = vld [vmem:[%s777_s1 + $0x28] sm:$0xff]  }
   0x2   :  { %594 = vmatprep.subr.bf16.mxu0 %v642_v0  ;;  %626 = vmatprep.subr.bf16.mxu1 %v642_v0  ;;  %v645_v3 = vld [vmem:[%s777_s1 + $0x20] sm:$0xff]   ;;  %v646_v6 = vld [vmem:[%s777_s1 + $0x18] sm:$0xff]   ;;  %v647_v7 = vld [vmem:[%s777_s1 + $0x10] sm:$0xff]  }
   0x3   :  { %595 = vmatpush3.bf16.msra.mxu0 %v642_v0  ;;  %634 = vmatpush3.bf16.msra.mxu1 %v642_v0  ;;  %v650_v4 = vld [vmem:[%s778_s0] sm:$0xff]   ;;  %v648_v8 = vld [vmem:[%s777_s1 + $0x8] sm:$0xff]   ;;  %v654_v12 = vld [vmem:[%s778_s0 + $0x10] sm:$0xff]  }
   0x4   :  { %596 = vmatprep.subr.bf16.mxu0 %v643_v1  ;;  %627 = vmatprep.subr.bf16.mxu1 %v643_v1  ;;  %v651_v5 = vld [vmem:[%s778_s0 + $0x20] sm:$0xff]   ;;  %v652_v10 = vld [vmem:[%s778_s0 + $0x8] sm:$0xff]   ;;  %v655_v13 = vld [vmem:[%s778_s0 + $0x30] sm:$0xff]  }
   0x5   :  { %610 = vmatprep.mubr.bf16.mxu0 %v650_v4  ;;  %618 = vmatprep.mubr.bf16.mxu1 %v651_v5  ;;  %v649_v9 = vld [vmem:[%s777_s1] sm:$0xff]   ;;  %v653_v11 = vld [vmem:[%s778_s0 + $0x28] sm:$0xff]   ;;  %v656_v14 = vld [vmem:[%s778_s0 + $0x18] sm:$0xff]  }
   0x6   :  { %v657_v15 = vld [vmem:[%s778_s0 + $0x38] sm:$0xff]   ;;  %v729_v16 = vld [vmem:[%s779_s2] ss:$0 sm:$0xff] }
   0x7   :  { %597 = vmatpush3.bf16.msra.mxu0 %v643_v1  ;;  %635 = vmatpush3.bf16.msra.mxu1 %v643_v1 }
   0x8   :  { %598 = vmatprep.subr.bf16.mxu0 %v644_v2  ;;  %628 = vmatprep.subr.bf16.mxu1 %v644_v2 }
   0xb   :  { %599 = vmatpush3.bf16.msra.mxu0 %v644_v2  ;;  %636 = vmatpush3.bf16.msra.mxu1 %v644_v2 }
   0xc   :  { %600 = vmatprep.subr.bf16.mxu0 %v645_v3  ;;  %629 = vmatprep.subr.bf16.mxu1 %v645_v3 }
   0xf   :  { %601 = vmatpush3.bf16.msra.mxu0 %v645_v3  ;;  %637 = vmatpush3.bf16.msra.mxu1 %v645_v3 }
  0x10   :  { %602 = vmatprep.subr.bf16.mxu0 %v646_v6  ;;  %630 = vmatprep.subr.bf16.mxu1 %v646_v6 }
  0x13   :  { %603 = vmatpush3.bf16.msra.mxu0 %v646_v6  ;;  %638 = vmatpush3.bf16.msra.mxu1 %v646_v6 }
  0x14   :  { %604 = vmatprep.subr.bf16.mxu0 %v647_v7  ;;  %631 = vmatprep.subr.bf16.mxu1 %v647_v7 }
  0x17   :  { %605 = vmatpush3.bf16.msra.mxu0 %v647_v7  ;;  %639 = vmatpush3.bf16.msra.mxu1 %v647_v7 }
  0x18   :  { %606 = vmatprep.subr.bf16.mxu0 %v648_v8  ;;  %632 = vmatprep.subr.bf16.mxu1 %v648_v8 }
  0x1b   :  { %607 = vmatpush3.bf16.msra.mxu0 %v648_v8  ;;  %640 = vmatpush3.bf16.msra.mxu1 %v648_v8 }
  0x1c   :  { %608 = vmatprep.subr.bf16.mxu0 %v649_v9  ;;  %633 = vmatprep.subr.bf16.mxu1 %v649_v9 }
  0x1f   :  { %609 = vmatpush3.bf16.msra.mxu0 %v649_v9  ;;  %641 = vmatpush3.bf16.msra.mxu1 %v649_v9 }
  0x22   :  { %611 = vmatmul.mubr.bf16.vlgmr.msra.gmra.mxu0 %v652_v10  ;;  %619 = vmatmul.mubr.bf16.vlgmr.msra.gmra.mxu1 %v653_v11 }
  0x23   :  { %614 = vmatprep.mubr.bf16.mxu0 %v654_v12  ;;  %622 = vmatprep.mubr.bf16.mxu1 %v655_v13 }
  0x2a   :  { %615 = vmatmul.mubr.bf16.gmra.mxu0 %v656_v14  ;;  %623 = vmatmul.mubr.bf16.gmra.mxu1 %v657_v15 }
  0xe2   :  { %v612_v17 = vpop.f32.mrf.mxu0  ;;  %v620_v18 = vpop.f32.mrf.mxu1 }
  0xe3   :  { %v336_v19 = vadd.f32 %v612_v17, %v729_v16  ;;  %v344_v20 = vadd.f32 %v620_v18, %v729_v16 }
  0xe4   :  { %v213_v21 = vpop.f32.mrf.mxu0  ;;  %v245_v22 = vpop.f32.mrf.mxu1 }
  0xe5   :  { %vm352_vm0 = vcmp.ge.f32.partialorder %v336_v19, 0.0  ;;  %v368_v23 = vmul.f32 0.2, %v336_v19  ;;  %vm360_vm1 = vcmp.ge.f32.partialorder %v344_v20, 0.0  ;;  %v376_v24 = vmul.f32 0.2, %v344_v20 }
  0xe6   :  { %v334_v25 = vadd.f32 %v729_v16, %v213_v21  ;;  %v342_v26 = vadd.f32 %v729_v16, %v245_v22  ;;  %v613_v27 = vpop.f32.mrf.mxu0  ;;  %v621_v28 = vpop.f32.mrf.mxu1 }
  0xe7   :  { %v337_v29 = vadd.f32 %v613_v27, %v729_v16  ;;  %v345_v30 = vadd.f32 %v621_v28, %v729_v16  ;;  %v384_v31 = vsel %vm352_vm0, %v336_v19, %v368_v23  ;;  %v392_v32 = vsel %vm360_vm1, %v344_v20, %v376_v24 }
  0xe8   :  { %vm350_vm2 = vcmp.ge.f32.partialorder %v334_v25, 0.0  ;;  %v366_v33 = vmul.f32 0.2, %v334_v25  ;;  %v216_v34 = vpop.f32.mrf.mxu0  ;;  %v248_v35 = vpop.f32.mrf.mxu1  ;;  %vm358_vm5 = vcmp.ge.f32.partialorder %v342_v26, 0.0  ;;  %v374_v38 = vmul.f32 0.2, %v342_v26 }
  0xe9   :  { %vm353_vm3 = vcmp.ge.f32.partialorder %v337_v29, 0.0  ;;  %v369_v36 = vmul.f32 0.2, %v337_v29  ;;  %vm361_vm4 = vcmp.ge.f32.partialorder %v345_v30, 0.0  ;;  %v377_v37 = vmul.f32 0.2, %v345_v30 }
  0xea   :  { %v335_v39 = vadd.f32 %v729_v16, %v216_v34  ;;  %v343_v40 = vadd.f32 %v729_v16, %v248_v35  ;;  %v616_v41 = vpop.f32.mrf.mxu0  ;;  %v624_v42 = vpop.f32.mrf.mxu1  ;;  %v382_v53 = vsel %vm350_vm2, %v334_v25, %v366_v33  ;;  %v390_v58 = vsel %vm358_vm5, %v342_v26, %v374_v38 }
  0xeb   :  { %v385_v43 = vsel %vm353_vm3, %v337_v29, %v369_v36  ;;  %v393_v44 = vsel %vm361_vm4, %v345_v30, %v377_v37  ;;  %v340_v45 = vadd.f32 %v616_v41, %v729_v16  ;;  %v348_v46 = vadd.f32 %v624_v42, %v729_v16 }
  0xec   :  { %v539_v47 = vpack.c.bf16 %v385_v43, %v384_v31  ;;  %v559_v48 = vpack.c.bf16 %v393_v44, %v392_v32  ;;  %vm351_vm6 = vcmp.ge.f32.partialorder %v335_v39, 0.0  ;;  %v367_v49 = vmul.f32 0.2, %v335_v39  ;;  %v229_v50 = vpop.f32.mrf.mxu0  ;;  %v261_v51 = vpop.f32.mrf.mxu1 }
  0xed   :  { %vm359_vm7 = vcmp.ge.f32.partialorder %v343_v40, 0.0  ;;  %v375_v52 = vmul.f32 0.2, %v343_v40  ;;  %v338_v55 = vadd.f32 %v729_v16, %v229_v50  ;;  %v346_v61 = vadd.f32 %v729_v16, %v261_v51 }
  0xee   :  { %571 = vst [vmem:[%s780_s3 + $0x8] sm:$0xff] %v539_v47   ;;  %575 = vst [vmem:[%s780_s3 + $0x28] sm:$0xff] %v559_v48   ;;  %v383_v54 = vsel %vm351_vm6, %v335_v39, %v367_v49  ;;  %v617_v56 = vpop.f32.mrf.mxu0  ;;  %v625_v57 = vpop.f32.mrf.mxu1  ;;  %vm356_vm8 = vcmp.ge.f32.partialorder %v340_v45, 0.0  ;;  %v372_v63 = vmul.f32 0.2, %v340_v45  ;;  %vm364_vm9 = vcmp.ge.f32.partialorder %v348_v46, 0.0 }
  0xef   :  { %v534_v59 = vpack.c.bf16 %v383_v54, %v382_v53  ;;  %v391_v60 = vsel %vm359_vm7, %v343_v40, %v375_v52  ;;  %v380_v2 = vmul.f32 0.2, %v348_v46  ;;  %vm354_vm10 = vcmp.ge.f32.partialorder %v338_v55, 0.0 }
  0xf0   :  { %v554_v62 = vpack.c.bf16 %v391_v60, %v390_v58  ;;  %v232_v0 = vpop.f32.mrf.mxu0  ;;  %v264_v1 = vpop.f32.mrf.mxu1  ;;  %v341_v3 = vadd.f32 %v617_v56, %v729_v16  ;;  %v349_v4 = vadd.f32 %v625_v57, %v729_v16  ;;  %v370_v5 = vmul.f32 0.2, %v338_v55 }
  0xf1   :  { %535 = vst [vmem:[%s780_s3] sm:$0xff] %v534_v59   ;;  %vm362_vm11 = vcmp.ge.f32.partialorder %v346_v61, 0.0  ;;  %v339_v6 = vadd.f32 %v729_v16, %v232_v0  ;;  %v347_v7 = vadd.f32 %v729_v16, %v264_v1  ;;  %v378_v8 = vmul.f32 0.2, %v346_v61 }
  0xf2   :  { %574 = vst [vmem:[%s780_s3 + $0x20] sm:$0xff] %v554_v62   ;;  %vm357_vm12 = vcmp.ge.f32.partialorder %v341_v3, 0.0  ;;  %v373_v9 = vmul.f32 0.2, %v341_v3  ;;  %vm365_vm13 = vcmp.ge.f32.partialorder %v349_v4, 0.0  ;;  %v388_v12 = vsel %vm356_vm8, %v340_v45, %v372_v63 }
  0xf3   :  { %v381_v10 = vmul.f32 0.2, %v349_v4  ;;  %vm355_vm14 = vcmp.ge.f32.partialorder %v339_v6, 0.0  ;;  %v371_v11 = vmul.f32 0.2, %v339_v6  ;;  %vm363_vm15 = vcmp.ge.f32.partialorder %v347_v7, 0.0 }
  0xf4   :  { %v396_v13 = vsel %vm364_vm9, %v348_v46, %v380_v2  ;;  %v389_v14 = vsel %vm357_vm12, %v341_v3, %v373_v9  ;;  %v379_v15 = vmul.f32 0.2, %v347_v7  ;;  %v386_v17 = vsel %vm354_vm10, %v338_v55, %v370_v5 }
  0xf5   :  { %v549_v18 = vpack.c.bf16 %v389_v14, %v388_v12  ;;  %v397_v19 = vsel %vm365_vm13, %v349_v4, %v381_v10  ;;  %v387_v20 = vsel %vm355_vm14, %v339_v6, %v371_v11  ;;  %v394_v16 = vsel %vm362_vm11, %v346_v61, %v378_v8 }
  0xf6   :  { %v569_v21 = vpack.c.bf16 %v397_v19, %v396_v13  ;;  %v544_v22 = vpack.c.bf16 %v387_v20, %v386_v17  ;;  %v395_v23 = vsel %vm363_vm15, %v347_v7, %v379_v15 }
  0xf7   :  { %573 = vst [vmem:[%s780_s3 + $0x18] sm:$0xff] %v549_v18   ;;  %v564_v24 = vpack.c.bf16 %v395_v23, %v394_v16 }
  0xf8   :  { %577 = vst [vmem:[%s780_s3 + $0x38] sm:$0xff] %v569_v21   ;;  %572 = vst [vmem:[%s780_s3 + $0x10] sm:$0xff] %v544_v22  }
  0xf9   :  { %576 = vst [vmem:[%s780_s3 + $0x30] sm:$0xff] %v564_v24  }

// kernel: _lambda_.7
= control target key start
LH: loop header
LB: loop body
LE: loop exit
PB: predicated region body
PF: predicated region fallthrough
CT: control target
= control target key end

     0   :  { %s971_s1 = inlined_call_operand.vmem [shape: bf16[256,128], index: 1, kind: input, shape index: {}]   ;;  %s972_s0 = inlined_call_operand.vmem [shape: bf16[128,256], index: 0, kind: input, shape index: {}]   ;;  %s973_s2 = inlined_call_operand.vmem [shape: f32[1,128], index: 2, kind: input, shape index: {}]   ;;  %s974_s3 = inlined_call_operand.vmem [shape: bf16[128,128], index: 3, kind: output, shape index: {}]  }
   0x1   :  { %v770_v0 = vld [vmem:[%s971_s1 + $0x78] sm:$0xff]   ;;  %v772_v2 = vld [vmem:[%s971_s1 + $0x70] sm:$0xff]   ;;  %v774_v4 = vld [vmem:[%s971_s1 + $0x68] sm:$0xff]  }
   0x2   :  { %v771_v1 = vld [vmem:[%s971_s1 + $0x38] sm:$0xff]   ;;  %690 = vmatprep.subr.bf16.mxu0 %v770_v0  ;;  %754 = vmatprep.subr.bf16.mxu1 %v770_v0  ;;  %v773_v3 = vld [vmem:[%s971_s1 + $0x30] sm:$0xff]   ;;  %v775_v5 = vld [vmem:[%s971_s1 + $0x28] sm:$0xff]  }
   0x3   :  { %691 = vmatpush3.bf16.msra.mxu0 %v771_v1  ;;  %762 = vmatpush3.bf16.msra.mxu1 %v771_v1  ;;  %v776_v6 = vld [vmem:[%s971_s1 + $0x60] sm:$0xff]   ;;  %v778_v8 = vld [vmem:[%s971_s1 + $0x58] sm:$0xff]   ;;  %v780_v10 = vld [vmem:[%s971_s1 + $0x50] sm:$0xff]  }
   0x4   :  { %692 = vmatprep.subr.bf16.mxu0 %v772_v2  ;;  %755 = vmatprep.subr.bf16.mxu1 %v772_v2  ;;  %v777_v7 = vld [vmem:[%s971_s1 + $0x20] sm:$0xff]   ;;  %v779_v9 = vld [vmem:[%s971_s1 + $0x18] sm:$0xff]   ;;  %v781_v13 = vld [vmem:[%s971_s1 + $0x10] sm:$0xff]  }
   0x5   :  { %v788_v11 = vld [vmem:[%s972_s0 + $0x4] ss:$8 sps:$4 sm:$0xff]   ;;  %v786_v18 = vld [vmem:[%s972_s0] ss:$8 sps:$4 sm:$0xff]   ;;  %v792_v20 = vld [vmem:[%s972_s0 + $0x14] ss:$8 sps:$4 sm:$0xff]  }
   0x6   :  { %v791_v12 = vld [vmem:[%s972_s0 + $0x44] ss:$8 sps:$4 sm:$0xff]   ;;  %307 = vmatprep.mubr.bf16.mxu0 %v788_v11  ;;  %v789_v19 = vld [vmem:[%s972_s0 + $0x40] ss:$8 sps:$4 sm:$0xff]   ;;  %v794_v21 = vld [vmem:[%s972_s0 + $0x54] ss:$8 sps:$4 sm:$0xff]  }
   0x7   :  { %693 = vmatpush3.bf16.msra.mxu0 %v773_v3  ;;  %763 = vmatpush3.bf16.msra.mxu1 %v773_v3  ;;  %v782_v14 = vld [vmem:[%s971_s1 + $0x48] sm:$0xff]   ;;  %v784_v16 = vld [vmem:[%s971_s1 + $0x40] sm:$0xff]   ;;  %v796_v22 = vld [vmem:[%s972_s0 + $0x10] ss:$8 sps:$4 sm:$0xff]  }
   0x8   :  { %694 = vmatprep.subr.bf16.mxu0 %v774_v4  ;;  %756 = vmatprep.subr.bf16.mxu1 %v774_v4  ;;  %v783_v15 = vld [vmem:[%s971_s1 + $0x8] sm:$0xff]   ;;  %v785_v17 = vld [vmem:[%s971_s1] sm:$0xff]   ;;  %v797_v23 = vld [vmem:[%s972_s0 + $0x50] ss:$8 sps:$4 sm:$0xff]  }
   0x9   :  { %339 = vmatprep.mubr.bf16.mxu1 %v791_v12  ;;  %v798_v24 = vld [vmem:[%s972_s0 + $0x24] ss:$8 sps:$4 sm:$0xff]   ;;  %v802_v26 = vld [vmem:[%s972_s0 + $0x20] ss:$8 sps:$4 sm:$0xff]   ;;  %v804_v28 = vld [vmem:[%s972_s0 + $0x34] ss:$8 sps:$4 sm:$0xff]  }
   0xa   :  { %v800_v25 = vld [vmem:[%s972_s0 + $0x64] ss:$8 sps:$4 sm:$0xff]   ;;  %v803_v27 = vld [vmem:[%s972_s0 + $0x60] ss:$8 sps:$4 sm:$0xff]   ;;  %v806_v29 = vld [vmem:[%s972_s0 + $0x74] ss:$8 sps:$4 sm:$0xff]  }
   0xb   :  { %695 = vmatpush3.bf16.msra.mxu0 %v775_v5  ;;  %764 = vmatpush3.bf16.msra.mxu1 %v775_v5  ;;  %v808_v30 = vld [vmem:[%s972_s0 + $0x30] ss:$8 sps:$4 sm:$0xff]   ;;  %v929_v35 = vld [vmem:[%s973_s2] ss:$0 sm:$0xff] }
   0xc   :  { %696 = vmatprep.subr.bf16.mxu0 %v776_v6  ;;  %757 = vmatprep.subr.bf16.mxu1 %v776_v6  ;;  %v809_v31 = vld [vmem:[%s972_s0 + $0x70] ss:$8 sps:$4 sm:$0xff]  }
   0xf   :  { %697 = vmatpush3.bf16.msra.mxu0 %v777_v7  ;;  %765 = vmatpush3.bf16.msra.mxu1 %v777_v7 }
  0x10   :  { %698 = vmatprep.subr.bf16.mxu0 %v778_v8  ;;  %758 = vmatprep.subr.bf16.mxu1 %v778_v8 }
  0x13   :  { %699 = vmatpush3.bf16.msra.mxu0 %v779_v9  ;;  %766 = vmatpush3.bf16.msra.mxu1 %v779_v9 }
  0x14   :  { %700 = vmatprep.subr.bf16.mxu0 %v780_v10  ;;  %759 = vmatprep.subr.bf16.mxu1 %v780_v10 }
  0x17   :  { %701 = vmatpush3.bf16.msra.mxu0 %v781_v13  ;;  %767 = vmatpush3.bf16.msra.mxu1 %v781_v13 }
  0x18   :  { %702 = vmatprep.subr.bf16.mxu0 %v782_v14  ;;  %760 = vmatprep.subr.bf16.mxu1 %v782_v14 }
  0x1b   :  { %703 = vmatpush3.bf16.msra.mxu0 %v783_v15  ;;  %768 = vmatpush3.bf16.msra.mxu1 %v783_v15 }
  0x1c   :  { %704 = vmatprep.subr.bf16.mxu0 %v784_v16  ;;  %761 = vmatprep.subr.bf16.mxu1 %v784_v16 }
  0x1f   :  { %705 = vmatpush3.bf16.msra.mxu0 %v785_v17  ;;  %769 = vmatpush3.bf16.msra.mxu1 %v785_v17 }
  0x22   :  { %308 = vmatmul.mubr.bf16.vlgmr.msra.gmra.mxu0 %v786_v18  ;;  %340 = vmatmul.mubr.bf16.vlgmr.msra.gmra.mxu1 %v789_v19 }
  0x23   :  { %315 = vmatprep.mubr.bf16.mxu0 %v792_v20  ;;  %347 = vmatprep.mubr.bf16.mxu1 %v794_v21 }
  0x2a   :  { %316 = vmatmul.mubr.bf16.gmra.mxu0 %v796_v22  ;;  %348 = vmatmul.mubr.bf16.gmra.mxu1 %v797_v23 }
  0x2b   :  { %323 = vmatprep.mubr.bf16.mxu0 %v798_v24  ;;  %355 = vmatprep.mubr.bf16.mxu1 %v800_v25 }
  0x32   :  { %324 = vmatmul.mubr.bf16.gmra.mxu0 %v802_v26  ;;  %356 = vmatmul.mubr.bf16.gmra.mxu1 %v803_v27 }
  0x33   :  { %331 = vmatprep.mubr.bf16.mxu0 %v804_v28  ;;  %363 = vmatprep.mubr.bf16.mxu1 %v806_v29 }
  0x3a   :  { %332 = vmatmul.mubr.bf16.gmra.mxu0 %v808_v30  ;;  %364 = vmatmul.mubr.bf16.gmra.mxu1 %v809_v31 }
  0xe2   :  { %v706_v32 = vpop.f32.mrf.mxu0  ;;  %v730_v33 = vpop.f32.mrf.mxu1 }
  0xe4   :  { %v707_v34 = vpop.f32.mrf.mxu0  ;;  %v731_v36 = vpop.f32.mrf.mxu1 }
  0xe5   :  { %v708_v37 = vadd.f32 %v707_v34, %v706_v32  ;;  %v732_v38 = vadd.f32 %v731_v36, %v730_v33 }
  0xe6   :  { %v709_v39 = vpop.f32.mrf.mxu0  ;;  %v733_v40 = vpop.f32.mrf.mxu1 }
  0xe7   :  { %v430_v41 = vadd.f32 %v708_v37, %v929_v35  ;;  %v438_v42 = vadd.f32 %v732_v38, %v929_v35 }
  0xe8   :  { %v710_v43 = vpop.f32.mrf.mxu0  ;;  %v734_v44 = vpop.f32.mrf.mxu1 }
  0xe9   :  { %v711_v45 = vadd.f32 %v710_v43, %v709_v39  ;;  %v735_v46 = vadd.f32 %v734_v44, %v733_v40  ;;  %v462_v49 = vmul.f32 0.2, %v430_v41  ;;  %v470_v50 = vmul.f32 0.2, %v438_v42 }
  0xea   :  { %v712_v47 = vpop.f32.mrf.mxu0  ;;  %v736_v48 = vpop.f32.mrf.mxu1  ;;  %vm446_vm0 = vcmp.ge.f32.partialorder %v430_v41, 0.0  ;;  %vm454_vm1 = vcmp.ge.f32.partialorder %v438_v42, 0.0 }
  0xeb   :  { %v431_v51 = vadd.f32 %v711_v45, %v929_v35  ;;  %v439_v52 = vadd.f32 %v735_v46, %v929_v35  ;;  %v478_v61 = vsel %vm446_vm0, %v430_v41, %v462_v49  ;;  %v486_v62 = vsel %vm454_vm1, %v438_v42, %v470_v50 }
  0xec   :  { %v713_v53 = vpop.f32.mrf.mxu0  ;;  %v737_v54 = vpop.f32.mrf.mxu1 }
  0xed   :  { %v714_v55 = vadd.f32 %v713_v53, %v712_v47  ;;  %v738_v56 = vadd.f32 %v737_v54, %v736_v48  ;;  %vm447_vm2 = vcmp.ge.f32.partialorder %v431_v51, 0.0  ;;  %v463_v57 = vmul.f32 0.2, %v431_v51 }
  0xee   :  { %vm455_vm3 = vcmp.ge.f32.partialorder %v439_v52, 0.0  ;;  %v471_v58 = vmul.f32 0.2, %v439_v52  ;;  %v715_v59 = vpop.f32.mrf.mxu0  ;;  %v739_v60 = vpop.f32.mrf.mxu1 }
  0xef   :  { %v479_v63 = vsel %vm447_vm2, %v431_v51, %v463_v57  ;;  %v432_v1 = vadd.f32 %v714_v55, %v929_v35  ;;  %v440_v2 = vadd.f32 %v738_v56, %v929_v35 }
  0xf0   :  { %v487_v0 = vsel %vm455_vm3, %v439_v52, %v471_v58  ;;  %v716_v3 = vpop.f32.mrf.mxu0  ;;  %v740_v4 = vpop.f32.mrf.mxu1  ;;  %v646_v5 = vpack.c.bf16 %v479_v63, %v478_v61 }
  0xf1   :  { %v666_v6 = vpack.c.bf16 %v487_v0, %v486_v62  ;;  %v717_v7 = vadd.f32 %v716_v3, %v715_v59  ;;  %v741_v8 = vadd.f32 %v740_v4, %v739_v60  ;;  %v464_v11 = vmul.f32 0.2, %v432_v1 }
  0xf2   :  { %v718_v9 = vpop.f32.mrf.mxu0  ;;  %v742_v10 = vpop.f32.mrf.mxu1  ;;  %647 = vst [vmem:[%s974_s3] sm:$0xff] %v646_v5   ;;  %v472_v12 = vmul.f32 0.2, %v440_v2  ;;  %vm448_vm4 = vcmp.ge.f32.partialorder %v432_v1, 0.0  ;;  %vm456_vm5 = vcmp.ge.f32.partialorder %v440_v2, 0.0 }
  0xf3   :  { %686 = vst [vmem:[%s974_s3 + $0x20] sm:$0xff] %v666_v6   ;;  %v433_v13 = vadd.f32 %v717_v7, %v929_v35  ;;  %v441_v14 = vadd.f32 %v741_v8, %v929_v35  ;;  %v480_v25 = vsel %vm448_vm4, %v432_v1, %v464_v11 }
  0xf4   :  { %v719_v15 = vpop.f32.mrf.mxu0  ;;  %v743_v16 = vpop.f32.mrf.mxu1  ;;  %v488_v26 = vsel %vm456_vm5, %v440_v2, %v472_v12 }
  0xf5   :  { %v720_v17 = vadd.f32 %v719_v15, %v718_v9  ;;  %v744_v18 = vadd.f32 %v743_v16, %v742_v10  ;;  %vm449_vm6 = vcmp.ge.f32.partialorder %v433_v13, 0.0  ;;  %v465_v19 = vmul.f32 0.2, %v433_v13 }
  0xf6   :  { %vm457_vm7 = vcmp.ge.f32.partialorder %v441_v14, 0.0  ;;  %v473_v20 = vmul.f32 0.2, %v441_v14  ;;  %v721_v21 = vpop.f32.mrf.mxu0  ;;  %v745_v22 = vpop.f32.mrf.mxu1 }
  0xf7   :  { %v434_v23 = vadd.f32 %v720_v17, %v929_v35  ;;  %v442_v24 = vadd.f32 %v744_v18, %v929_v35  ;;  %v481_v27 = vsel %vm449_vm6, %v433_v13, %v465_v19 }
  0xf8   :  { %v489_v28 = vsel %vm457_vm7, %v441_v14, %v473_v20  ;;  %v722_v29 = vpop.f32.mrf.mxu0  ;;  %v746_v30 = vpop.f32.mrf.mxu1  ;;  %v651_v31 = vpack.c.bf16 %v481_v27, %v480_v25 }
  0xf9   :  { %v671_v32 = vpack.c.bf16 %v489_v28, %v488_v26  ;;  %v723_v33 = vadd.f32 %v722_v29, %v721_v21  ;;  %v747_v34 = vadd.f32 %v746_v30, %v745_v22  ;;  %v466_v38 = vmul.f32 0.2, %v434_v23 }
  0xfa   :  { %v724_v36 = vpop.f32.mrf.mxu0  ;;  %v748_v37 = vpop.f32.mrf.mxu1  ;;  %683 = vst [vmem:[%s974_s3 + $0x8] sm:$0xff] %v651_v31   ;;  %v474_v39 = vmul.f32 0.2, %v442_v24  ;;  %vm450_vm8 = vcmp.ge.f32.partialorder %v434_v23, 0.0  ;;  %vm458_vm9 = vcmp.ge.f32.partialorder %v442_v24, 0.0 }
  0xfb   :  { %687 = vst [vmem:[%s974_s3 + $0x28] sm:$0xff] %v671_v32   ;;  %v435_v40 = vadd.f32 %v723_v33, %v929_v35  ;;  %v443_v41 = vadd.f32 %v747_v34, %v929_v35  ;;  %v482_v50 = vsel %vm450_vm8, %v434_v23, %v466_v38 }
  0xfc   :  { %v725_v42 = vpop.f32.mrf.mxu0  ;;  %v749_v43 = vpop.f32.mrf.mxu1  ;;  %v490_v51 = vsel %vm458_vm9, %v442_v24, %v474_v39 }
  0xfd   :  { %v726_v44 = vadd.f32 %v725_v42, %v724_v36  ;;  %v750_v45 = vadd.f32 %v749_v43, %v748_v37  ;;  %vm451_vm10 = vcmp.ge.f32.partialorder %v435_v40, 0.0  ;;  %v467_v46 = vmul.f32 0.2, %v435_v40 }
  0xfe   :  { %vm459_vm11 = vcmp.ge.f32.partialorder %v443_v41, 0.0  ;;  %v475_v47 = vmul.f32 0.2, %v443_v41  ;;  %v727_v48 = vpop.f32.mrf.mxu0  ;;  %v751_v49 = vpop.f32.mrf.mxu1 }
  0xff   :  { %v483_v52 = vsel %vm451_vm10, %v435_v40, %v467_v46  ;;  %v436_v54 = vadd.f32 %v726_v44, %v929_v35  ;;  %v444_v55 = vadd.f32 %v750_v45, %v929_v35 }
 0x100   :  { %v491_v53 = vsel %vm459_vm11, %v443_v41, %v475_v47  ;;  %v728_v56 = vpop.f32.mrf.mxu0  ;;  %v752_v57 = vpop.f32.mrf.mxu1  ;;  %v656_v58 = vpack.c.bf16 %v483_v52, %v482_v50 }
 0x101   :  { %v676_v59 = vpack.c.bf16 %v491_v53, %v490_v51  ;;  %v729_v60 = vadd.f32 %v728_v56, %v727_v48  ;;  %v753_v61 = vadd.f32 %v752_v57, %v751_v49  ;;  %v468_v62 = vmul.f32 0.2, %v436_v54 }
 0x102   :  { %684 = vst [vmem:[%s974_s3 + $0x10] sm:$0xff] %v656_v58   ;;  %v476_v63 = vmul.f32 0.2, %v444_v55  ;;  %vm452_vm12 = vcmp.ge.f32.partialorder %v436_v54, 0.0  ;;  %vm460_vm13 = vcmp.ge.f32.partialorder %v444_v55, 0.0 }
 0x103   :  { %688 = vst [vmem:[%s974_s3 + $0x30] sm:$0xff] %v676_v59   ;;  %v437_v0 = vadd.f32 %v729_v60, %v929_v35  ;;  %v445_v1 = vadd.f32 %v753_v61, %v929_v35  ;;  %v484_v4 = vsel %vm452_vm12, %v436_v54, %v468_v62 }
 0x104   :  { %v492_v5 = vsel %vm460_vm13, %v444_v55, %v476_v63 }
 0x105   :  { %vm453_vm14 = vcmp.ge.f32.partialorder %v437_v0, 0.0  ;;  %v469_v2 = vmul.f32 0.2, %v437_v0  ;;  %vm461_vm15 = vcmp.ge.f32.partialorder %v445_v1, 0.0  ;;  %v477_v3 = vmul.f32 0.2, %v445_v1 }
 0x107   :  { %v485_v6 = vsel %vm453_vm14, %v437_v0, %v469_v2  ;;  %v493_v7 = vsel %vm461_vm15, %v445_v1, %v477_v3 }
 0x108   :  { %v661_v8 = vpack.c.bf16 %v485_v6, %v484_v4  ;;  %v681_v9 = vpack.c.bf16 %v493_v7, %v492_v5 }
 0x10a   :  { %685 = vst [vmem:[%s974_s3 + $0x18] sm:$0xff] %v661_v8   ;;  %689 = vst [vmem:[%s974_s3 + $0x38] sm:$0xff] %v681_v9  }

// kernel: _lambda_.8
= control target key start
LH: loop header
LB: loop body
LE: loop exit
PB: predicated region body
PF: predicated region fallthrough
CT: control target
= control target key end

     0   :  { %s1508_s1 = inlined_call_operand.vmem [shape: bf16[512,128], index: 1, kind: input, shape index: {}]   ;;  %s1509_s0 = inlined_call_operand.vmem [shape: bf16[128,512], index: 0, kind: input, shape index: {}]   ;;  %s1510_s2 = inlined_call_operand.vmem [shape: f32[1,128], index: 2, kind: input, shape index: {}]   ;;  %s1511_s3 = inlined_call_operand.vmem [shape: bf16[128,128], index: 3, kind: output, shape index: {}]  }
   0x1   :  { %v1171_v0 = vld [vmem:[%s1508_s1 + $0x78] sm:$0xff]   ;;  %v1175_v4 = vld [vmem:[%s1508_s1 + $0x70] sm:$0xff]   ;;  %v1179_v8 = vld [vmem:[%s1508_s1 + $0x68] sm:$0xff]  }
   0x2   :  { %v1172_v1 = vld [vmem:[%s1508_s1 + $0xf8] sm:$0xff]   ;;  %1043 = vmatprep.subr.bf16.mxu0 %v1171_v0  ;;  %v1176_v5 = vld [vmem:[%s1508_s1 + $0xf0] sm:$0xff]   ;;  %v1180_v9 = vld [vmem:[%s1508_s1 + $0xe8] sm:$0xff]  }
   0x3   :  { %v1173_v2 = vld [vmem:[%s1508_s1 + $0x38] sm:$0xff]   ;;  %1107 = vmatprep.subr.bf16.mxu1 %v1172_v1  ;;  %v1177_v6 = vld [vmem:[%s1508_s1 + $0x30] sm:$0xff]   ;;  %v1181_v10 = vld [vmem:[%s1508_s1 + $0x28] sm:$0xff]  }
   0x4   :  { %v1174_v3 = vld [vmem:[%s1508_s1 + $0xb8] sm:$0xff]   ;;  %1044 = vmatpush3.bf16.msra.mxu0 %v1173_v2  ;;  %v1178_v7 = vld [vmem:[%s1508_s1 + $0xb0] sm:$0xff]   ;;  %v1182_v11 = vld [vmem:[%s1508_s1 + $0xa8] sm:$0xff]  }
   0x5   :  { %1108 = vmatpush3.bf16.msra.mxu1 %v1174_v3  ;;  %1045 = vmatprep.subr.bf16.mxu0 %v1175_v4  ;;  %v1183_v12 = vld [vmem:[%s1508_s1 + $0x60] sm:$0xff]   ;;  %v1187_v16 = vld [vmem:[%s1508_s1 + $0x58] sm:$0xff]   ;;  %v1191_v20 = vld [vmem:[%s1508_s1 + $0x50] sm:$0xff]  }
   0x6   :  { %1109 = vmatprep.subr.bf16.mxu1 %v1176_v5  ;;  %v1184_v13 = vld [vmem:[%s1508_s1 + $0xe0] sm:$0xff]   ;;  %v1188_v17 = vld [vmem:[%s1508_s1 + $0xd8] sm:$0xff]   ;;  %v1192_v21 = vld [vmem:[%s1508_s1 + $0xd0] sm:$0xff]  }
   0x7   :  { %v1185_v14 = vld [vmem:[%s1508_s1 + $0x20] sm:$0xff]   ;;  %v1189_v18 = vld [vmem:[%s1508_s1 + $0x18] sm:$0xff]   ;;  %v1193_v22 = vld [vmem:[%s1508_s1 + $0x10] sm:$0xff]  }
   0x8   :  { %1046 = vmatpush3.bf16.msra.mxu0 %v1177_v6  ;;  %v1186_v15 = vld [vmem:[%s1508_s1 + $0xa0] sm:$0xff]   ;;  %v1190_v19 = vld [vmem:[%s1508_s1 + $0x98] sm:$0xff]   ;;  %v1194_v23 = vld [vmem:[%s1508_s1 + $0x90] sm:$0xff]  }
   0x9   :  { %1110 = vmatpush3.bf16.msra.mxu1 %v1178_v7  ;;  %1047 = vmatprep.subr.bf16.mxu0 %v1179_v8  ;;  %v1195_v24 = vld [vmem:[%s1508_s1 + $0x48] sm:$0xff]   ;;  %v1199_v28 = vld [vmem:[%s1508_s1 + $0x40] sm:$0xff]  }
   0xa   :  { %1111 = vmatprep.subr.bf16.mxu1 %v1180_v9  ;;  %v1196_v25 = vld [vmem:[%s1508_s1 + $0xc8] sm:$0xff]   ;;  %v1200_v29 = vld [vmem:[%s1508_s1 + $0xc0] sm:$0xff]  }
   0xb   :  { %v1197_v26 = vld [vmem:[%s1508_s1 + $0x8] sm:$0xff]   ;;  %v1201_v30 = vld [vmem:[%s1508_s1] sm:$0xff]  }
   0xc   :  { %1048 = vmatpush3.bf16.msra.mxu0 %v1181_v10  ;;  %v1198_v27 = vld [vmem:[%s1508_s1 + $0x88] sm:$0xff]   ;;  %v1202_v31 = vld [vmem:[%s1508_s1 + $0x80] sm:$0xff]  }
   0xd   :  { %1112 = vmatpush3.bf16.msra.mxu1 %v1182_v11  ;;  %1049 = vmatprep.subr.bf16.mxu0 %v1183_v12  ;;  %v1203_v32 = vld [vmem:[%s1509_s0] ss:$16 sps:$4 sm:$0xff]   ;;  %v1205_v33 = vld [vmem:[%s1509_s0 + $0x4] ss:$16 sps:$4 sm:$0xff]   ;;  %v1206_v34 = vld [vmem:[%s1509_s0 + $0x8] ss:$16 sps:$4 sm:$0xff]  }
   0xe   :  { %1113 = vmatprep.subr.bf16.mxu1 %v1184_v13  ;;  %v1208_v35 = vld [vmem:[%s1509_s0 + $0xc] ss:$16 sps:$4 sm:$0xff]   ;;  %531 = vmatprep.mubr.bf16.mxu0 %v1205_v33  ;;  %v1209_v36 = vld [vmem:[%s1509_s0 + $0x24] ss:$16 sps:$4 sm:$0xff]   ;;  %v1213_v38 = vld [vmem:[%s1509_s0 + $0x20] ss:$16 sps:$4 sm:$0xff]  }
   0xf   :  { %628 = vmatprep.mubr.bf16.mxu1 %v1208_v35  ;;  %v1211_v37 = vld [vmem:[%s1509_s0 + $0x2c] ss:$16 sps:$4 sm:$0xff]   ;;  %v1214_v39 = vld [vmem:[%s1509_s0 + $0x28] ss:$16 sps:$4 sm:$0xff]   ;;  %v1215_v40 = vld [vmem:[%s1509_s0 + $0x44] ss:$16 sps:$4 sm:$0xff]  }
  0x10   :  { %1050 = vmatpush3.bf16.msra.mxu0 %v1185_v14  ;;  %v1217_v41 = vld [vmem:[%s1509_s0 + $0x4c] ss:$16 sps:$4 sm:$0xff]   ;;  %v1219_v42 = vld [vmem:[%s1509_s0 + $0x40] ss:$16 sps:$4 sm:$0xff]   ;;  %v1220_v43 = vld [vmem:[%s1509_s0 + $0x48] ss:$16 sps:$4 sm:$0xff]  }
  0x11   :  { %1114 = vmatpush3.bf16.msra.mxu1 %v1186_v15  ;;  %1051 = vmatprep.subr.bf16.mxu0 %v1187_v16  ;;  %v1221_v44 = vld [vmem:[%s1509_s0 + $0x64] ss:$16 sps:$4 sm:$0xff]   ;;  %v1223_v45 = vld [vmem:[%s1509_s0 + $0x6c] ss:$16 sps:$4 sm:$0xff]   ;;  %v1225_v46 = vld [vmem:[%s1509_s0 + $0x60] ss:$16 sps:$4 sm:$0xff]  }
  0x12   :  { %1115 = vmatprep.subr.bf16.mxu1 %v1188_v17  ;;  %v1226_v47 = vld [vmem:[%s1509_s0 + $0x68] ss:$16 sps:$4 sm:$0xff]   ;;  %v1227_v48 = vld [vmem:[%s1509_s0 + $0x84] ss:$16 sps:$4 sm:$0xff]   ;;  %v1229_v49 = vld [vmem:[%s1509_s0 + $0x8c] ss:$16 sps:$4 sm:$0xff]  }
  0x13   :  { %v1231_v50 = vld [vmem:[%s1509_s0 + $0x80] ss:$16 sps:$4 sm:$0xff]   ;;  %v1232_v51 = vld [vmem:[%s1509_s0 + $0x88] ss:$16 sps:$4 sm:$0xff]   ;;  %v1233_v52 = vld [vmem:[%s1509_s0 + $0xa4] ss:$16 sps:$4 sm:$0xff]  }
  0x14   :  { %1052 = vmatpush3.bf16.msra.mxu0 %v1189_v18  ;;  %v1235_v53 = vld [vmem:[%s1509_s0 + $0xac] ss:$16 sps:$4 sm:$0xff]   ;;  %v1237_v54 = vld [vmem:[%s1509_s0 + $0xa0] ss:$16 sps:$4 sm:$0xff]   ;;  %v1238_v55 = vld [vmem:[%s1509_s0 + $0xa8] ss:$16 sps:$4 sm:$0xff]  }
  0x15   :  { %1116 = vmatpush3.bf16.msra.mxu1 %v1190_v19  ;;  %1053 = vmatprep.subr.bf16.mxu0 %v1191_v20  ;;  %v1239_v56 = vld [vmem:[%s1509_s0 + $0xc4] ss:$16 sps:$4 sm:$0xff]   ;;  %v1241_v57 = vld [vmem:[%s1509_s0 + $0xcc] ss:$16 sps:$4 sm:$0xff]   ;;  %v1243_v58 = vld [vmem:[%s1509_s0 + $0xc0] ss:$16 sps:$4 sm:$0xff]  }
  0x16   :  { %1117 = vmatprep.subr.bf16.mxu1 %v1192_v21  ;;  %v1244_v59 = vld [vmem:[%s1509_s0 + $0xc8] ss:$16 sps:$4 sm:$0xff]   ;;  %v1245_v60 = vld [vmem:[%s1509_s0 + $0xe4] ss:$16 sps:$4 sm:$0xff]   ;;  %v1247_v61 = vld [vmem:[%s1509_s0 + $0xec] ss:$16 sps:$4 sm:$0xff]  }
  0x17   :  { %v1249_v62 = vld [vmem:[%s1509_s0 + $0xe0] ss:$16 sps:$4 sm:$0xff]   ;;  %v1250_v63 = vld [vmem:[%s1509_s0 + $0xe8] ss:$16 sps:$4 sm:$0xff]  }
  0x18   :  { %1054 = vmatpush3.bf16.msra.mxu0 %v1193_v22  ;;  %v1466_v7 = vld [vmem:[%s1510_s2] ss:$0 sm:$0xff] }
  0x19   :  { %1118 = vmatpush3.bf16.msra.mxu1 %v1194_v23  ;;  %1055 = vmatprep.subr.bf16.mxu0 %v1195_v24 }
  0x1a   :  { %1119 = vmatprep.subr.bf16.mxu1 %v1196_v25 }
  0x1c   :  { %1056 = vmatpush3.bf16.msra.mxu0 %v1197_v26 }
  0x1d   :  { %1120 = vmatpush3.bf16.msra.mxu1 %v1198_v27  ;;  %1057 = vmatprep.subr.bf16.mxu0 %v1199_v28 }
  0x1e   :  { %1121 = vmatprep.subr.bf16.mxu1 %v1200_v29 }
  0x20   :  { %1058 = vmatpush3.bf16.msra.mxu0 %v1201_v30 }
  0x21   :  { %1122 = vmatpush3.bf16.msra.mxu1 %v1202_v31 }
  0x23   :  { %532 = vmatmul.mubr.bf16.vlgmr.msra.gmra.mxu0 %v1203_v32 }
  0x24   :  { %629 = vmatmul.mubr.bf16.vlgmr.msra.gmra.mxu1 %v1206_v34  ;;  %539 = vmatprep.mubr.bf16.mxu0 %v1209_v36 }
  0x25   :  { %636 = vmatprep.mubr.bf16.mxu1 %v1211_v37 }
  0x2b   :  { %540 = vmatmul.mubr.bf16.gmra.mxu0 %v1213_v38 }
  0x2c   :  { %637 = vmatmul.mubr.bf16.gmra.mxu1 %v1214_v39  ;;  %547 = vmatprep.mubr.bf16.mxu0 %v1215_v40 }
  0x2d   :  { %644 = vmatprep.mubr.bf16.mxu1 %v1217_v41 }
  0x33   :  { %548 = vmatmul.mubr.bf16.gmra.mxu0 %v1219_v42 }
  0x34   :  { %645 = vmatmul.mubr.bf16.gmra.mxu1 %v1220_v43  ;;  %555 = vmatprep.mubr.bf16.mxu0 %v1221_v44 }
  0x35   :  { %652 = vmatprep.mubr.bf16.mxu1 %v1223_v45 }
  0x3b   :  { %556 = vmatmul.mubr.bf16.gmra.mxu0 %v1225_v46 }
  0x3c   :  { %653 = vmatmul.mubr.bf16.gmra.mxu1 %v1226_v47  ;;  %563 = vmatprep.mubr.bf16.mxu0 %v1227_v48 }
  0x3d   :  { %660 = vmatprep.mubr.bf16.mxu1 %v1229_v49 }
  0x43   :  { %564 = vmatmul.mubr.bf16.gmra.mxu0 %v1231_v50 }
  0x44   :  { %661 = vmatmul.mubr.bf16.gmra.mxu1 %v1232_v51  ;;  %571 = vmatprep.mubr.bf16.mxu0 %v1233_v52 }
  0x45   :  { %668 = vmatprep.mubr.bf16.mxu1 %v1235_v53 }
  0x4b   :  { %572 = vmatmul.mubr.bf16.gmra.mxu0 %v1237_v54 }
  0x4c   :  { %669 = vmatmul.mubr.bf16.gmra.mxu1 %v1238_v55  ;;  %579 = vmatprep.mubr.bf16.mxu0 %v1239_v56 }
  0x4d   :  { %676 = vmatprep.mubr.bf16.mxu1 %v1241_v57 }
  0x53   :  { %580 = vmatmul.mubr.bf16.gmra.mxu0 %v1243_v58 }
  0x54   :  { %677 = vmatmul.mubr.bf16.gmra.mxu1 %v1244_v59  ;;  %587 = vmatprep.mubr.bf16.mxu0 %v1245_v60 }
  0x55   :  { %684 = vmatprep.mubr.bf16.mxu1 %v1247_v61 }
  0x5b   :  { %588 = vmatmul.mubr.bf16.gmra.mxu0 %v1249_v62 }
  0x5c   :  { %685 = vmatmul.mubr.bf16.gmra.mxu1 %v1250_v63 }
  0xe3   :  { %v1059_v0 = vpop.f32.mrf.mxu0 }
  0xe4   :  { %v1123_v1 = vpop.f32.mrf.mxu1 }
  0xe5   :  { %v1060_v2 = vpop.f32.mrf.mxu0 }
  0xe6   :  { %v1061_v3 = vadd.f32 %v1060_v2, %v1059_v0  ;;  %v1124_v4 = vpop.f32.mrf.mxu1 }
  0xe7   :  { %v1125_v5 = vadd.f32 %v1124_v4, %v1123_v1  ;;  %v1062_v6 = vpop.f32.mrf.mxu0 }
  0xe8   :  { %v1126_v8 = vpop.f32.mrf.mxu1 }
  0xe9   :  { %v631_v9 = vadd.f32 %v1125_v5, %v1061_v3  ;;  %v1063_v10 = vpop.f32.mrf.mxu0 }
  0xea   :  { %v1064_v11 = vadd.f32 %v1063_v10, %v1062_v6  ;;  %v1127_v12 = vpop.f32.mrf.mxu1 }
  0xeb   :  { %v751_v13 = vadd.f32 %v1466_v7, %v631_v9  ;;  %v1128_v14 = vadd.f32 %v1127_v12, %v1126_v8  ;;  %v1065_v15 = vpop.f32.mrf.mxu0 }
  0xec   :  { %v1129_v16 = vpop.f32.mrf.mxu1 }
  0xed   :  { %v634_v17 = vadd.f32 %v1128_v14, %v1064_v11  ;;  %v1066_v18 = vpop.f32.mrf.mxu0  ;;  %v783_v21 = vmul.f32 0.2, %v751_v13  ;;  %vm767_vm0 = vcmp.ge.f32.partialorder %v751_v13, 0.0 }
  0xee   :  { %v1067_v19 = vadd.f32 %v1066_v18, %v1065_v15  ;;  %v1130_v20 = vpop.f32.mrf.mxu1 }
  0xef   :  { %v752_v22 = vadd.f32 %v1466_v7, %v634_v17  ;;  %v1131_v23 = vadd.f32 %v1130_v20, %v1129_v16  ;;  %v1068_v24 = vpop.f32.mrf.mxu0  ;;  %v799_v31 = vsel %vm767_vm0, %v751_v13, %v783_v21 }
  0xf0   :  { %v1132_v25 = vpop.f32.mrf.mxu1 }
  0xf1   :  { %vm768_vm1 = vcmp.ge.f32.partialorder %v752_v22, 0.0  ;;  %v784_v26 = vmul.f32 0.2, %v752_v22  ;;  %v639_v27 = vadd.f32 %v1131_v23, %v1067_v19  ;;  %v1069_v28 = vpop.f32.mrf.mxu0 }
  0xf2   :  { %v1070_v29 = vadd.f32 %v1069_v28, %v1068_v24  ;;  %v1133_v30 = vpop.f32.mrf.mxu1 }
  0xf3   :  { %v800_v32 = vsel %vm768_vm1, %v752_v22, %v784_v26  ;;  %v753_v33 = vadd.f32 %v1466_v7, %v639_v27  ;;  %v1134_v34 = vadd.f32 %v1133_v30, %v1132_v25  ;;  %v1071_v35 = vpop.f32.mrf.mxu0 }
  0xf4   :  { %v999_v36 = vpack.c.bf16 %v800_v32, %v799_v31  ;;  %v1135_v37 = vpop.f32.mrf.mxu1 }
  0xf5   :  { %v642_v38 = vadd.f32 %v1134_v34, %v1070_v29  ;;  %v1072_v39 = vpop.f32.mrf.mxu0  ;;  %v785_v42 = vmul.f32 0.2, %v753_v33  ;;  %vm769_vm2 = vcmp.ge.f32.partialorder %v753_v33, 0.0 }
  0xf6   :  { %1000 = vst [vmem:[%s1511_s3] sm:$0xff] %v999_v36   ;;  %v1073_v40 = vadd.f32 %v1072_v39, %v1071_v35  ;;  %v1136_v41 = vpop.f32.mrf.mxu1 }
  0xf7   :  { %v754_v43 = vadd.f32 %v1466_v7, %v642_v38  ;;  %v1137_v44 = vadd.f32 %v1136_v41, %v1135_v37  ;;  %v1074_v45 = vpop.f32.mrf.mxu0  ;;  %v801_v52 = vsel %vm769_vm2, %v753_v33, %v785_v42 }
  0xf8   :  { %v1138_v46 = vpop.f32.mrf.mxu1 }
  0xf9   :  { %vm770_vm3 = vcmp.ge.f32.partialorder %v754_v43, 0.0  ;;  %v786_v47 = vmul.f32 0.2, %v754_v43  ;;  %v647_v48 = vadd.f32 %v1137_v44, %v1073_v40  ;;  %v1075_v49 = vpop.f32.mrf.mxu0 }
  0xfa   :  { %v1076_v50 = vadd.f32 %v1075_v49, %v1074_v45  ;;  %v1139_v51 = vpop.f32.mrf.mxu1 }
  0xfb   :  { %v802_v53 = vsel %vm770_vm3, %v754_v43, %v786_v47  ;;  %v755_v54 = vadd.f32 %v1466_v7, %v647_v48  ;;  %v1140_v55 = vadd.f32 %v1139_v51, %v1138_v46  ;;  %v1077_v56 = vpop.f32.mrf.mxu0 }
  0xfc   :  { %v1004_v57 = vpack.c.bf16 %v802_v53, %v801_v52  ;;  %v1141_v58 = vpop.f32.mrf.mxu1 }
  0xfd   :  { %v650_v59 = vadd.f32 %v1140_v55, %v1076_v50  ;;  %v1078_v60 = vpop.f32.mrf.mxu0  ;;  %v787_v63 = vmul.f32 0.2, %v755_v54  ;;  %vm771_vm4 = vcmp.ge.f32.partialorder %v755_v54, 0.0 }
  0xfe   :  { %1036 = vst [vmem:[%s1511_s3 + $0x8] sm:$0xff] %v1004_v57   ;;  %v1079_v61 = vadd.f32 %v1078_v60, %v1077_v56  ;;  %v1142_v62 = vpop.f32.mrf.mxu1 }
  0xff   :  { %v756_v0 = vadd.f32 %v1466_v7, %v650_v59  ;;  %v1143_v1 = vadd.f32 %v1142_v62, %v1141_v58  ;;  %v1080_v2 = vpop.f32.mrf.mxu0  ;;  %v803_v10 = vsel %vm771_vm4, %v755_v54, %v787_v63 }
 0x100   :  { %v1144_v3 = vpop.f32.mrf.mxu1 }
 0x101   :  { %vm772_vm5 = vcmp.ge.f32.partialorder %v756_v0, 0.0  ;;  %v788_v4 = vmul.f32 0.2, %v756_v0  ;;  %v655_v5 = vadd.f32 %v1143_v1, %v1079_v61  ;;  %v1081_v6 = vpop.f32.mrf.mxu0 }
 0x102   :  { %v1082_v8 = vadd.f32 %v1081_v6, %v1080_v2  ;;  %v1145_v9 = vpop.f32.mrf.mxu1 }
 0x103   :  { %v804_v11 = vsel %vm772_vm5, %v756_v0, %v788_v4  ;;  %v757_v12 = vadd.f32 %v1466_v7, %v655_v5  ;;  %v1146_v13 = vadd.f32 %v1145_v9, %v1144_v3  ;;  %v1083_v14 = vpop.f32.mrf.mxu0 }
 0x104   :  { %v1009_v15 = vpack.c.bf16 %v804_v11, %v803_v10  ;;  %v1147_v16 = vpop.f32.mrf.mxu1 }
 0x105   :  { %v658_v17 = vadd.f32 %v1146_v13, %v1082_v8  ;;  %v1084_v18 = vpop.f32.mrf.mxu0  ;;  %v789_v21 = vmul.f32 0.2, %v757_v12  ;;  %vm773_vm6 = vcmp.ge.f32.partialorder %v757_v12, 0.0 }
 0x106   :  { %1037 = vst [vmem:[%s1511_s3 + $0x10] sm:$0xff] %v1009_v15   ;;  %v1085_v19 = vadd.f32 %v1084_v18, %v1083_v14  ;;  %v1148_v20 = vpop.f32.mrf.mxu1 }
 0x107   :  { %v758_v22 = vadd.f32 %v1466_v7, %v658_v17  ;;  %v1149_v23 = vadd.f32 %v1148_v20, %v1147_v16  ;;  %v1086_v24 = vpop.f32.mrf.mxu0  ;;  %v805_v31 = vsel %vm773_vm6, %v757_v12, %v789_v21 }
 0x108   :  { %v1150_v25 = vpop.f32.mrf.mxu1 }
 0x109   :  { %vm774_vm7 = vcmp.ge.f32.partialorder %v758_v22, 0.0  ;;  %v790_v26 = vmul.f32 0.2, %v758_v22  ;;  %v663_v27 = vadd.f32 %v1149_v23, %v1085_v19  ;;  %v1087_v28 = vpop.f32.mrf.mxu0 }
 0x10a   :  { %v1088_v29 = vadd.f32 %v1087_v28, %v1086_v24  ;;  %v1151_v30 = vpop.f32.mrf.mxu1 }
 0x10b   :  { %v806_v32 = vsel %vm774_vm7, %v758_v22, %v790_v26  ;;  %v759_v33 = vadd.f32 %v1466_v7, %v663_v27  ;;  %v1152_v34 = vadd.f32 %v1151_v30, %v1150_v25  ;;  %v1089_v35 = vpop.f32.mrf.mxu0 }
 0x10c   :  { %v1014_v36 = vpack.c.bf16 %v806_v32, %v805_v31  ;;  %v1153_v37 = vpop.f32.mrf.mxu1 }
 0x10d   :  { %v666_v38 = vadd.f32 %v1152_v34, %v1088_v29  ;;  %v1090_v39 = vpop.f32.mrf.mxu0  ;;  %v791_v42 = vmul.f32 0.2, %v759_v33  ;;  %vm775_vm8 = vcmp.ge.f32.partialorder %v759_v33, 0.0 }
 0x10e   :  { %1038 = vst [vmem:[%s1511_s3 + $0x18] sm:$0xff] %v1014_v36   ;;  %v1091_v40 = vadd.f32 %v1090_v39, %v1089_v35  ;;  %v1154_v41 = vpop.f32.mrf.mxu1 }
 0x10f   :  { %v760_v43 = vadd.f32 %v1466_v7, %v666_v38  ;;  %v1155_v44 = vadd.f32 %v1154_v41, %v1153_v37  ;;  %v1092_v45 = vpop.f32.mrf.mxu0  ;;  %v807_v52 = vsel %vm775_vm8, %v759_v33, %v791_v42 }
 0x110   :  { %v1156_v46 = vpop.f32.mrf.mxu1 }
 0x111   :  { %vm776_vm9 = vcmp.ge.f32.partialorder %v760_v43, 0.0  ;;  %v792_v47 = vmul.f32 0.2, %v760_v43  ;;  %v671_v48 = vadd.f32 %v1155_v44, %v1091_v40  ;;  %v1093_v49 = vpop.f32.mrf.mxu0 }
 0x112   :  { %v1094_v50 = vadd.f32 %v1093_v49, %v1092_v45  ;;  %v1157_v51 = vpop.f32.mrf.mxu1 }
 0x113   :  { %v808_v53 = vsel %vm776_vm9, %v760_v43, %v792_v47  ;;  %v761_v54 = vadd.f32 %v1466_v7, %v671_v48  ;;  %v1158_v55 = vadd.f32 %v1157_v51, %v1156_v46  ;;  %v1095_v56 = vpop.f32.mrf.mxu0 }
 0x114   :  { %v1019_v57 = vpack.c.bf16 %v808_v53, %v807_v52  ;;  %v1159_v58 = vpop.f32.mrf.mxu1 }
 0x115   :  { %v674_v59 = vadd.f32 %v1158_v55, %v1094_v50  ;;  %v1096_v60 = vpop.f32.mrf.mxu0  ;;  %v793_v63 = vmul.f32 0.2, %v761_v54  ;;  %vm777_vm10 = vcmp.ge.f32.partialorder %v761_v54, 0.0 }
 0x116   :  { %1039 = vst [vmem:[%s1511_s3 + $0x20] sm:$0xff] %v1019_v57   ;;  %v1097_v61 = vadd.f32 %v1096_v60, %v1095_v56  ;;  %v1160_v62 = vpop.f32.mrf.mxu1 }
 0x117   :  { %v762_v0 = vadd.f32 %v1466_v7, %v674_v59  ;;  %v1161_v1 = vadd.f32 %v1160_v62, %v1159_v58  ;;  %v1098_v2 = vpop.f32.mrf.mxu0  ;;  %v809_v10 = vsel %vm777_vm10, %v761_v54, %v793_v63 }
 0x118   :  { %v1162_v3 = vpop.f32.mrf.mxu1 }
 0x119   :  { %vm778_vm11 = vcmp.ge.f32.partialorder %v762_v0, 0.0  ;;  %v794_v4 = vmul.f32 0.2, %v762_v0  ;;  %v679_v5 = vadd.f32 %v1161_v1, %v1097_v61  ;;  %v1099_v6 = vpop.f32.mrf.mxu0 }
 0x11a   :  { %v1100_v8 = vadd.f32 %v1099_v6, %v1098_v2  ;;  %v1163_v9 = vpop.f32.mrf.mxu1 }
 0x11b   :  { %v810_v11 = vsel %vm778_vm11, %v762_v0, %v794_v4  ;;  %v763_v12 = vadd.f32 %v1466_v7, %v679_v5  ;;  %v1164_v13 = vadd.f32 %v1163_v9, %v1162_v3  ;;  %v1101_v14 = vpop.f32.mrf.mxu0 }
 0x11c   :  { %v1024_v15 = vpack.c.bf16 %v810_v11, %v809_v10  ;;  %v1165_v16 = vpop.f32.mrf.mxu1 }
 0x11d   :  { %v682_v17 = vadd.f32 %v1164_v13, %v1100_v8  ;;  %v1102_v18 = vpop.f32.mrf.mxu0  ;;  %v795_v21 = vmul.f32 0.2, %v763_v12  ;;  %vm779_vm12 = vcmp.ge.f32.partialorder %v763_v12, 0.0 }
 0x11e   :  { %1040 = vst [vmem:[%s1511_s3 + $0x28] sm:$0xff] %v1024_v15   ;;  %v1103_v19 = vadd.f32 %v1102_v18, %v1101_v14  ;;  %v1166_v20 = vpop.f32.mrf.mxu1 }
 0x11f   :  { %v764_v22 = vadd.f32 %v1466_v7, %v682_v17  ;;  %v1167_v23 = vadd.f32 %v1166_v20, %v1165_v16  ;;  %v1104_v24 = vpop.f32.mrf.mxu0  ;;  %v811_v31 = vsel %vm779_vm12, %v763_v12, %v795_v21 }
 0x120   :  { %v1168_v25 = vpop.f32.mrf.mxu1 }
 0x121   :  { %vm780_vm13 = vcmp.ge.f32.partialorder %v764_v22, 0.0  ;;  %v796_v26 = vmul.f32 0.2, %v764_v22  ;;  %v687_v27 = vadd.f32 %v1167_v23, %v1103_v19  ;;  %v1105_v28 = vpop.f32.mrf.mxu0 }
 0x122   :  { %v1106_v29 = vadd.f32 %v1105_v28, %v1104_v24  ;;  %v1169_v30 = vpop.f32.mrf.mxu1 }
 0x123   :  { %v812_v32 = vsel %vm780_vm13, %v764_v22, %v796_v26  ;;  %v765_v33 = vadd.f32 %v1466_v7, %v687_v27  ;;  %v1170_v34 = vadd.f32 %v1169_v30, %v1168_v25 }
 0x124   :  { %v1029_v35 = vpack.c.bf16 %v812_v32, %v811_v31 }
 0x125   :  { %v690_v36 = vadd.f32 %v1170_v34, %v1106_v29  ;;  %v797_v37 = vmul.f32 0.2, %v765_v33  ;;  %vm781_vm14 = vcmp.ge.f32.partialorder %v765_v33, 0.0 }
 0x126   :  { %1041 = vst [vmem:[%s1511_s3 + $0x30] sm:$0xff] %v1029_v35  }
 0x127   :  { %v766_v38 = vadd.f32 %v1466_v7, %v690_v36  ;;  %v813_v40 = vsel %vm781_vm14, %v765_v33, %v797_v37 }
 0x129   :  { %vm782_vm15 = vcmp.ge.f32.partialorder %v766_v38, 0.0  ;;  %v798_v39 = vmul.f32 0.2, %v766_v38 }
 0x12b   :  { %v814_v41 = vsel %vm782_vm15, %v766_v38, %v798_v39 }
 0x12c   :  { %v1034_v42 = vpack.c.bf16 %v814_v41, %v813_v40 }
 0x12e   :  { %1042 = vst [vmem:[%s1511_s3 + $0x38] sm:$0xff] %v1034_v42  }

// kernel: _lambda_.9
= control target key start
LH: loop header
LB: loop body
LE: loop exit
PB: predicated region body
PF: predicated region fallthrough
CT: control target
= control target key end

     0   :  { %s2537_s1 = inlined_call_operand.vmem [shape: bf16[1024,128], index: 1, kind: input, shape index: {}]   ;;  %s2538_s0 = inlined_call_operand.vmem [shape: bf16[128,1024], index: 0, kind: input, shape index: {}]   ;;  %s2539_s2 = inlined_call_operand.vmem [shape: f32[1,128], index: 2, kind: input, shape index: {}]   ;;  %s2540_s3 = inlined_call_operand.vmem [shape: f32[128,128], index: 3, kind: output, shape index: {}]  }
   0x1   :  { %v1814_v0 = vld [vmem:[%s2537_s1 + $0x78] sm:$0xff]   ;;  %v1818_v4 = vld [vmem:[%s2537_s1 + $0x70] sm:$0xff]   ;;  %v1822_v8 = vld [vmem:[%s2537_s1 + $0x68] sm:$0xff]  }
   0x2   :  { %v1815_v1 = vld [vmem:[%s2537_s1 + $0xf8] sm:$0xff]   ;;  %1558 = vmatprep.subr.bf16.mxu0 %v1814_v0  ;;  %v1819_v5 = vld [vmem:[%s2537_s1 + $0xf0] sm:$0xff]   ;;  %v1823_v9 = vld [vmem:[%s2537_s1 + $0xe8] sm:$0xff]  }
   0x3   :  { %v1816_v2 = vld [vmem:[%s2537_s1 + $0x38] sm:$0xff]   ;;  %1622 = vmatprep.subr.bf16.mxu1 %v1815_v1  ;;  %v1820_v6 = vld [vmem:[%s2537_s1 + $0x30] sm:$0xff]   ;;  %v1824_v10 = vld [vmem:[%s2537_s1 + $0x28] sm:$0xff]  }
   0x4   :  { %v1817_v3 = vld [vmem:[%s2537_s1 + $0xb8] sm:$0xff]   ;;  %1559 = vmatpush3.bf16.msra.mxu0 %v1816_v2  ;;  %v1821_v7 = vld [vmem:[%s2537_s1 + $0xb0] sm:$0xff]   ;;  %v1825_v11 = vld [vmem:[%s2537_s1 + $0xa8] sm:$0xff]  }
   0x5   :  { %1623 = vmatpush3.bf16.msra.mxu1 %v1817_v3  ;;  %1560 = vmatprep.subr.bf16.mxu0 %v1818_v4  ;;  %v1826_v12 = vld [vmem:[%s2537_s1 + $0x60] sm:$0xff]   ;;  %v1830_v16 = vld [vmem:[%s2537_s1 + $0x58] sm:$0xff]   ;;  %v1834_v20 = vld [vmem:[%s2537_s1 + $0x50] sm:$0xff]  }
   0x6   :  { %1624 = vmatprep.subr.bf16.mxu1 %v1819_v5  ;;  %v1827_v13 = vld [vmem:[%s2537_s1 + $0xe0] sm:$0xff]   ;;  %v1831_v17 = vld [vmem:[%s2537_s1 + $0xd8] sm:$0xff]   ;;  %v1835_v21 = vld [vmem:[%s2537_s1 + $0xd0] sm:$0xff]  }
   0x7   :  { %v1828_v14 = vld [vmem:[%s2537_s1 + $0x20] sm:$0xff]   ;;  %v1832_v18 = vld [vmem:[%s2537_s1 + $0x18] sm:$0xff]   ;;  %v1836_v22 = vld [vmem:[%s2537_s1 + $0x10] sm:$0xff]  }
   0x8   :  { %1561 = vmatpush3.bf16.msra.mxu0 %v1820_v6  ;;  %v1829_v15 = vld [vmem:[%s2537_s1 + $0xa0] sm:$0xff]   ;;  %v1833_v19 = vld [vmem:[%s2537_s1 + $0x98] sm:$0xff]   ;;  %v1837_v23 = vld [vmem:[%s2537_s1 + $0x90] sm:$0xff]  }
   0x9   :  { %1625 = vmatpush3.bf16.msra.mxu1 %v1821_v7  ;;  %1562 = vmatprep.subr.bf16.mxu0 %v1822_v8  ;;  %v1838_v24 = vld [vmem:[%s2537_s1 + $0x48] sm:$0xff]   ;;  %v1842_v28 = vld [vmem:[%s2537_s1 + $0x40] sm:$0xff]   ;;  %v1846_v40 = vld [vmem:[%s2537_s1 + $0x178] sm:$0xff]  }
   0xa   :  { %1626 = vmatprep.subr.bf16.mxu1 %v1823_v9  ;;  %v1839_v25 = vld [vmem:[%s2537_s1 + $0xc8] sm:$0xff]   ;;  %v1843_v29 = vld [vmem:[%s2537_s1 + $0xc0] sm:$0xff]   ;;  %v1847_v41 = vld [vmem:[%s2537_s1 + $0x138] sm:$0xff]  }
   0xb   :  { %v1840_v26 = vld [vmem:[%s2537_s1 + $0x8] sm:$0xff]   ;;  %v1844_v30 = vld [vmem:[%s2537_s1] sm:$0xff]   ;;  %v1848_v42 = vld [vmem:[%s2537_s1 + $0x1f8] sm:$0xff]  }
   0xc   :  { %1563 = vmatpush3.bf16.msra.mxu0 %v1824_v10  ;;  %v1841_v27 = vld [vmem:[%s2537_s1 + $0x88] sm:$0xff]   ;;  %v1845_v31 = vld [vmem:[%s2537_s1 + $0x80] sm:$0xff]   ;;  %v1849_v43 = vld [vmem:[%s2537_s1 + $0x1b8] sm:$0xff]  }
   0xd   :  { %1627 = vmatpush3.bf16.msra.mxu1 %v1825_v11  ;;  %1564 = vmatprep.subr.bf16.mxu0 %v1826_v12  ;;  %v51_v32 = vld [vmem:[%s2538_s0] sm:$0xff]  ;;  %v52_v34 = vld [vmem:[%s2538_s0 + $0x8] sm:$0xff]  ;;  %v1850_v50 = vld [vmem:[%s2537_s1 + $0x170] sm:$0xff]  }
   0xe   :  { %1628 = vmatprep.subr.bf16.mxu1 %v1827_v13  ;;  %v55_v33 = vld [vmem:[%s2538_s0 + $0x20] sm:$0xff]  ;;  %v56_v37 = vld [vmem:[%s2538_s0 + $0x28] sm:$0xff]  ;;  %v1851_v52 = vld [vmem:[%s2537_s1 + $0x130] sm:$0xff]  }
   0xf   :  { %v1429_v35 = vcombine.low %v51_v32, %v55_v33  ;;  %v1430_v36 = vcombine.high %v51_v32, %v55_v33  ;;  %v1431_v38 = vcombine.low %v52_v34, %v56_v37  ;;  %v1432_v39 = vcombine.high %v52_v34, %v56_v37  ;;  %v59_v44 = vld [vmem:[%s2538_s0 + $0x40] sm:$0xff]  ;;  %v60_v47 = vld [vmem:[%s2538_s0 + $0x48] sm:$0xff]  ;;  %v1852_v54 = vld [vmem:[%s2537_s1 + $0x1f0] sm:$0xff]  }
  0x10   :  { %1565 = vmatpush3.bf16.msra.mxu0 %v1828_v14  ;;  %v63_v45 = vld [vmem:[%s2538_s0 + $0x60] sm:$0xff]  ;;  %v64_v48 = vld [vmem:[%s2538_s0 + $0x68] sm:$0xff]  ;;  %v1853_v55 = vld [vmem:[%s2537_s1 + $0x1b0] sm:$0xff]  }
  0x11   :  { %1629 = vmatpush3.bf16.msra.mxu1 %v1829_v15  ;;  %1566 = vmatprep.subr.bf16.mxu0 %v1830_v16  ;;  %v1438_v46 = vcombine.high %v59_v44, %v63_v45  ;;  %v1440_v49 = vcombine.high %v60_v47, %v64_v48  ;;  %v1437_v51 = vcombine.low %v59_v44, %v63_v45  ;;  %v67_v56 = vld [vmem:[%s2538_s0 + $0x80] sm:$0xff]  ;;  %v68_v58 = vld [vmem:[%s2538_s0 + $0x88] sm:$0xff]  ;;  %v1868_v32 = vld [vmem:[%s2537_s1 + $0x1d0] sm:$0xff]  }
  0x12   :  { %1630 = vmatprep.subr.bf16.mxu1 %v1831_v17  ;;  %979 = vmatprep.mubr.bf16.mxu0 %v1430_v36  ;;  %v1439_v53 = vcombine.low %v60_v47, %v64_v48  ;;  %v71_v57 = vld [vmem:[%s2538_s0 + $0xa0] sm:$0xff]  ;;  %v72_v59 = vld [vmem:[%s2538_s0 + $0xa8] sm:$0xff]  ;;  %v1869_v33 = vld [vmem:[%s2537_s1 + $0x190] sm:$0xff]  }
  0x13   :  { %1076 = vmatprep.mubr.bf16.mxu1 %v1432_v39  ;;  %v1446_v60 = vcombine.high %v67_v56, %v71_v57  ;;  %v1448_v61 = vcombine.high %v68_v58, %v72_v59  ;;  %v1854_v62 = vld [vmem:[%s2537_s1 + $0x168] sm:$0xff]   ;;  %v1445_v2 = vcombine.low %v67_v56, %v71_v57  ;;  %v75_v3 = vld [vmem:[%s2538_s0 + $0xc0] sm:$0xff]  ;;  %v1447_v6 = vcombine.low %v68_v58, %v72_v59 }
  0x14   :  { %1567 = vmatpush3.bf16.msra.mxu0 %v1832_v18  ;;  %v1855_v63 = vld [vmem:[%s2537_s1 + $0x128] sm:$0xff]   ;;  %v79_v4 = vld [vmem:[%s2538_s0 + $0xe0] sm:$0xff]  ;;  %v1862_v18 = vld [vmem:[%s2537_s1 + $0x158] sm:$0xff]  }
  0x15   :  { %1631 = vmatpush3.bf16.msra.mxu1 %v1833_v19  ;;  %1568 = vmatprep.subr.bf16.mxu0 %v1834_v20  ;;  %v1856_v0 = vld [vmem:[%s2537_s1 + $0x1e8] sm:$0xff]   ;;  %v1454_v7 = vcombine.high %v75_v3, %v79_v4  ;;  %v1858_v10 = vld [vmem:[%s2537_s1 + $0x160] sm:$0xff]   ;;  %v1453_v19 = vcombine.low %v75_v3, %v79_v4  ;;  %v1863_v20 = vld [vmem:[%s2537_s1 + $0x118] sm:$0xff]  }
  0x16   :  { %1632 = vmatprep.subr.bf16.mxu1 %v1835_v21  ;;  %v1857_v1 = vld [vmem:[%s2537_s1 + $0x1a8] sm:$0xff]   ;;  %v1859_v11 = vld [vmem:[%s2537_s1 + $0x120] sm:$0xff]  }
  0x17   :  { %v76_v5 = vld [vmem:[%s2538_s0 + $0xc8] sm:$0xff]  ;;  %v1860_v12 = vld [vmem:[%s2537_s1 + $0x1e0] sm:$0xff]  }
  0x18   :  { %1569 = vmatpush3.bf16.msra.mxu0 %v1836_v22  ;;  %v80_v8 = vld [vmem:[%s2538_s0 + $0xe8] sm:$0xff]  ;;  %v1861_v13 = vld [vmem:[%s2537_s1 + $0x1a0] sm:$0xff]  }
  0x19   :  { %1633 = vmatpush3.bf16.msra.mxu1 %v1837_v23  ;;  %1570 = vmatprep.subr.bf16.mxu0 %v1838_v24  ;;  %v1456_v9 = vcombine.high %v76_v5, %v80_v8  ;;  %v83_v14 = vld [vmem:[%s2538_s0 + $0x100] sm:$0xff]  ;;  %v84_v16 = vld [vmem:[%s2538_s0 + $0x108] sm:$0xff]  ;;  %v1455_v21 = vcombine.low %v76_v5, %v80_v8  ;;  %v1864_v23 = vld [vmem:[%s2537_s1 + $0x1d8] sm:$0xff]  }
  0x1a   :  { %1634 = vmatprep.subr.bf16.mxu1 %v1839_v25  ;;  %v87_v15 = vld [vmem:[%s2538_s0 + $0x120] sm:$0xff]  ;;  %v88_v17 = vld [vmem:[%s2538_s0 + $0x128] sm:$0xff]  ;;  %v1865_v25 = vld [vmem:[%s2537_s1 + $0x198] sm:$0xff]  }
  0x1b   :  { %v1462_v22 = vcombine.high %v83_v14, %v87_v15  ;;  %v1464_v24 = vcombine.high %v84_v16, %v88_v17  ;;  %v1461_v34 = vcombine.low %v83_v14, %v87_v15  ;;  %v1871_v39 = vld [vmem:[%s2537_s1 + $0x108] sm:$0xff]   ;;  %v1875_v48 = vld [vmem:[%s2537_s1 + $0x100] sm:$0xff]   ;;  %v62_v8 = vld [vmem:[%s2538_s0 + $0x58] sm:$0xff] }
  0x1c   :  { %1571 = vmatpush3.bf16.msra.mxu0 %v1840_v26  ;;  %v91_v26 = vld [vmem:[%s2538_s0 + $0x140] sm:$0xff]  ;;  %v100_v44 = vld [vmem:[%s2538_s0 + $0x188] sm:$0xff]  ;;  %v69_v14 = vld [vmem:[%s2538_s0 + $0x90] sm:$0xff] }
  0x1d   :  { %1635 = vmatpush3.bf16.msra.mxu1 %v1841_v27  ;;  %1572 = vmatprep.subr.bf16.mxu0 %v1842_v28  ;;  %v95_v27 = vld [vmem:[%s2538_s0 + $0x160] sm:$0xff]  ;;  %v1866_v28 = vld [vmem:[%s2537_s1 + $0x150] sm:$0xff]   ;;  %v104_v45 = vld [vmem:[%s2538_s0 + $0x1a8] sm:$0xff] }
  0x1e   :  { %1636 = vmatprep.subr.bf16.mxu1 %v1843_v29  ;;  %v92_v29 = vld [vmem:[%s2538_s0 + $0x148] sm:$0xff]  ;;  %v1470_v36 = vcombine.high %v91_v26, %v95_v27  ;;  %v1469_v47 = vcombine.low %v91_v26, %v95_v27  ;;  %v1479_v59 = vcombine.low %v100_v44, %v104_v45  ;;  %v73_v15 = vld [vmem:[%s2538_s0 + $0xb0] sm:$0xff] }
  0x1f   :  { %v108_v56 = vld [vmem:[%s2538_s0 + $0x1c8] sm:$0xff]  ;;  %v1449_v26 = vcombine.low %v69_v14, %v73_v15 }
  0x20   :  { %1573 = vmatpush3.bf16.msra.mxu0 %v1844_v30  ;;  %v96_v30 = vld [vmem:[%s2538_s0 + $0x168] sm:$0xff] }
  0x21   :  { %1637 = vmatpush3.bf16.msra.mxu1 %v1845_v31  ;;  %1686 = vmatprep.subr.bf16.mxu0 %v1846_v40  ;;  %v1867_v31 = vld [vmem:[%s2537_s1 + $0x110] sm:$0xff]   ;;  %v1472_v37 = vcombine.high %v92_v29, %v96_v30  ;;  %v1872_v40 = vld [vmem:[%s2537_s1 + $0x1c8] sm:$0xff]  }
  0x22   :  { %1750 = vmatprep.subr.bf16.mxu1 %v1848_v42  ;;  %v103_v42 = vld [vmem:[%s2538_s0 + $0x1a0] sm:$0xff]  ;;  %v112_v57 = vld [vmem:[%s2538_s0 + $0x1e8] sm:$0xff] }
  0x23   :  { %980 = vmatmul.mubr.bf16.vlgmr.msra.gmra.mxu0 %v1429_v35  ;;  %v1463_v35 = vcombine.low %v84_v16, %v88_v17  ;;  %v1487_v3 = vcombine.low %v108_v56, %v112_v57  ;;  %v70_v16 = vld [vmem:[%s2538_s0 + $0x98] sm:$0xff] }
  0x24   :  { %1077 = vmatmul.mubr.bf16.vlgmr.msra.gmra.mxu1 %v1431_v38  ;;  %1687 = vmatpush3.bf16.msra.mxu0 %v1847_v41  ;;  %v1870_v38 = vld [vmem:[%s2537_s1 + $0x148] sm:$0xff]   ;;  %v99_v41 = vld [vmem:[%s2538_s0 + $0x180] sm:$0xff]  ;;  %v74_v17 = vld [vmem:[%s2538_s0 + $0xb8] sm:$0xff] }
  0x25   :  { %1751 = vmatpush3.bf16.msra.mxu1 %v1849_v43  ;;  %987 = vmatprep.mubr.bf16.mxu0 %v1438_v46  ;;  %v1873_v43 = vld [vmem:[%s2537_s1 + $0x188] sm:$0xff]   ;;  %v1874_v46 = vld [vmem:[%s2537_s1 + $0x140] sm:$0xff]   ;;  %v1477_v58 = vcombine.low %v99_v41, %v103_v42  ;;  %v1451_v27 = vcombine.low %v70_v16, %v74_v17 }
  0x26   :  { %1084 = vmatprep.mubr.bf16.mxu1 %v1440_v49  ;;  %1688 = vmatprep.subr.bf16.mxu0 %v1850_v50  ;;  %v1471_v49 = vcombine.low %v92_v29, %v96_v30  ;;  %v1478_v50 = vcombine.high %v99_v41, %v103_v42  ;;  %v85_v30 = vld [vmem:[%s2538_s0 + $0x110] sm:$0xff]  ;;  %v98_v41 = vld [vmem:[%s2538_s0 + $0x178] sm:$0xff] }
  0x27   :  { %1752 = vmatprep.subr.bf16.mxu1 %v1852_v54  ;;  %v107_v54 = vld [vmem:[%s2538_s0 + $0x1c0] sm:$0xff] }
  0x28   :  { %1689 = vmatpush3.bf16.msra.mxu0 %v1851_v52  ;;  %v1480_v52 = vcombine.high %v100_v44, %v104_v45 }
  0x29   :  { %1753 = vmatpush3.bf16.msra.mxu1 %v1853_v55  ;;  %1690 = vmatprep.subr.bf16.mxu0 %v1854_v62  ;;  %v111_v55 = vld [vmem:[%s2538_s0 + $0x1e0] sm:$0xff]  ;;  %v53_v62 = vld [vmem:[%s2538_s0 + $0x10] sm:$0xff] }
  0x2a   :  { %1754 = vmatprep.subr.bf16.mxu1 %v1856_v0  ;;  %v54_v0 = vld [vmem:[%s2538_s0 + $0x18] sm:$0xff] }
  0x2b   :  { %988 = vmatmul.mubr.bf16.gmra.mxu0 %v1437_v51  ;;  %v1876_v51 = vld [vmem:[%s2537_s1 + $0x1c0] sm:$0xff]  }
  0x2c   :  { %1085 = vmatmul.mubr.bf16.gmra.mxu1 %v1439_v53  ;;  %995 = vmatprep.mubr.bf16.mxu0 %v1446_v60  ;;  %v1877_v53 = vld [vmem:[%s2537_s1 + $0x180] sm:$0xff]   ;;  %v1486_v60 = vcombine.high %v107_v54, %v111_v55 }
  0x2d   :  { %1092 = vmatprep.mubr.bf16.mxu1 %v1448_v61  ;;  %1691 = vmatpush3.bf16.msra.mxu0 %v1855_v63  ;;  %v1488_v61 = vcombine.high %v108_v56, %v112_v57  ;;  %v57_v63 = vld [vmem:[%s2538_s0 + $0x30] sm:$0xff]  ;;  %v110_v56 = vld [vmem:[%s2538_s0 + $0x1d8] sm:$0xff] }
  0x2e   :  { %1755 = vmatpush3.bf16.msra.mxu1 %v1857_v1  ;;  %1692 = vmatprep.subr.bf16.mxu0 %v1858_v10  ;;  %v58_v1 = vld [vmem:[%s2538_s0 + $0x38] sm:$0xff]  ;;  %v1434_v4 = vcombine.high %v53_v62, %v57_v63  ;;  %v1433_v10 = vcombine.low %v53_v62, %v57_v63 }
  0x2f   :  { %1756 = vmatprep.subr.bf16.mxu1 %v1860_v12  ;;  %v1436_v5 = vcombine.high %v54_v0, %v58_v1  ;;  %v114_v57 = vld [vmem:[%s2538_s0 + $0x1f8] sm:$0xff] }
  0x30   :  { %v1491_v63 = vcombine.low %v110_v56, %v114_v57 }
  0x31   :  { %1693 = vmatpush3.bf16.msra.mxu0 %v1859_v11  ;;  %v1435_v11 = vcombine.low %v54_v0, %v58_v1 }
  0x32   :  { %1757 = vmatpush3.bf16.msra.mxu1 %v1861_v13  ;;  %1694 = vmatprep.subr.bf16.mxu0 %v1862_v18 }
  0x33   :  { %996 = vmatmul.mubr.bf16.gmra.mxu0 %v1445_v2  ;;  %1758 = vmatprep.subr.bf16.mxu1 %v1864_v23  ;;  %v1485_v2 = vcombine.low %v107_v54, %v111_v55  ;;  %v81_v23 = vld [vmem:[%s2538_s0 + $0xf0] sm:$0xff] }
  0x34   :  { %1093 = vmatmul.mubr.bf16.gmra.mxu1 %v1447_v6  ;;  %1003 = vmatprep.mubr.bf16.mxu0 %v1454_v7  ;;  %v61_v6 = vld [vmem:[%s2538_s0 + $0x50] sm:$0xff] }
  0x35   :  { %1100 = vmatprep.mubr.bf16.mxu1 %v1456_v9  ;;  %1695 = vmatpush3.bf16.msra.mxu0 %v1863_v20  ;;  %v65_v7 = vld [vmem:[%s2538_s0 + $0x70] sm:$0xff]  ;;  %v66_v9 = vld [vmem:[%s2538_s0 + $0x78] sm:$0xff]  ;;  %v1450_v20 = vcombine.high %v69_v14, %v73_v15 }
  0x36   :  { %1759 = vmatpush3.bf16.msra.mxu1 %v1865_v25  ;;  %1696 = vmatprep.subr.bf16.mxu0 %v1866_v28  ;;  %v1442_v12 = vcombine.high %v61_v6, %v65_v7  ;;  %v1444_v13 = vcombine.high %v62_v8, %v66_v9  ;;  %v1441_v18 = vcombine.low %v61_v6, %v65_v7  ;;  %v82_v25 = vld [vmem:[%s2538_s0 + $0xf8] sm:$0xff]  ;;  %v109_v54 = vld [vmem:[%s2538_s0 + $0x1d0] sm:$0xff] }
  0x37   :  { %1760 = vmatprep.subr.bf16.mxu1 %v1868_v32  ;;  %v86_v32 = vld [vmem:[%s2538_s0 + $0x118] sm:$0xff]  ;;  %v113_v55 = vld [vmem:[%s2538_s0 + $0x1f0] sm:$0xff] }
  0x38   :  { %v1489_v62 = vcombine.low %v109_v54, %v113_v55 }
  0x39   :  { %1697 = vmatpush3.bf16.msra.mxu0 %v1867_v31  ;;  %v89_v31 = vld [vmem:[%s2538_s0 + $0x130] sm:$0xff] }
  0x3a   :  { %1761 = vmatpush3.bf16.msra.mxu1 %v1869_v33  ;;  %1698 = vmatprep.subr.bf16.mxu0 %v1870_v38  ;;  %v90_v33 = vld [vmem:[%s2538_s0 + $0x138] sm:$0xff]  ;;  %v93_v38 = vld [vmem:[%s2538_s0 + $0x150] sm:$0xff]  ;;  %v1465_v42 = vcombine.low %v85_v30, %v89_v31 }
  0x3b   :  { %1004 = vmatmul.mubr.bf16.gmra.mxu0 %v1453_v19  ;;  %1762 = vmatprep.subr.bf16.mxu1 %v1872_v40  ;;  %v1443_v19 = vcombine.low %v62_v8, %v66_v9  ;;  %v94_v40 = vld [vmem:[%s2538_s0 + $0x158] sm:$0xff] }
  0x3c   :  { %1101 = vmatmul.mubr.bf16.gmra.mxu1 %v1455_v21  ;;  %1011 = vmatprep.mubr.bf16.mxu0 %v1462_v22  ;;  %v1452_v21 = vcombine.high %v70_v16, %v74_v17  ;;  %v77_v22 = vld [vmem:[%s2538_s0 + $0xd0] sm:$0xff]  ;;  %v1476_v45 = vcombine.high %v94_v40, %v98_v41 }
  0x3d   :  { %1108 = vmatprep.mubr.bf16.mxu1 %v1464_v24  ;;  %1699 = vmatpush3.bf16.msra.mxu0 %v1871_v39  ;;  %v78_v24 = vld [vmem:[%s2538_s0 + $0xd8] sm:$0xff]  ;;  %v1458_v28 = vcombine.high %v77_v22, %v81_v23  ;;  %v97_v39 = vld [vmem:[%s2538_s0 + $0x170] sm:$0xff] }
  0x3e   :  { %1763 = vmatpush3.bf16.msra.mxu1 %v1873_v43  ;;  %1700 = vmatprep.subr.bf16.mxu0 %v1874_v46  ;;  %v1460_v29 = vcombine.high %v78_v24, %v82_v25  ;;  %v1467_v43 = vcombine.low %v86_v32, %v90_v33  ;;  %v1474_v44 = vcombine.high %v93_v38, %v97_v39  ;;  %v101_v46 = vld [vmem:[%s2538_s0 + $0x190] sm:$0xff] }
  0x3f   :  { %1764 = vmatprep.subr.bf16.mxu1 %v1876_v51  ;;  %v1475_v51 = vcombine.low %v94_v40, %v98_v41 }
  0x41   :  { %1701 = vmatpush3.bf16.msra.mxu0 %v1875_v48  ;;  %v102_v48 = vld [vmem:[%s2538_s0 + $0x198] sm:$0xff] }
  0x42   :  { %1765 = vmatpush3.bf16.msra.mxu1 %v1877_v53 }
  0x43   :  { %1012 = vmatmul.mubr.bf16.gmra.mxu0 %v1461_v34  ;;  %v1457_v34 = vcombine.low %v77_v22, %v81_v23 }
  0x44   :  { %1109 = vmatmul.mubr.bf16.gmra.mxu1 %v1463_v35  ;;  %1019 = vmatprep.mubr.bf16.mxu0 %v1470_v36  ;;  %v1459_v35 = vcombine.low %v78_v24, %v82_v25  ;;  %v1466_v36 = vcombine.high %v85_v30, %v89_v31 }
  0x45   :  { %1116 = vmatprep.mubr.bf16.mxu1 %v1472_v37  ;;  %v1468_v37 = vcombine.high %v86_v32, %v90_v33 }
  0x4b   :  { %1020 = vmatmul.mubr.bf16.gmra.mxu0 %v1469_v47  ;;  %v105_v47 = vld [vmem:[%s2538_s0 + $0x1b0] sm:$0xff] }
  0x4c   :  { %1117 = vmatmul.mubr.bf16.gmra.mxu1 %v1471_v49  ;;  %1027 = vmatprep.mubr.bf16.mxu0 %v1478_v50  ;;  %v106_v49 = vld [vmem:[%s2538_s0 + $0x1b8] sm:$0xff]  ;;  %v1473_v50 = vcombine.low %v93_v38, %v97_v39 }
  0x4d   :  { %1124 = vmatprep.mubr.bf16.mxu1 %v1480_v52  ;;  %v1482_v52 = vcombine.high %v101_v46, %v105_v47  ;;  %v1484_v53 = vcombine.high %v102_v48, %v106_v49 }
  0x53   :  { %1028 = vmatmul.mubr.bf16.gmra.mxu0 %v1477_v58  ;;  %v1481_v58 = vcombine.low %v101_v46, %v105_v47 }
  0x54   :  { %1125 = vmatmul.mubr.bf16.gmra.mxu1 %v1479_v59  ;;  %1035 = vmatprep.mubr.bf16.mxu0 %v1486_v60  ;;  %v1483_v59 = vcombine.low %v102_v48, %v106_v49  ;;  %v1490_v60 = vcombine.high %v109_v54, %v113_v55 }
  0x55   :  { %1132 = vmatprep.mubr.bf16.mxu1 %v1488_v61  ;;  %v1492_v61 = vcombine.high %v110_v56, %v114_v57 }
  0x5b   :  { %1036 = vmatmul.mubr.bf16.gmra.mxu0 %v1485_v2 }
  0x5c   :  { %1133 = vmatmul.mubr.bf16.gmra.mxu1 %v1487_v3  ;;  %1173 = vmatprep.mubr.bf16.mxu0 %v1434_v4 }
  0x5d   :  { %1270 = vmatprep.mubr.bf16.mxu1 %v1436_v5 }
  0x63   :  { %1174 = vmatmul.mubr.bf16.vlgmr.msra.gmra.mxu0 %v1433_v10 }
  0x64   :  { %1271 = vmatmul.mubr.bf16.vlgmr.msra.gmra.mxu1 %v1435_v11  ;;  %1181 = vmatprep.mubr.bf16.mxu0 %v1442_v12 }
  0x65   :  { %1278 = vmatprep.mubr.bf16.mxu1 %v1444_v13 }
  0x6b   :  { %1182 = vmatmul.mubr.bf16.gmra.mxu0 %v1441_v18 }
  0x6c   :  { %1279 = vmatmul.mubr.bf16.gmra.mxu1 %v1443_v19  ;;  %1189 = vmatprep.mubr.bf16.mxu0 %v1450_v20 }
  0x6d   :  { %1286 = vmatprep.mubr.bf16.mxu1 %v1452_v21 }
  0x73   :  { %1190 = vmatmul.mubr.bf16.gmra.mxu0 %v1449_v26 }
  0x74   :  { %1287 = vmatmul.mubr.bf16.gmra.mxu1 %v1451_v27  ;;  %1197 = vmatprep.mubr.bf16.mxu0 %v1458_v28 }
  0x75   :  { %1294 = vmatprep.mubr.bf16.mxu1 %v1460_v29 }
  0x7b   :  { %1198 = vmatmul.mubr.bf16.gmra.mxu0 %v1457_v34 }
  0x7c   :  { %1295 = vmatmul.mubr.bf16.gmra.mxu1 %v1459_v35  ;;  %1205 = vmatprep.mubr.bf16.mxu0 %v1466_v36 }
  0x7d   :  { %1302 = vmatprep.mubr.bf16.mxu1 %v1468_v37 }
  0x83   :  { %1206 = vmatmul.mubr.bf16.gmra.mxu0 %v1465_v42 }
  0x84   :  { %1303 = vmatmul.mubr.bf16.gmra.mxu1 %v1467_v43  ;;  %1213 = vmatprep.mubr.bf16.mxu0 %v1474_v44 }
  0x85   :  { %1310 = vmatprep.mubr.bf16.mxu1 %v1476_v45 }
  0x8b   :  { %1214 = vmatmul.mubr.bf16.gmra.mxu0 %v1473_v50 }
  0x8c   :  { %1311 = vmatmul.mubr.bf16.gmra.mxu1 %v1475_v51  ;;  %1221 = vmatprep.mubr.bf16.mxu0 %v1482_v52 }
  0x8d   :  { %1318 = vmatprep.mubr.bf16.mxu1 %v1484_v53 }
  0x93   :  { %1222 = vmatmul.mubr.bf16.gmra.mxu0 %v1481_v58 }
  0x94   :  { %1319 = vmatmul.mubr.bf16.gmra.mxu1 %v1483_v59  ;;  %1229 = vmatprep.mubr.bf16.mxu0 %v1490_v60 }
  0x95   :  { %1326 = vmatprep.mubr.bf16.mxu1 %v1492_v61 }
  0x9b   :  { %1230 = vmatmul.mubr.bf16.gmra.mxu0 %v1489_v62 }
  0x9c   :  { %1327 = vmatmul.mubr.bf16.gmra.mxu1 %v1491_v63 }
  0xe3   :  { %v2282_v0 = vpop.f32.mrf.mxu0 }
  0xe4   :  { %v2284_v1 = vpop.f32.mrf.mxu1 }
  0xe5   :  { %v1575_v2 = vpop.f32.mrf.mxu0 }
  0xe6   :  { %v1639_v3 = vpop.f32.mrf.mxu1  ;;  %v1576_v63 = vadd.f32 %v1575_v2, %v2282_v0 }
  0xe7   :  { %v2286_v4 = vpop.f32.mrf.mxu0 }
  0xe8   :  { %v2288_v5 = vpop.f32.mrf.mxu1 }
  0xe9   :  { %v2290_v6 = vpop.f32.mrf.mxu0 }
  0xea   :  { %v2292_v7 = vpop.f32.mrf.mxu1 }
  0xeb   :  { %v2294_v8 = vpop.f32.mrf.mxu0 }
  0xec   :  { %v2296_v9 = vpop.f32.mrf.mxu1 }
  0xed   :  { %v2298_v10 = vpop.f32.mrf.mxu0 }
  0xee   :  { %v2300_v11 = vpop.f32.mrf.mxu1 }
  0xef   :  { %v2302_v12 = vpop.f32.mrf.mxu0  ;;  %v1646_v2 = vadd.f32 %v2300_v11, %v2296_v9 }
  0xf0   :  { %v2304_v13 = vpop.f32.mrf.mxu1 }
  0xf1   :  { %v2306_v14 = vpop.f32.mrf.mxu0 }
  0xf2   :  { %v2308_v15 = vpop.f32.mrf.mxu1  ;;  %v1585_v9 = vadd.f32 %v2306_v14, %v2302_v12 }
  0xf3   :  { %v2310_v16 = vpop.f32.mrf.mxu0  ;;  %v1649_v11 = vadd.f32 %v2308_v15, %v2304_v13 }
  0xf4   :  { %v2312_v17 = vpop.f32.mrf.mxu1 }
  0xf5   :  { %v2314_v18 = vpop.f32.mrf.mxu0  ;;  %v1090_v14 = vadd.f32 %v1649_v11, %v1585_v9 }
  0xf6   :  { %v2316_v19 = vpop.f32.mrf.mxu1 }
  0xf7   :  { %v2318_v20 = vpop.f32.mrf.mxu0  ;;  %v1652_v12 = vadd.f32 %v2316_v19, %v2312_v17 }
  0xf8   :  { %v2320_v21 = vpop.f32.mrf.mxu1 }
  0xf9   :  { %v2322_v22 = vpop.f32.mrf.mxu0 }
  0xfa   :  { %v2324_v23 = vpop.f32.mrf.mxu1  ;;  %v1591_v17 = vadd.f32 %v2322_v22, %v2318_v20 }
  0xfb   :  { %v2326_v24 = vpop.f32.mrf.mxu0 }
  0xfc   :  { %v2328_v25 = vpop.f32.mrf.mxu1 }
  0xfd   :  { %v2330_v26 = vpop.f32.mrf.mxu0 }
  0xfe   :  { %v2332_v27 = vpop.f32.mrf.mxu1 }
  0xff   :  { %v2334_v28 = vpop.f32.mrf.mxu0  ;;  %v1658_v20 = vadd.f32 %v2332_v27, %v2328_v25 }
 0x100   :  { %v2336_v29 = vpop.f32.mrf.mxu1 }
 0x101   :  { %v2338_v30 = vpop.f32.mrf.mxu0 }
 0x102   :  { %v2340_v31 = vpop.f32.mrf.mxu1  ;;  %v1597_v25 = vadd.f32 %v2338_v30, %v2334_v28 }
 0x103   :  { %v2342_v32 = vpop.f32.mrf.mxu0 }
 0x104   :  { %v2344_v33 = vpop.f32.mrf.mxu1 }
 0x105   :  { %v2346_v34 = vpop.f32.mrf.mxu0 }
 0x106   :  { %v2348_v35 = vpop.f32.mrf.mxu1 }
 0x107   :  { %v2350_v36 = vpop.f32.mrf.mxu0  ;;  %v1664_v28 = vadd.f32 %v2348_v35, %v2344_v33 }
 0x108   :  { %v2352_v37 = vpop.f32.mrf.mxu1 }
 0x109   :  { %v2354_v38 = vpop.f32.mrf.mxu0 }
 0x10a   :  { %v2356_v39 = vpop.f32.mrf.mxu1  ;;  %v1603_v33 = vadd.f32 %v2354_v38, %v2350_v36 }
 0x10b   :  { %v2358_v40 = vpop.f32.mrf.mxu0 }
 0x10c   :  { %v2360_v41 = vpop.f32.mrf.mxu1 }
 0x10d   :  { %v2362_v42 = vpop.f32.mrf.mxu0 }
 0x10e   :  { %v2364_v43 = vpop.f32.mrf.mxu1 }
 0x10f   :  { %v2366_v44 = vpop.f32.mrf.mxu0  ;;  %v1670_v36 = vadd.f32 %v2364_v43, %v2360_v41 }
 0x110   :  { %v2368_v45 = vpop.f32.mrf.mxu1 }
 0x111   :  { %v2370_v46 = vpop.f32.mrf.mxu0 }
 0x112   :  { %v2372_v47 = vpop.f32.mrf.mxu1  ;;  %v1609_v41 = vadd.f32 %v2370_v46, %v2366_v44 }
 0x113   :  { %v2374_v48 = vpop.f32.mrf.mxu0 }
 0x114   :  { %v2376_v49 = vpop.f32.mrf.mxu1 }
 0x115   :  { %2541 = vst [vmem:[#allocation3_spill] sm:$0xff] %v2376_v49  ;;  %v2378_v50 = vpop.f32.mrf.mxu0 }
 0x116   :  { %v2380_v51 = vpop.f32.mrf.mxu1 }
 0x117   :  { %2542 = vst [vmem:[#allocation4_spill] sm:$0xff] %v2380_v51  ;;  %v2382_v52 = vpop.f32.mrf.mxu0 }
 0x118   :  { %2543 = vst [vmem:[#allocation5_spill] sm:$0xff] %v2382_v52  ;;  %v2384_v53 = vpop.f32.mrf.mxu1 }
 0x119   :  { %2544 = vst [vmem:[#allocation6_spill] sm:$0xff] %v2384_v53  ;;  %v2386_v54 = vpop.f32.mrf.mxu0  ;;  %v1640_v53 = vadd.f32 %v1639_v3, %v2284_v1  ;;  %v1582_v1 = vadd.f32 %v2298_v10, %v2294_v8  ;;  %v2419_v3 = vld [vmem:[%s2539_s2] ss:$0 sm:$0xff] }
 0x11a   :  { %2545 = vst [vmem:[#allocation7_spill] sm:$0xff] %v2386_v54  ;;  %v2388_v55 = vpop.f32.mrf.mxu1 }
 0x11b   :  { %2546 = vst [vmem:[#allocation8_spill] sm:$0xff] %v2388_v55  ;;  %v2390_v56 = vpop.f32.mrf.mxu0  ;;  %v1087_v8 = vadd.f32 %v1646_v2, %v1582_v1  ;;  %v1588_v1 = vadd.f32 %v2314_v18, %v2310_v16  ;;  %v1655_v18 = vadd.f32 %v2324_v23, %v2320_v21 }
 0x11c   :  { %2547 = vst [vmem:[#allocation9_spill] sm:$0xff] %v2390_v56  ;;  %v2392_v57 = vpop.f32.mrf.mxu1  ;;  %v2554_v44 = vld [vmem:[#allocation3_spill] sm:$0xff] }
 0x11d   :  { %2548 = vst [vmem:[#allocation10_spill] sm:$0xff] %v2392_v57  ;;  %v2394_v58 = vpop.f32.mrf.mxu0  ;;  %v1079_v57 = vadd.f32 %v1640_v53, %v1576_v63  ;;  %v1098_v22 = vadd.f32 %v1655_v18, %v1591_v17 }
 0x11e   :  { %2549 = vst [vmem:[#allocation11_spill] sm:$0xff] %v2394_v58  ;;  %v2396_v59 = vpop.f32.mrf.mxu1  ;;  %v1579_v58 = vadd.f32 %v2290_v6, %v2286_v4  ;;  %v2555_v46 = vld [vmem:[#allocation4_spill] sm:$0xff] }
 0x11f   :  { %2550 = vst [vmem:[#allocation12_spill] sm:$0xff] %v2396_v59  ;;  %v2398_v60 = vpop.f32.mrf.mxu0 }
 0x120   :  { %2551 = vst [vmem:[#allocation13_spill] sm:$0xff] %v2398_v60  ;;  %v2400_v61 = vpop.f32.mrf.mxu1  ;;  %v1643_v60 = vadd.f32 %v2292_v7, %v2288_v5 }
 0x121   :  { %2552 = vst [vmem:[#allocation14_spill] sm:$0xff] %v2400_v61  ;;  %v2402_v62 = vpop.f32.mrf.mxu0 }
 0x122   :  { %2553 = vst [vmem:[#allocation15_spill] sm:$0xff] %v2402_v62  ;;  %v2406_v54 = vpop.f32.mrf.mxu1  ;;  %v1082_v6 = vadd.f32 %v1643_v60, %v1579_v58 }
 0x123   :  { %v1702_v55 = vpop.f32.mrf.mxu0 }
 0x124   :  { %v1766_v56 = vpop.f32.mrf.mxu1 }
 0x125   :  { %v1703_v52 = vpop.f32.mrf.mxu0 }
 0x126   :  { %v1704_v59 = vadd.f32 %v1703_v52, %v1702_v55  ;;  %v1767_v61 = vpop.f32.mrf.mxu1 }
 0x127   :  { %v1705_v51 = vpop.f32.mrf.mxu0  ;;  %v1768_v49 = vadd.f32 %v1767_v61, %v1766_v56 }
 0x128   :  { %v1176_v62 = vadd.f32 %v1704_v59, %v1079_v57  ;;  %v1769_v0 = vpop.f32.mrf.mxu1 }
 0x129   :  { %v1706_v4 = vpop.f32.mrf.mxu0 }
 0x12a   :  { %v1273_v5 = vadd.f32 %v1768_v49, %v1176_v62  ;;  %v1707_v7 = vadd.f32 %v1706_v4, %v1705_v51  ;;  %v1770_v52 = vpop.f32.mrf.mxu1 }
 0x12b   :  { %v1708_v53 = vpop.f32.mrf.mxu0  ;;  %v1771_v57 = vadd.f32 %v1770_v52, %v1769_v0 }
 0x12c   :  { %v1393_v55 = vadd.f32 %v2419_v3, %v1273_v5  ;;  %v1179_v56 = vadd.f32 %v1707_v7, %v1082_v6  ;;  %v1772_v59 = vpop.f32.mrf.mxu1 }
 0x12d   :  { %v1709_v10 = vpop.f32.mrf.mxu0 }
 0x12e   :  { %1409 = vst [vmem:[%s2540_s3] sm:$0xff] %v1393_v55  ;;  %v1276_v49 = vadd.f32 %v1771_v57, %v1179_v56  ;;  %v1710_v51 = vadd.f32 %v1709_v10, %v1708_v53  ;;  %v1773_v58 = vpop.f32.mrf.mxu1  ;;  %v1095_v55 = vadd.f32 %v1652_v12, %v1588_v1 }
 0x12f   :  { %v1711_v60 = vpop.f32.mrf.mxu0  ;;  %v1774_v63 = vadd.f32 %v1773_v58, %v1772_v59 }
 0x130   :  { %v1394_v61 = vadd.f32 %v2419_v3, %v1276_v49  ;;  %v1184_v62 = vadd.f32 %v1710_v51, %v1087_v8  ;;  %v1775_v0 = vpop.f32.mrf.mxu1  ;;  %v1594_v49 = vadd.f32 %v2330_v26, %v2326_v24  ;;  %v1661_v26 = vadd.f32 %v2340_v31, %v2336_v29 }
 0x131   :  { %v1712_v13 = vpop.f32.mrf.mxu0 }
 0x132   :  { %1410 = vst [vmem:[%s2540_s3 + $0x8] sm:$0xff] %v1394_v61  ;;  %v1281_v15 = vadd.f32 %v1774_v63, %v1184_v62  ;;  %v1713_v2 = vadd.f32 %v1712_v13, %v1711_v60  ;;  %v1776_v4 = vpop.f32.mrf.mxu1  ;;  %v1103_v1 = vadd.f32 %v1658_v20, %v1594_v49  ;;  %v1106_v30 = vadd.f32 %v1661_v26, %v1597_v25 }
 0x133   :  { %v1714_v6 = vpop.f32.mrf.mxu0  ;;  %v1777_v52 = vadd.f32 %v1776_v4, %v1775_v0  ;;  %v1606_v49 = vadd.f32 %v2362_v42, %v2358_v40  ;;  %v1673_v42 = vadd.f32 %v2372_v47, %v2368_v45 }
 0x134   :  { %v1395_v5 = vadd.f32 %v2419_v3, %v1281_v15  ;;  %v1187_v7 = vadd.f32 %v1713_v2, %v1090_v14  ;;  %v1778_v53 = vpop.f32.mrf.mxu1 }
 0x135   :  { %v1715_v16 = vpop.f32.mrf.mxu0  ;;  %v1122_v47 = vadd.f32 %v1673_v42, %v1609_v41 }
 0x136   :  { %1411 = vst [vmem:[%s2540_s3 + $0x10] sm:$0xff] %v1395_v5  ;;  %v1284_v19 = vadd.f32 %v1777_v52, %v1187_v7  ;;  %v1716_v56 = vadd.f32 %v1715_v16, %v1714_v6  ;;  %v1779_v57 = vpop.f32.mrf.mxu1  ;;  %v1600_v5 = vadd.f32 %v2346_v34, %v2342_v32  ;;  %v1667_v34 = vadd.f32 %v2356_v39, %v2352_v37 }
 0x137   :  { %v1717_v59 = vpop.f32.mrf.mxu0  ;;  %v1780_v9 = vadd.f32 %v1779_v57, %v1778_v53 }
 0x138   :  { %v1396_v8 = vadd.f32 %v2419_v3, %v1284_v19  ;;  %v1192_v10 = vadd.f32 %v1716_v56, %v1095_v55  ;;  %v1781_v11 = vpop.f32.mrf.mxu1  ;;  %v1111_v19 = vadd.f32 %v1664_v28, %v1600_v5  ;;  %v1114_v38 = vadd.f32 %v1667_v34, %v1603_v33 }
 0x139   :  { %v1718_v21 = vpop.f32.mrf.mxu0 }
 0x13a   :  { %1412 = vst [vmem:[%s2540_s3 + $0x18] sm:$0xff] %v1396_v8  ;;  %v1289_v23 = vadd.f32 %v1780_v9, %v1192_v10  ;;  %v1719_v51 = vadd.f32 %v1718_v21, %v1717_v59  ;;  %v1782_v58 = vpop.f32.mrf.mxu1 }
 0x13b   :  { %v1720_v60 = vpop.f32.mrf.mxu0  ;;  %v1783_v63 = vadd.f32 %v1782_v58, %v1781_v11 }
 0x13c   :  { %v1397_v61 = vadd.f32 %v2419_v3, %v1289_v23  ;;  %v1195_v62 = vadd.f32 %v1719_v51, %v1098_v22  ;;  %v1784_v0 = vpop.f32.mrf.mxu1 }
 0x13d   :  { %v1721_v24 = vpop.f32.mrf.mxu0 }
 0x13e   :  { %1413 = vst [vmem:[%s2540_s3 + $0x20] sm:$0xff] %v1397_v61  ;;  %v1292_v27 = vadd.f32 %v1783_v63, %v1195_v62  ;;  %v1722_v12 = vadd.f32 %v1721_v24, %v1720_v60  ;;  %v1785_v13 = vpop.f32.mrf.mxu1  ;;  %v1119_v61 = vadd.f32 %v1670_v36, %v1606_v49 }
 0x13f   :  { %v1723_v14 = vpop.f32.mrf.mxu0  ;;  %v1786_v4 = vadd.f32 %v1785_v13, %v1784_v0 }
 0x140   :  { %v1398_v15 = vadd.f32 %v2419_v3, %v1292_v27  ;;  %v1200_v2 = vadd.f32 %v1722_v12, %v1103_v1  ;;  %v1787_v6 = vpop.f32.mrf.mxu1  ;;  %v1612_v27 = vadd.f32 %v2378_v50, %v2374_v48  ;;  %v1676_v12 = vadd.f32 %v2555_v46, %v2554_v44  ;;  %v2556_v50 = vld [vmem:[#allocation5_spill] sm:$0xff] }
 0x141   :  { %v1724_v29 = vpop.f32.mrf.mxu0 }
 0x142   :  { %1414 = vst [vmem:[%s2540_s3 + $0x28] sm:$0xff] %v1398_v15  ;;  %v1297_v31 = vadd.f32 %v1786_v4, %v1200_v2  ;;  %v1725_v7 = vadd.f32 %v1724_v29, %v1723_v14  ;;  %v1788_v52 = vpop.f32.mrf.mxu1  ;;  %v1127_v29 = vadd.f32 %v1676_v12, %v1612_v27 }
 0x143   :  { %v1726_v53 = vpop.f32.mrf.mxu0  ;;  %v1789_v17 = vadd.f32 %v1788_v52, %v1787_v6  ;;  %v2559_v52 = vld [vmem:[#allocation8_spill] sm:$0xff] }
 0x144   :  { %v1399_v55 = vadd.f32 %v2419_v3, %v1297_v31  ;;  %v1203_v16 = vadd.f32 %v1725_v7, %v1106_v30  ;;  %v1790_v18 = vpop.f32.mrf.mxu1  ;;  %v2557_v30 = vld [vmem:[#allocation7_spill] sm:$0xff]  ;;  %v2558_v7 = vld [vmem:[#allocation6_spill] sm:$0xff] }
 0x145   :  { %v1727_v32 = vpop.f32.mrf.mxu0  ;;  %v1615_v31 = vadd.f32 %v2557_v30, %v2556_v50 }
 0x146   :  { %1415 = vst [vmem:[%s2540_s3 + $0x30] sm:$0xff] %v1399_v55  ;;  %v1300_v35 = vadd.f32 %v1789_v17, %v1203_v16  ;;  %v1728_v56 = vadd.f32 %v1727_v32, %v1726_v53  ;;  %v1791_v57 = vpop.f32.mrf.mxu1  ;;  %v1679_v53 = vadd.f32 %v2559_v52, %v2558_v7 }
 0x147   :  { %v1729_v59 = vpop.f32.mrf.mxu0  ;;  %v1792_v9 = vadd.f32 %v1791_v57, %v1790_v18 }
 0x148   :  { %v1400_v8 = vadd.f32 %v2419_v3, %v1300_v35  ;;  %v1208_v10 = vadd.f32 %v1728_v56, %v1111_v19  ;;  %v1793_v11 = vpop.f32.mrf.mxu1  ;;  %v2560_v35 = vld [vmem:[#allocation9_spill] sm:$0xff]  ;;  %v2561_v56 = vld [vmem:[#allocation11_spill] sm:$0xff] }
 0x149   :  { %v1730_v37 = vpop.f32.mrf.mxu0  ;;  %v1618_v57 = vadd.f32 %v2561_v56, %v2560_v35 }
 0x14a   :  { %1416 = vst [vmem:[%s2540_s3 + $0x38] sm:$0xff] %v1400_v8  ;;  %v1305_v39 = vadd.f32 %v1792_v9, %v1208_v10  ;;  %v1731_v20 = vadd.f32 %v1730_v37, %v1729_v59  ;;  %v1794_v21 = vpop.f32.mrf.mxu1  ;;  %v2562_v59 = vld [vmem:[#allocation10_spill] sm:$0xff]  ;;  %v2563_v8 = vld [vmem:[#allocation12_spill] sm:$0xff] }
 0x14b   :  { %v1732_v22 = vpop.f32.mrf.mxu0  ;;  %v1795_v58 = vadd.f32 %v1794_v21, %v1793_v11  ;;  %v1682_v10 = vadd.f32 %v2563_v8, %v2562_v59  ;;  %v1130_v11 = vadd.f32 %v1679_v53, %v1615_v31 }
 0x14c   :  { %v1401_v23 = vadd.f32 %v2419_v3, %v1305_v39  ;;  %v1211_v51 = vadd.f32 %v1731_v20, %v1114_v38  ;;  %v1796_v60 = vpop.f32.mrf.mxu1 }
 0x14d   :  { %v1733_v40 = vpop.f32.mrf.mxu0 }
 0x14e   :  { %1417 = vst [vmem:[%s2540_s3 + $0x40] sm:$0xff] %v1401_v23  ;;  %v1308_v43 = vadd.f32 %v1795_v58, %v1211_v51  ;;  %v1734_v62 = vadd.f32 %v1733_v40, %v1732_v22  ;;  %v1797_v63 = vpop.f32.mrf.mxu1  ;;  %v1135_v23 = vadd.f32 %v1682_v10, %v1618_v57  ;;  %v2564_v58 = vld [vmem:[#allocation13_spill] sm:$0xff]  ;;  %v2566_v40 = vld [vmem:[#allocation14_spill] sm:$0xff] }
 0x14f   :  { %v1735_v0 = vpop.f32.mrf.mxu0  ;;  %v1798_v25 = vadd.f32 %v1797_v63, %v1796_v60  ;;  %v2565_v60 = vld [vmem:[#allocation15_spill] sm:$0xff]  ;;  %v1685_v41 = vadd.f32 %v2406_v54, %v2566_v40 }
 0x150   :  { %v1402_v1 = vadd.f32 %v2419_v3, %v1308_v43  ;;  %v1216_v24 = vadd.f32 %v1734_v62, %v1119_v61  ;;  %v1799_v26 = vpop.f32.mrf.mxu1  ;;  %v1621_v61 = vadd.f32 %v2565_v60, %v2564_v58 }
 0x151   :  { %v1736_v45 = vpop.f32.mrf.mxu0 }
 0x152   :  { %1418 = vst [vmem:[%s2540_s3 + $0x48] sm:$0xff] %v1402_v1  ;;  %v1313_v13 = vadd.f32 %v1798_v25, %v1216_v24  ;;  %v1737_v14 = vadd.f32 %v1736_v45, %v1735_v0  ;;  %v1800_v15 = vpop.f32.mrf.mxu1  ;;  %v1138_v27 = vadd.f32 %v1685_v41, %v1621_v61 }
 0x153   :  { %v1738_v2 = vpop.f32.mrf.mxu0  ;;  %v1801_v5 = vadd.f32 %v1800_v15, %v1799_v26 }
 0x154   :  { %v1403_v4 = vadd.f32 %v2419_v3, %v1313_v13  ;;  %v1219_v6 = vadd.f32 %v1737_v14, %v1122_v47  ;;  %v1802_v28 = vpop.f32.mrf.mxu1 }
 0x155   :  { %v1739_v48 = vpop.f32.mrf.mxu0 }
 0x156   :  { %1419 = vst [vmem:[%s2540_s3 + $0x50] sm:$0xff] %v1403_v4  ;;  %v1316_v55 = vadd.f32 %v1801_v5, %v1219_v6  ;;  %v1740_v16 = vadd.f32 %v1739_v48, %v1738_v2  ;;  %v1803_v17 = vpop.f32.mrf.mxu1 }
 0x157   :  { %v1741_v18 = vpop.f32.mrf.mxu0  ;;  %v1804_v33 = vadd.f32 %v1803_v17, %v1802_v28 }
 0x158   :  { %v1404_v19 = vadd.f32 %v2419_v3, %v1316_v55  ;;  %v1224_v32 = vadd.f32 %v1740_v16, %v1127_v29  ;;  %v1805_v34 = vpop.f32.mrf.mxu1 }
 0x159   :  { %v1742_v9 = vpop.f32.mrf.mxu0 }
 0x15a   :  { %1420 = vst [vmem:[%s2540_s3 + $0x58] sm:$0xff] %v1404_v19  ;;  %v1321_v49 = vadd.f32 %v1804_v33, %v1224_v32  ;;  %v1743_v36 = vadd.f32 %v1742_v9, %v1741_v18  ;;  %v1806_v37 = vpop.f32.mrf.mxu1 }
 0x15b   :  { %v1744_v38 = vpop.f32.mrf.mxu0  ;;  %v1807_v21 = vadd.f32 %v1806_v37, %v1805_v34 }
 0x15c   :  { %v1405_v39 = vadd.f32 %v2419_v3, %v1321_v49  ;;  %v1227_v20 = vadd.f32 %v1743_v36, %v1130_v11  ;;  %v1808_v22 = vpop.f32.mrf.mxu1 }
 0x15d   :  { %v1745_v51 = vpop.f32.mrf.mxu0 }
 0x15e   :  { %1421 = vst [vmem:[%s2540_s3 + $0x60] sm:$0xff] %v1405_v39  ;;  %v1324_v42 = vadd.f32 %v1807_v21, %v1227_v20  ;;  %v1746_v43 = vadd.f32 %v1745_v51, %v1744_v38  ;;  %v1809_v62 = vpop.f32.mrf.mxu1 }
 0x15f   :  { %v1747_v63 = vpop.f32.mrf.mxu0  ;;  %v1810_v24 = vadd.f32 %v1809_v62, %v1808_v22 }
 0x160   :  { %v1406_v0 = vadd.f32 %v2419_v3, %v1324_v42  ;;  %v1232_v1 = vadd.f32 %v1746_v43, %v1135_v23  ;;  %v1811_v25 = vpop.f32.mrf.mxu1 }
 0x161   :  { %v1748_v26 = vpop.f32.mrf.mxu0 }
 0x162   :  { %1422 = vst [vmem:[%s2540_s3 + $0x68] sm:$0xff] %v1406_v0  ;;  %v1329_v54 = vadd.f32 %v1810_v24, %v1232_v1  ;;  %v1749_v44 = vadd.f32 %v1748_v26, %v1747_v63  ;;  %v1812_v46 = vpop.f32.mrf.mxu1 }
 0x163   :  { %v1813_v47 = vadd.f32 %v1812_v46, %v1811_v25 }
 0x164   :  { %v1407_v12 = vadd.f32 %v2419_v3, %v1329_v54  ;;  %v1235_v45 = vadd.f32 %v1749_v44, %v1138_v27 }
 0x166   :  { %1423 = vst [vmem:[%s2540_s3 + $0x70] sm:$0xff] %v1407_v12  ;;  %v1332_v13 = vadd.f32 %v1813_v47, %v1235_v45 }
 0x168   :  { %v1408_v14 = vadd.f32 %v2419_v3, %v1332_v13 }
 0x16a   :  { %1424 = vst [vmem:[%s2540_s3 + $0x78] sm:$0xff] %v1408_v14 }

</bundles_post_ra>
